<compile_context>
chip_gen: v6e
topology: v6e:2x2x1
jax: 0.10.0
libtpu: 0.0.40
codegen_flags: <defaults>
</compile_context>

<pallas_src>
import math
import functools

import numpy as np
import jax
import jax.numpy as jnp
from jax.experimental import pallas as pl
from jax.experimental.pallas import tpu as pltpu

# ----------------------------- configuration (small) -----------------------------
BATCH = 2
IN_CH = 4
IMG = 16
PATCH = 4
OVERLAP = 0.5
EMBED = 32
HEADS = 4
SP_HEADS = max(1, HEADS // 2)
LAYERS = 2
MLP_RATIO = 2.0

STRIDE = max(1, int(PATCH * (1 - OVERLAP)))       # effective_stride = 2
PPS = (IMG - PATCH) // STRIDE + 1                 # patches_per_side = 7
NPATCH = PPS * PPS                                # 49
S_PAD = ((NPATCH + 7) // 8) * 8                   # 56 (sublane-aligned sequence length)
PATCH_DIM = IN_CH * PATCH * PATCH                 # 64
OUT_CH = IN_CH
MLP_HIDDEN = int(EMBED * MLP_RATIO)               # 64

# TODO(synk): the 5-D (B, C, D, H, W) volumetric input path of the PyTorch forward is not
# implemented; this script covers the 4-D NCHW path.

# ----------------------------- static geometry constants -----------------------------

def _neighbor_matrix():
    """Spatial 8-neighbour weighted average expressed as a (S_PAD, S_PAD) linear operator."""
    A = np.zeros((S_PAD, S_PAD), np.float32)
    for i in range(PPS):
        for j in range(PPS):
            n = i * PPS + j
            A[n, n] += 1.0
            wsum = 1.0
            for di in (-1, 0, 1):
                for dj in (-1, 0, 1):
                    if di == 0 and dj == 0:
                        continue
                    ni, nj = i + di, j + dj
                    if 0 <= ni < PPS and 0 <= nj < PPS:
                        w = 0.5 if abs(di) + abs(dj) == 2 else 1.0
                        A[n, ni * PPS + nj] += w
                        wsum += w
            A[n, :] /= wsum
    return jnp.asarray(A)


def _overlap_weight_mask():
    wm = np.zeros((IMG, IMG), np.float32)
    for i in range(PPS):
        for j in range(PPS):
            wm[i * STRIDE:i * STRIDE + PATCH, j * STRIDE:j * STRIDE + PATCH] += 1.0
    return jnp.asarray(np.maximum(wm, 1.0))[None, None]


NEIGHBOR_MAT = _neighbor_matrix()
WEIGHT_MASK = _overlap_weight_mask()

_G1 = np.exp(-((np.arange(3, dtype=np.float32) - 1.0) ** 2) / (2.0 * 0.8 ** 2))
_G1 = _G1 / _G1.sum()
GAUSS2D = np.outer(_G1, _G1).astype(np.float32)

_SQRT1_2 = 0.7071067811865476

# ================================ in-kernel helpers ================================

def _ln(x, g, b):
    mu = jnp.mean(x, axis=-1, keepdims=True)
    var = jnp.mean((x - mu) ** 2, axis=-1, keepdims=True)
    return (x - mu) * jax.lax.rsqrt(var + 1e-5) * g + b          # PyTorch LayerNorm eps


def _gelu(x):                                                     # exact erf GELU (nn.GELU)
    return 0.5 * x * (1.0 + jax.lax.erf(x * _SQRT1_2))


def _softmax_rows(s):
    m = jnp.max(s, axis=-1, keepdims=True)
    p = jnp.exp(s - m)
    return p * pl.reciprocal(jnp.sum(p, axis=-1, keepdims=True), approx=True)


def _heads_attention(q, k, v, num_heads, valid_keys):
    """q, k, v: (S, D) projected (q already pre-scaled). Returns per-head concat (S, D)."""
    S, D = q.shape
    dh = D // num_heads
    kmask = jax.lax.broadcasted_iota(jnp.int32, (S, S), 1) < valid_keys
    outs = []
    for h in range(num_heads):
        qh = q[:, h * dh:(h + 1) * dh]
        kh = k[:, h * dh:(h + 1) * dh]
        vh = v[:, h * dh:(h + 1) * dh]
        s = jax.lax.dot_general(qh, kh, (((1,), (1,)), ((), ())),
                                preferred_element_type=jnp.float32)
        s = jnp.where(kmask, s, -1e30)                            # mask padded keys
        p = _softmax_rows(s)
        outs.append(jnp.dot(p, vh, preferred_element_type=jnp.float32))
    return jnp.concatenate(outs, axis=-1)


# ================================ fused Pallas kernels ================================

def _embed_kernel(p_ref, w_ref, b_ref, pos_ref, o_ref):
    """patch-embed conv (as matmul) + bias + positional embedding."""
    o_ref[...] = (jnp.dot(p_ref[...], w_ref[...], preferred_element_type=jnp.float32)
                  + b_ref[...] + pos_ref[...])


def _self_attn_kernel(x_ref, g_ref, b_ref, wqkv_ref, bqkv_ref, wo_ref, bo_ref, o_ref,
                      *, num_heads, valid_keys):
    """x + MHA(LN(x)): LayerNorm -> fused QKV -> all-heads SDPA -> out proj -> residual."""
    x = x_ref[...]
    xn = _ln(x, g_ref[...], b_ref[...])
    qkv = jnp.dot(xn, wqkv_ref[...], preferred_element_type=jnp.float32) + bqkv_ref[...]
    D = x.shape[-1]
    attn = _heads_attention(qkv[:, :D], qkv[:, D:2 * D], qkv[:, 2 * D:],
                            num_heads, valid_keys)
    o_ref[...] = x + (jnp.dot(attn, wo_ref[...], preferred_element_type=jnp.float32)
                      + bo_ref[...])


def _spatial_attn_kernel(x_ref, g_ref, b_ref, nmat_ref, wq_ref, bq_ref, wkv_ref, bkv_ref,
                         wo_ref, bo_ref, o_ref, *, num_heads, valid_keys, alpha):
    """x + 0.5 * MHA(q=LN(x), kv=neighbors(LN(x))); neighbors = constant matrix matmul."""
    x = x_ref[...]
    xs = _ln(x, g_ref[...], b_ref[...])
    nb = jnp.dot(nmat_ref[...], xs, preferred_element_type=jnp.float32)   # spatial neighbors
    q = jnp.dot(xs, wq_ref[...], preferred_element_type=jnp.float32) + bq_ref[...]
    kv = jnp.dot(nb, wkv_ref[...], preferred_element_type=jnp.float32) + bkv_ref[...]
    D = x.shape[-1]
    attn = _heads_attention(q, kv[:, :D], kv[:, D:], num_heads, valid_keys)
    o_ref[...] = x + alpha * (jnp.dot(attn, wo_ref[...], preferred_element_type=jnp.float32)
                              + bo_ref[...])


def _mlp_kernel(x_ref, g_ref, b_ref, w1_ref, b1_ref, w2_ref, b2_ref, o_ref):
    """x + W2(GELU(W1(LN(x)))); hidden activation never leaves VMEM."""
    x = x_ref[...]
    xn = _ln(x, g_ref[...], b_ref[...])
    h = _gelu(jnp.dot(xn, w1_ref[...], preferred_element_type=jnp.float32) + b1_ref[...])
    o_ref[...] = x + (jnp.dot(h, w2_ref[...], preferred_element_type=jnp.float32)
                      + b2_ref[...])


def _head_kernel(x_ref, g_ref, b_ref, w1_ref, b1_ref, w2_ref, b2_ref, o_ref):
    """final LN -> Linear+GELU -> Linear+Tanh reconstruction head."""
    xn = _ln(x_ref[...], g_ref[...], b_ref[...])
    h = _gelu(jnp.dot(xn, w1_ref[...], preferred_element_type=jnp.float32) + b1_ref[...])
    o_ref[...] = jnp.tanh(jnp.dot(h, w2_ref[...], preferred_element_type=jnp.float32)
                          + b2_ref[...])


# ================================ pallas_call wrappers ================================

def _seq_call(kernel, batch, out_feat, x, *operands):
    """Grid over the batch dim of a (batch*S_PAD, feat) sequence slab; every other operand
    (weights / LN params / constant matrices, all tiny) is loaded whole into VMEM."""
    in_specs = [pl.BlockSpec((S_PAD, x.shape[-1]), lambda i: (i, 0))]
    for op in operands:
        r, c = op.shape
        in_specs.append(pl.BlockSpec((r, c), lambda i: (0, 0)))
    return pl.pallas_call(
        kernel,
        out_shape=jax.ShapeDtypeStruct((batch * S_PAD, out_feat), jnp.float32),
        grid=(batch,),
        in_specs=in_specs,
        out_specs=pl.BlockSpec((S_PAD, out_feat), lambda i: (i, 0)),
        compiler_params=pltpu.CompilerParams(dimension_semantics=("parallel",)),
    )(x, *operands)


def spatial_block(p, h, batch):
    h = _seq_call(
        functools.partial(_self_attn_kernel, num_heads=HEADS, valid_keys=NPATCH),
        batch, EMBED, h,
        p["ln1_g"], p["ln1_b"], p["wqkv"], p["bqkv"], p["wo"], p["bo"])
    h = _seq_call(
        functools.partial(_spatial_attn_kernel, num_heads=SP_HEADS,
                          valid_keys=NPATCH, alpha=0.5),
        batch, EMBED, h,
        p["sln_g"], p["sln_b"], NEIGHBOR_MAT,
        p["swq"], p["sbq"], p["swkv"], p["sbkv"], p["swo"], p["sbo"])
    h = _seq_call(
        _mlp_kernel, batch, EMBED, h,
        p["ln2_g"], p["ln2_b"], p["m1_w"], p["m1_b"], p["m2_w"], p["m2_b"])
    return h


# ================================ JAX glue (epilogue / prologue) ================================

def extract_patches(x):
    """Strided im2col for the overlapping-patch conv; flat feature order = (C, kh, kw)."""
    B = x.shape[0]
    span = STRIDE * (PPS - 1) + 1
    cols = []
    for a in range(PATCH):
        for b in range(PATCH):
            cols.append(x[:, :, a:a + span:STRIDE, b:b + span:STRIDE])   # (B, C, PPS, PPS)
    p = jnp.stack(cols, axis=2).reshape(B, IN_CH, PATCH, PATCH, PPS, PPS)
    p = p.transpose(0, 4, 5, 1, 2, 3)                                    # (B, PPS, PPS, C, kh, kw)
    return p.reshape(B, NPATCH, PATCH_DIM)


def reconstruct_from_overlapping_patches(r, B, H, W):
    """Overlap-add via 4 static quadrant placements + constant weight mask."""
    span = PPS * STRIDE                                                  # 14
    out = jnp.zeros((B, OUT_CH, H, W), jnp.float32)
    for a in range(PATCH // STRIDE):
        for b in range(PATCH // STRIDE):
            quad = r[:, :, :, :, a * STRIDE:(a + 1) * STRIDE, b * STRIDE:(b + 1) * STRIDE]
            quad = quad.transpose(0, 3, 1, 4, 2, 5).reshape(B, OUT_CH, span, span)
            out = out + jnp.pad(
                quad, ((0, 0), (0, 0),
                       (a * STRIDE, H - span - a * STRIDE),
                       (b * STRIDE, W - span - b * STRIDE)))
    return out / WEIGHT_MASK


def smooth_reconstruction(x):
    B, C, H, W = x.shape
    xp = jnp.pad(x, ((0, 0), (0, 0), (1, 1), (1, 1)))
    sm = jnp.zeros_like(x)
    for di in range(3):
        for dj in range(3):
            sm = sm + float(GAUSS2D[di, dj]) * xp[:, :, di:di + H, dj:dj + W]
    return 0.7 * x + 0.3 * sm


# ================================ forward ================================

def vit_forward(params, x):
    B = x.shape[0]
    # patch embedding (im2col + fused matmul/bias/pos-embed kernel), seq padded 49 -> 56
    patches = extract_patches(x)
    patches = jnp.pad(patches, ((0, 0), (0, S_PAD - NPATCH), (0, 0)))
    patches = patches.reshape(B * S_PAD, PATCH_DIM)
    pos = jnp.pad(params["pos_embed"], ((0, S_PAD - NPATCH), (0, 0)))    # (S_PAD, EMBED)

    h = _seq_call(_embed_kernel, B, EMBED, patches,
                  params["pe_w"], params["pe_b"], pos)                   # pos_dropout = identity

    for blk in params["blocks"]:
        h = spatial_block(blk, h, B)

    r = _seq_call(_head_kernel, B, PATCH_DIM, h,
                  params["ln_g"], params["ln_b"],
                  params["r1_w"], params["r1_b"], params["r2_w"], params["r2_b"])

    r = r.reshape(B, S_PAD, PATCH_DIM)[:, :NPATCH, :]                    # drop padded rows
    r = r.reshape(B, PPS, PPS, OUT_CH, PATCH, PATCH)
    out = reconstruct_from_overlapping_patches(r, B, IMG, IMG)
    out = smooth_reconstruction(out)
    return out


# ================================ parameters ================================

def init_params(key):
    keys = iter(jax.random.split(key, 64))

    def nrm(shape):
        return 0.02 * jax.random.normal(next(keys), shape, jnp.float32)

    def zeros(shape):
        return jnp.zeros(shape, jnp.float32)

    def ones(shape):
        return jnp.ones(shape, jnp.float32)

    params = {}
    params["pe_w"] = nrm((PATCH_DIM, EMBED))                             # Conv2d as matmul
    params["pe_b"] = zeros((1, EMBED))
    params["pos_embed"] = nrm((NPATCH, EMBED))

    blocks = []
    for _ in range(LAYERS):
        b = {}
        b["ln1_g"], b["ln1_b"] = ones((1, EMBED)), zeros((1, EMBED))
        scale = 1.0 / math.sqrt(EMBED // HEADS)                          # folded into Wq / bq
        b["wqkv"] = jnp.concatenate(
            [nrm((EMBED, EMBED)) * scale, nrm((EMBED, EMBED)), nrm((EMBED, EMBED))], axis=1)
        b["bqkv"] = zeros((1, 3 * EMBED))
        b["wo"], b["bo"] = nrm((EMBED, EMBED)), zeros((1, EMBED))

        b["sln_g"], b["sln_b"] = ones((1, EMBED)), zeros((1, EMBED))
        sp_scale = 1.0 / math.sqrt(EMBED // SP_HEADS)
        b["swq"] = nrm((EMBED, EMBED)) * sp_scale
        b["sbq"] = zeros((1, EMBED))
        b["swkv"] = jnp.concatenate([nrm((EMBED, EMBED)), nrm((EMBED, EMBED))], axis=1)
        b["sbkv"] = zeros((1, 2 * EMBED))
        b["swo"], b["sbo"] = nrm((EMBED, EMBED)), zeros((1, EMBED))

        b["ln2_g"], b["ln2_b"] = ones((1, EMBED)), zeros((1, EMBED))
        b["m1_w"], b["m1_b"] = nrm((EMBED, MLP_HIDDEN)), zeros((1, MLP_HIDDEN))
        b["m2_w"], b["m2_b"] = nrm((MLP_HIDDEN, EMBED)), zeros((1, EMBED))
        blocks.append(b)
    params["blocks"] = blocks

    params["ln_g"], params["ln_b"] = ones((1, EMBED)), zeros((1, EMBED))
    params["r1_w"], params["r1_b"] = nrm((EMBED, 2 * EMBED)), zeros((1, 2 * EMBED))
    params["r2_w"], params["r2_b"] = nrm((2 * EMBED, PATCH_DIM)), zeros((1, PATCH_DIM))
    return params


# ================================ main ================================

if __name__ == "__main__":
    key = jax.random.PRNGKey(0)
    pkey, xkey = jax.random.split(key)
    params = init_params(pkey)
    x = jax.random.normal(xkey, (BATCH, IN_CH, IMG, IMG), jnp.float32)   # NCHW

    fwd = jax.jit(vit_forward)
    out = jax.block_until_ready(fwd(params, x))
    assert out.shape == (BATCH, OUT_CH, IMG, IMG), out.shape
    assert bool(jnp.all(jnp.isfinite(out)))
    print("KERNEL_OK")
</pallas_src>

<mosaic_0001>
module attributes {stable_mosaic.version = 11 : i64} {
  func.func @_embed_kernel(%arg0: i32, %arg1: memref<56x64xf32, #tpu.memory_space<vmem>>, %arg2: memref<64x32xf32, #tpu.memory_space<vmem>>, %arg3: memref<1x32xf32, #tpu.memory_space<vmem>>, %arg4: memref<56x32xf32, #tpu.memory_space<vmem>>, %arg5: memref<56x32xf32, #tpu.memory_space<vmem>>) attributes {dimension_semantics = [#tpu.dimension_semantics<parallel>], iteration_bounds = array<i64: 2>, scalar_prefetch = 0 : i64, scratch_operands = 0 : i64, tpu.core_type = #tpu.core_type<tc>, window_params = [{transform_indices = @transform_0, window_bounds = array<i64: 56, 64>}, {pipeline_mode = #tpu.pipeline_mode<synchronous>, transform_indices = @transform_1, window_bounds = array<i64: 64, 32>}, {pipeline_mode = #tpu.pipeline_mode<synchronous>, transform_indices = @transform_2, window_bounds = array<i64: 1, 32>}, {pipeline_mode = #tpu.pipeline_mode<synchronous>, transform_indices = @transform_3, window_bounds = array<i64: 56, 32>}, {transform_indices = @transform_4, window_bounds = array<i64: 56, 32>}]} {
    %c0 = arith.constant 0 : index
    %c0_0 = arith.constant 0 : index
    %0 = vector.load %arg1[%c0, %c0_0] : memref<56x64xf32, #tpu.memory_space<vmem>>, vector<56x64xf32>
    %c0_1 = arith.constant 0 : index
    %c0_2 = arith.constant 0 : index
    %1 = vector.load %arg2[%c0_1, %c0_2] : memref<64x32xf32, #tpu.memory_space<vmem>>, vector<64x32xf32>
    %cst = arith.constant dense<0.000000e+00> : vector<56x32xf32>
    %2 = tpu.matmul %0, %1, %cst {dimension_numbers = #tpu.dot_dimension_numbers<[1], [0], [0], [1], [0, 0, 1, 1], [], []>} : vector<56x64xf32>, vector<64x32xf32>, vector<56x32xf32> -> vector<56x32xf32>
    %c0_3 = arith.constant 0 : index
    %c0_4 = arith.constant 0 : index
    %3 = vector.load %arg3[%c0_3, %c0_4] : memref<1x32xf32, #tpu.memory_space<vmem>>, vector<1x32xf32>
    %4 = vector.broadcast %3 : vector<1x32xf32> to vector<56x32xf32>
    %5 = arith.addf %2, %4 : vector<56x32xf32>
    %c0_5 = arith.constant 0 : index
    %c0_6 = arith.constant 0 : index
    %6 = vector.load %arg4[%c0_5, %c0_6] : memref<56x32xf32, #tpu.memory_space<vmem>>, vector<56x32xf32>
    %7 = arith.addf %5, %6 : vector<56x32xf32>
    %c0_7 = arith.constant 0 : index
    %c0_8 = arith.constant 0 : index
    %8 = vector.load %arg5[%c0_7, %c0_8] : memref<56x32xf32, #tpu.memory_space<vmem>>, vector<56x32xf32>
    tpu.vector_store %arg5[%c0_7, %c0_8], %7 {strides = array<i32>} : memref<56x32xf32, #tpu.memory_space<vmem>>, vector<56x32xf32>,
    return
  }
  func.func @transform_0(%arg0: i32) -> (i32, i32) {
    %c0_i32 = arith.constant 0 : i32
    %c0_i32_0 = arith.constant 0 : i32
    return %arg0, %c0_i32 : i32, i32
  }
  func.func @transform_1(%arg0: i32) -> (i32, i32) {
    %c0_i32 = arith.constant 0 : i32
    %c0_i32_0 = arith.constant 0 : i32
    %c0_i32_1 = arith.constant 0 : i32
    return %c0_i32, %c0_i32_0 : i32, i32
  }
  func.func @transform_2(%arg0: i32) -> (i32, i32) {
    %c0_i32 = arith.constant 0 : i32
    %c0_i32_0 = arith.constant 0 : i32
    %c0_i32_1 = arith.constant 0 : i32
    return %c0_i32, %c0_i32_0 : i32, i32
  }
  func.func @transform_3(%arg0: i32) -> (i32, i32) {
    %c0_i32 = arith.constant 0 : i32
    %c0_i32_0 = arith.constant 0 : i32
    %c0_i32_1 = arith.constant 0 : i32
    return %c0_i32, %c0_i32_0 : i32, i32
  }
  func.func @transform_4(%arg0: i32) -> (i32, i32) {
    %c0_i32 = arith.constant 0 : i32
    %c0_i32_0 = arith.constant 0 : i32
    return %arg0, %c0_i32 : i32, i32
  }
}

module attributes {stable_mosaic.version = 11 : i64} {
  func.func @_self_attn_kernel(%arg0: i32, %arg1: memref<56x32xf32, #tpu.memory_space<vmem>>, %arg2: memref<1x32xf32, #tpu.memory_space<vmem>>, %arg3: memref<1x32xf32, #tpu.memory_space<vmem>>, %arg4: memref<32x96xf32, #tpu.memory_space<vmem>>, %arg5: memref<1x96xf32, #tpu.memory_space<vmem>>, %arg6: memref<32x32xf32, #tpu.memory_space<vmem>>, %arg7: memref<1x32xf32, #tpu.memory_space<vmem>>, %arg8: memref<56x32xf32, #tpu.memory_space<vmem>>) attributes {dimension_semantics = [#tpu.dimension_semantics<parallel>], iteration_bounds = array<i64: 2>, scalar_prefetch = 0 : i64, scratch_operands = 0 : i64, tpu.core_type = #tpu.core_type<tc>, window_params = [{transform_indices = @transform_0, window_bounds = array<i64: 56, 32>}, {pipeline_mode = #tpu.pipeline_mode<synchronous>, transform_indices = @transform_1, window_bounds = array<i64: 1, 32>}, {pipeline_mode = #tpu.pipeline_mode<synchronous>, transform_indices = @transform_2, window_bounds = array<i64: 1, 32>}, {pipeline_mode = #tpu.pipeline_mode<synchronous>, transform_indices = @transform_3, window_bounds = array<i64: 32, 96>}, {pipeline_mode = #tpu.pipeline_mode<synchronous>, transform_indices = @transform_4, window_bounds = array<i64: 1, 96>}, {pipeline_mode = #tpu.pipeline_mode<synchronous>, transform_indices = @transform_5, window_bounds = array<i64: 32, 32>}, {pipeline_mode = #tpu.pipeline_mode<synchronous>, transform_indices = @transform_6, window_bounds = array<i64: 1, 32>}, {transform_indices = @transform_7, window_bounds = array<i64: 56, 32>}]} {
    %c0 = arith.constant 0 : index
    %c0_0 = arith.constant 0 : index
    %0 = vector.load %arg1[%c0, %c0_0] : memref<56x32xf32, #tpu.memory_space<vmem>>, vector<56x32xf32>
    %c0_1 = arith.constant 0 : index
    %c0_2 = arith.constant 0 : index
    %1 = vector.load %arg2[%c0_1, %c0_2] : memref<1x32xf32, #tpu.memory_space<vmem>>, vector<1x32xf32>
    %c0_3 = arith.constant 0 : index
    %c0_4 = arith.constant 0 : index
    %2 = vector.load %arg3[%c0_3, %c0_4] : memref<1x32xf32, #tpu.memory_space<vmem>>, vector<1x32xf32>
    %cst = arith.constant dense<0.000000e+00> : vector<56xf32>
    %3 = vector.multi_reduction <add>, %0, %cst [1] : vector<56x32xf32> to vector<56xf32>
    %4 = vector.shape_cast %3 : vector<56xf32> to vector<56x1xf32>
    %cst_5 = arith.constant 3.200000e+01 : f32
    %5 = vector.broadcast %cst_5 : f32 to vector<56x1xf32>
    %6 = arith.divf %4, %5 : vector<56x1xf32>
    %7 = vector.broadcast %6 : vector<56x1xf32> to vector<56x32xf32>
    %8 = arith.subf %0, %7 : vector<56x32xf32>
    %9 = arith.mulf %8, %8 : vector<56x32xf32>
    %cst_6 = arith.constant dense<0.000000e+00> : vector<56xf32>
    %10 = vector.multi_reduction <add>, %9, %cst_6 [1] : vector<56x32xf32> to vector<56xf32>
    %11 = vector.shape_cast %10 : vector<56xf32> to vector<56x1xf32>
    %cst_7 = arith.constant 3.200000e+01 : f32
    %12 = vector.broadcast %cst_7 : f32 to vector<56x1xf32>
    %13 = arith.divf %11, %12 : vector<56x1xf32>
    %14 = vector.broadcast %6 : vector<56x1xf32> to vector<56x32xf32>
    %15 = arith.subf %0, %14 : vector<56x32xf32>
    %cst_8 = arith.constant 9.99999974E-6 : f32
    %16 = vector.broadcast %cst_8 : f32 to vector<56x1xf32>
    %17 = arith.addf %13, %16 : vector<56x1xf32>
    %18 = math.rsqrt %17 : vector<56x1xf32>
    %19 = vector.broadcast %18 : vector<56x1xf32> to vector<56x32xf32>
    %20 = arith.mulf %15, %19 : vector<56x32xf32>
    %21 = vector.broadcast %1 : vector<1x32xf32> to vector<56x32xf32>
    %22 = arith.mulf %20, %21 : vector<56x32xf32>
    %23 = vector.broadcast %2 : vector<1x32xf32> to vector<56x32xf32>
    %24 = arith.addf %22, %23 : vector<56x32xf32>
    %c0_9 = arith.constant 0 : index
    %c0_10 = arith.constant 0 : index
    %25 = vector.load %arg4[%c0_9, %c0_10] : memref<32x96xf32, #tpu.memory_space<vmem>>, vector<32x96xf32>
    %cst_11 = arith.constant dense<0.000000e+00> : vector<56x96xf32>
    %26 = tpu.matmul %24, %25, %cst_11 {dimension_numbers = #tpu.dot_dimension_numbers<[1], [0], [0], [1], [0, 0, 1, 1], [], []>} : vector<56x32xf32>, vector<32x96xf32>, vector<56x96xf32> -> vector<56x96xf32>
    %c0_12 = arith.constant 0 : index
    %c0_13 = arith.constant 0 : index
    %27 = vector.load %arg5[%c0_12, %c0_13] : memref<1x96xf32, #tpu.memory_space<vmem>>, vector<1x96xf32>
    %28 = vector.broadcast %27 : vector<1x96xf32> to vector<56x96xf32>
    %29 = arith.addf %26, %28 : vector<56x96xf32>
    %30 = vector.extract_strided_slice %29 {offsets = [0, 0], sizes = [56, 32], strides = [1, 1]} : vector<56x96xf32> to vector<56x32xf32>
    %31 = vector.extract_strided_slice %29 {offsets = [0, 32], sizes = [56, 32], strides = [1, 1]} : vector<56x96xf32> to vector<56x32xf32>
    %32 = vector.extract_strided_slice %29 {offsets = [0, 64], sizes = [56, 32], strides = [1, 1]} : vector<56x96xf32> to vector<56x32xf32>
    %33 = tpu.iota {dimensions = array<i32: 1>} : vector<56x56xi32>
    %c49_i32 = arith.constant 49 : i32
    %34 = vector.broadcast %c49_i32 : i32 to vector<56x56xi32>
    %35 = arith.cmpi slt, %33, %34 : vector<56x56xi32>
    %36 = vector.extract_strided_slice %30 {offsets = [0, 0], sizes = [56, 8], strides = [1, 1]} : vector<56x32xf32> to vector<56x8xf32>
    %37 = vector.extract_strided_slice %31 {offsets = [0, 0], sizes = [56, 8], strides = [1, 1]} : vector<56x32xf32> to vector<56x8xf32>
    %38 = vector.extract_strided_slice %32 {offsets = [0, 0], sizes = [56, 8], strides = [1, 1]} : vector<56x32xf32> to vector<56x8xf32>
    %cst_14 = arith.constant dense<0.000000e+00> : vector<56x56xf32>
    %39 = tpu.matmul %36, %37, %cst_14 {dimension_numbers = #tpu.dot_dimension_numbers<[1], [1], [0], [0], [0, 0, 1, 0], [], []>} : vector<56x8xf32>, vector<56x8xf32>, vector<56x56xf32> -> vector<56x56xf32>
    %cst_15 = arith.constant -1.000000e+30 : f32
    %40 = vector.broadcast %cst_15 : f32 to vector<56x56xf32>
    %41 = arith.select %35, %39, %40 : vector<56x56xi1>, vector<56x56xf32>
    %cst_16 = arith.constant dense<0xFF800000> : vector<56xf32>
    %42 = vector.multi_reduction <maximumf>, %41, %cst_16 [1] : vector<56x56xf32> to vector<56xf32>
    %43 = vector.shape_cast %42 : vector<56xf32> to vector<56x1xf32>
    %44 = vector.broadcast %43 : vector<56x1xf32> to vector<56x56xf32>
    %45 = arith.subf %41, %44 : vector<56x56xf32>
    %46 = math.exp %45 : vector<56x56xf32>
    %cst_17 = arith.constant dense<0.000000e+00> : vector<56xf32>
    %47 = vector.multi_reduction <add>, %46, %cst_17 [1] : vector<56x56xf32> to vector<56xf32>
    %48 = vector.shape_cast %47 : vector<56xf32> to vector<56x1xf32>
    %49 = tpu.reciprocal %48 {approx = true} : vector<56x1xf32> -> vector<56x1xf32>
    %50 = vector.broadcast %49 : vector<56x1xf32> to vector<56x56xf32>
    %51 = arith.mulf %46, %50 : vector<56x56xf32>
    %cst_18 = arith.constant dense<0.000000e+00> : vector<56x8xf32>
    %52 = tpu.matmul %51, %38, %cst_18 {dimension_numbers = #tpu.dot_dimension_numbers<[1], [0], [0], [1], [0, 0, 1, 1], [], []>} : vector<56x56xf32>, vector<56x8xf32>, vector<56x8xf32> -> vector<56x8xf32>
    %53 = vector.extract_strided_slice %30 {offsets = [0, 8], sizes = [56, 8], strides = [1, 1]} : vector<56x32xf32> to vector<56x8xf32>
    %54 = vector.extract_strided_slice %31 {offsets = [0, 8], sizes = [56, 8], strides = [1, 1]} : vector<56x32xf32> to vector<56x8xf32>
    %55 = vector.extract_strided_slice %32 {offsets = [0, 8], sizes = [56, 8], strides = [1, 1]} : vector<56x32xf32> to vector<56x8xf32>
    %cst_19 = arith.constant dense<0.000000e+00> : vector<56x56xf32>
    %56 = tpu.matmul %53, %54, %cst_19 {dimension_numbers = #tpu.dot_dimension_numbers<[1], [1], [0], [0], [0, 0, 1, 0], [], []>} : vector<56x8xf32>, vector<56x8xf32>, vector<56x56xf32> -> vector<56x56xf32>
    %cst_20 = arith.constant -1.000000e+30 : f32
    %57 = vector.broadcast %cst_20 : f32 to vector<56x56xf32>
    %58 = arith.select %35, %56, %57 : vector<56x56xi1>, vector<56x56xf32>
    %cst_21 = arith.constant dense<0xFF800000> : vector<56xf32>
    %59 = vector.multi_reduction <maximumf>, %58, %cst_21 [1] : vector<56x56xf32> to vector<56xf32>
    %60 = vector.shape_cast %59 : vector<56xf32> to vector<56x1xf32>
    %61 = vector.broadcast %60 : vector<56x1xf32> to vector<56x56xf32>
    %62 = arith.subf %58, %61 : vector<56x56xf32>
    %63 = math.exp %62 : vector<56x56xf32>
    %cst_22 = arith.constant dense<0.000000e+00> : vector<56xf32>
    %64 = vector.multi_reduction <add>, %63, %cst_22 [1] : vector<56x56xf32> to vector<56xf32>
    %65 = vector.shape_cast %64 : vector<56xf32> to vector<56x1xf32>
    %66 = tpu.reciprocal %65 {approx = true} : vector<56x1xf32> -> vector<56x1xf32>
    %67 = vector.broadcast %66 : vector<56x1xf32> to vector<56x56xf32>
    %68 = arith.mulf %63, %67 : vector<56x56xf32>
    %cst_23 = arith.constant dense<0.000000e+00> : vector<56x8xf32>
    %69 = tpu.matmul %68, %55, %cst_23 {dimension_numbers = #tpu.dot_dimension_numbers<[1], [0], [0], [1], [0, 0, 1, 1], [], []>} : vector<56x56xf32>, vector<56x8xf32>, vector<56x8xf32> -> vector<56x8xf32>
    %70 = vector.extract_strided_slice %30 {offsets = [0, 16], sizes = [56, 8], strides = [1, 1]} : vector<56x32xf32> to vector<56x8xf32>
    %71 = vector.extract_strided_slice %31 {offsets = [0, 16], sizes = [56, 8], strides = [1, 1]} : vector<56x32xf32> to vector<56x8xf32>
    %72 = vector.extract_strided_slice %32 {offsets = [0, 16], sizes = [56, 8], strides = [1, 1]} : vector<56x32xf32> to vector<56x8xf32>
    %cst_24 = arith.constant dense<0.000000e+00> : vector<56x56xf32>
    %73 = tpu.matmul %70, %71, %cst_24 {dimension_numbers = #tpu.dot_dimension_numbers<[1], [1], [0], [0], [0, 0, 1, 0], [], []>} : vector<56x8xf32>, vector<56x8xf32>, vector<56x56xf32> -> vector<56x56xf32>
    %cst_25 = arith.constant -1.000000e+30 : f32
    %74 = vector.broadcast %cst_25 : f32 to vector<56x56xf32>
    %75 = arith.select %35, %73, %74 : vector<56x56xi1>, vector<56x56xf32>
    %cst_26 = arith.constant dense<0xFF800000> : vector<56xf32>
    %76 = vector.multi_reduction <maximumf>, %75, %cst_26 [1] : vector<56x56xf32> to vector<56xf32>
    %77 = vector.shape_cast %76 : vector<56xf32> to vector<56x1xf32>
    %78 = vector.broadcast %77 : vector<56x1xf32> to vector<56x56xf32>
    %79 = arith.subf %75, %78 : vector<56x56xf32>
    %80 = math.exp %79 : vector<56x56xf32>
    %cst_27 = arith.constant dense<0.000000e+00> : vector<56xf32>
    %81 = vector.multi_reduction <add>, %80, %cst_27 [1] : vector<56x56xf32> to vector<56xf32>
    %82 = vector.shape_cast %81 : vector<56xf32> to vector<56x1xf32>
    %83 = tpu.reciprocal %82 {approx = true} : vector<56x1xf32> -> vector<56x1xf32>
    %84 = vector.broadcast %83 : vector<56x1xf32> to vector<56x56xf32>
    %85 = arith.mulf %80, %84 : vector<56x56xf32>
    %cst_28 = arith.constant dense<0.000000e+00> : vector<56x8xf32>
    %86 = tpu.matmul %85, %72, %cst_28 {dimension_numbers = #tpu.dot_dimension_numbers<[1], [0], [0], [1], [0, 0, 1, 1], [], []>} : vector<56x56xf32>, vector<56x8xf32>, vector<56x8xf32> -> vector<56x8xf32>
    %87 = vector.extract_strided_slice %30 {offsets = [0, 24], sizes = [56, 8], strides = [1, 1]} : vector<56x32xf32> to vector<56x8xf32>
    %88 = vector.extract_strided_slice %31 {offsets = [0, 24], sizes = [56, 8], strides = [1, 1]} : vector<56x32xf32> to vector<56x8xf32>
    %89 = vector.extract_strided_slice %32 {offsets = [0, 24], sizes = [56, 8], strides = [1, 1]} : vector<56x32xf32> to vector<56x8xf32>
    %cst_29 = arith.constant dense<0.000000e+00> : vector<56x56xf32>
    %90 = tpu.matmul %87, %88, %cst_29 {dimension_numbers = #tpu.dot_dimension_numbers<[1], [1], [0], [0], [0, 0, 1, 0], [], []>} : vector<56x8xf32>, vector<56x8xf32>, vector<56x56xf32> -> vector<56x56xf32>
    %cst_30 = arith.constant -1.000000e+30 : f32
    %91 = vector.broadcast %cst_30 : f32 to vector<56x56xf32>
    %92 = arith.select %35, %90, %91 : vector<56x56xi1>, vector<56x56xf32>
    %cst_31 = arith.constant dense<0xFF800000> : vector<56xf32>
    %93 = vector.multi_reduction <maximumf>, %92, %cst_31 [1] : vector<56x56xf32> to vector<56xf32>
    %94 = vector.shape_cast %93 : vector<56xf32> to vector<56x1xf32>
    %95 = vector.broadcast %94 : vector<56x1xf32> to vector<56x56xf32>
    %96 = arith.subf %92, %95 : vector<56x56xf32>
    %97 = math.exp %96 : vector<56x56xf32>
    %cst_32 = arith.constant dense<0.000000e+00> : vector<56xf32>
    %98 = vector.multi_reduction <add>, %97, %cst_32 [1] : vector<56x56xf32> to vector<56xf32>
    %99 = vector.shape_cast %98 : vector<56xf32> to vector<56x1xf32>
    %100 = tpu.reciprocal %99 {approx = true} : vector<56x1xf32> -> vector<56x1xf32>
    %101 = vector.broadcast %100 : vector<56x1xf32> to vector<56x56xf32>
    %102 = arith.mulf %97, %101 : vector<56x56xf32>
    %cst_33 = arith.constant dense<0.000000e+00> : vector<56x8xf32>
    %103 = tpu.matmul %102, %89, %cst_33 {dimension_numbers = #tpu.dot_dimension_numbers<[1], [0], [0], [1], [0, 0, 1, 1], [], []>} : vector<56x56xf32>, vector<56x8xf32>, vector<56x8xf32> -> vector<56x8xf32>
    %104 = tpu.concatenate %52, %69, %86, %103 in 1 : vector<56x8xf32>, vector<56x8xf32>, vector<56x8xf32>, vector<56x8xf32> -> vector<56x32xf32>
    %c0_34 = arith.constant 0 : index
    %c0_35 = arith.constant 0 : index
    %105 = vector.load %arg6[%c0_34, %c0_35] : memref<32x32xf32, #tpu.memory_space<vmem>>, vector<32x32xf32>
    %cst_36 = arith.constant dense<0.000000e+00> : vector<56x32xf32>
    %106 = tpu.matmul %104, %105, %cst_36 {dimension_numbers = #tpu.dot_dimension_numbers<[1], [0], [0], [1], [0, 0, 1, 1], [], []>} : vector<56x32xf32>, vector<32x32xf32>, vector<56x32xf32> -> vector<56x32xf32>
    %c0_37 = arith.constant 0 : index
    %c0_38 = arith.constant 0 : index
    %107 = vector.load %arg7[%c0_37, %c0_38] : memref<1x32xf32, #tpu.memory_space<vmem>>, vector<1x32xf32>
    %108 = vector.broadcast %107 : vector<1x32xf32> to vector<56x32xf32>
    %109 = arith.addf %106, %108 : vector<56x32xf32>
    %110 = arith.addf %0, %109 : vector<56x32xf32>
    %c0_39 = arith.constant 0 : index
    %c0_40 = arith.constant 0 : index
    %111 = vector.load %arg8[%c0_39, %c0_40] : memref<56x32xf32, #tpu.memory_space<vmem>>, vector<56x32xf32>
    tpu.vector_store %arg8[%c0_39, %c0_40], %110 {strides = array<i32>} : memref<56x32xf32, #tpu.memory_space<vmem>>, vector<56x32xf32>,
    return
  }
  func.func @transform_0(%arg0: i32) -> (i32, i32) {
    %c0_i32 = arith.constant 0 : i32
    %c0_i32_0 = arith.constant 0 : i32
    return %arg0, %c0_i32 : i32, i32
  }
  func.func @transform_1(%arg0: i32) -> (i32, i32) {
    %c0_i32 = arith.constant 0 : i32
    %c0_i32_0 = arith.constant 0 : i32
    %c0_i32_1 = arith.constant 0 : i32
    return %c0_i32, %c0_i32_0 : i32, i32
  }
  func.func @transform_2(%arg0: i32) -> (i32, i32) {
    %c0_i32 = arith.constant 0 : i32
    %c0_i32_0 = arith.constant 0 : i32
    %c0_i32_1 = arith.constant 0 : i32
    return %c0_i32, %c0_i32_0 : i32, i32
  }
  func.func @transform_3(%arg0: i32) -> (i32, i32) {
    %c0_i32 = arith.constant 0 : i32
    %c0_i32_0 = arith.constant 0 : i32
    %c0_i32_1 = arith.constant 0 : i32
    return %c0_i32, %c0_i32_0 : i32, i32
  }
  func.func @transform_4(%arg0: i32) -> (i32, i32) {
    %c0_i32 = arith.constant 0 : i32
    %c0_i32_0 = arith.constant 0 : i32
    %c0_i32_1 = arith.constant 0 : i32
    return %c0_i32, %c0_i32_0 : i32, i32
  }
  func.func @transform_5(%arg0: i32) -> (i32, i32) {
    %c0_i32 = arith.constant 0 : i32
    %c0_i32_0 = arith.constant 0 : i32
    %c0_i32_1 = arith.constant 0 : i32
    return %c0_i32, %c0_i32_0 : i32, i32
  }
  func.func @transform_6(%arg0: i32) -> (i32, i32) {
    %c0_i32 = arith.constant 0 : i32
    %c0_i32_0 = arith.constant 0 : i32
    %c0_i32_1 = arith.constant 0 : i32
    return %c0_i32, %c0_i32_0 : i32, i32
  }
  func.func @transform_7(%arg0: i32) -> (i32, i32) {
    %c0_i32 = arith.constant 0 : i32
    %c0_i32_0 = arith.constant 0 : i32
    return %arg0, %c0_i32 : i32, i32
  }
}

module attributes {stable_mosaic.version = 11 : i64} {
  func.func @_spatial_attn_kernel(%arg0: i32, %arg1: memref<56x32xf32, #tpu.memory_space<vmem>>, %arg2: memref<1x32xf32, #tpu.memory_space<vmem>>, %arg3: memref<1x32xf32, #tpu.memory_space<vmem>>, %arg4: memref<56x56xf32, #tpu.memory_space<vmem>>, %arg5: memref<32x32xf32, #tpu.memory_space<vmem>>, %arg6: memref<1x32xf32, #tpu.memory_space<vmem>>, %arg7: memref<32x64xf32, #tpu.memory_space<vmem>>, %arg8: memref<1x64xf32, #tpu.memory_space<vmem>>, %arg9: memref<32x32xf32, #tpu.memory_space<vmem>>, %arg10: memref<1x32xf32, #tpu.memory_space<vmem>>, %arg11: memref<56x32xf32, #tpu.memory_space<vmem>>) attributes {dimension_semantics = [#tpu.dimension_semantics<parallel>], iteration_bounds = array<i64: 2>, scalar_prefetch = 0 : i64, scratch_operands = 0 : i64, tpu.core_type = #tpu.core_type<tc>, window_params = [{transform_indices = @transform_0, window_bounds = array<i64: 56, 32>}, {pipeline_mode = #tpu.pipeline_mode<synchronous>, transform_indices = @transform_1, window_bounds = array<i64: 1, 32>}, {pipeline_mode = #tpu.pipeline_mode<synchronous>, transform_indices = @transform_2, window_bounds = array<i64: 1, 32>}, {pipeline_mode = #tpu.pipeline_mode<synchronous>, transform_indices = @transform_3, window_bounds = array<i64: 56, 56>}, {pipeline_mode = #tpu.pipeline_mode<synchronous>, transform_indices = @transform_4, window_bounds = array<i64: 32, 32>}, {pipeline_mode = #tpu.pipeline_mode<synchronous>, transform_indices = @transform_5, window_bounds = array<i64: 1, 32>}, {pipeline_mode = #tpu.pipeline_mode<synchronous>, transform_indices = @transform_6, window_bounds = array<i64: 32, 64>}, {pipeline_mode = #tpu.pipeline_mode<synchronous>, transform_indices = @transform_7, window_bounds = array<i64: 1, 64>}, {pipeline_mode = #tpu.pipeline_mode<synchronous>, transform_indices = @transform_8, window_bounds = array<i64: 32, 32>}, {pipeline_mode = #tpu.pipeline_mode<synchronous>, transform_indices = @transform_9, window_bounds = array<i64: 1, 32>}, {transform_indices = @transform_10, window_bounds = array<i64: 56, 32>}]} {
    %c0 = arith.constant 0 : index
    %c0_0 = arith.constant 0 : index
    %0 = vector.load %arg1[%c0, %c0_0] : memref<56x32xf32, #tpu.memory_space<vmem>>, vector<56x32xf32>
    %c0_1 = arith.constant 0 : index
    %c0_2 = arith.constant 0 : index
    %1 = vector.load %arg2[%c0_1, %c0_2] : memref<1x32xf32, #tpu.memory_space<vmem>>, vector<1x32xf32>
    %c0_3 = arith.constant 0 : index
    %c0_4 = arith.constant 0 : index
    %2 = vector.load %arg3[%c0_3, %c0_4] : memref<1x32xf32, #tpu.memory_space<vmem>>, vector<1x32xf32>
    %cst = arith.constant dense<0.000000e+00> : vector<56xf32>
    %3 = vector.multi_reduction <add>, %0, %cst [1] : vector<56x32xf32> to vector<56xf32>
    %4 = vector.shape_cast %3 : vector<56xf32> to vector<56x1xf32>
    %cst_5 = arith.constant 3.200000e+01 : f32
    %5 = vector.broadcast %cst_5 : f32 to vector<56x1xf32>
    %6 = arith.divf %4, %5 : vector<56x1xf32>
    %7 = vector.broadcast %6 : vector<56x1xf32> to vector<56x32xf32>
    %8 = arith.subf %0, %7 : vector<56x32xf32>
    %9 = arith.mulf %8, %8 : vector<56x32xf32>
    %cst_6 = arith.constant dense<0.000000e+00> : vector<56xf32>
    %10 = vector.multi_reduction <add>, %9, %cst_6 [1] : vector<56x32xf32> to vector<56xf32>
    %11 = vector.shape_cast %10 : vector<56xf32> to vector<56x1xf32>
    %cst_7 = arith.constant 3.200000e+01 : f32
    %12 = vector.broadcast %cst_7 : f32 to vector<56x1xf32>
    %13 = arith.divf %11, %12 : vector<56x1xf32>
    %14 = vector.broadcast %6 : vector<56x1xf32> to vector<56x32xf32>
    %15 = arith.subf %0, %14 : vector<56x32xf32>
    %cst_8 = arith.constant 9.99999974E-6 : f32
    %16 = vector.broadcast %cst_8 : f32 to vector<56x1xf32>
    %17 = arith.addf %13, %16 : vector<56x1xf32>
    %18 = math.rsqrt %17 : vector<56x1xf32>
    %19 = vector.broadcast %18 : vector<56x1xf32> to vector<56x32xf32>
    %20 = arith.mulf %15, %19 : vector<56x32xf32>
    %21 = vector.broadcast %1 : vector<1x32xf32> to vector<56x32xf32>
    %22 = arith.mulf %20, %21 : vector<56x32xf32>
    %23 = vector.broadcast %2 : vector<1x32xf32> to vector<56x32xf32>
    %24 = arith.addf %22, %23 : vector<56x32xf32>
    %c0_9 = arith.constant 0 : index
    %c0_10 = arith.constant 0 : index
    %25 = vector.load %arg4[%c0_9, %c0_10] : memref<56x56xf32, #tpu.memory_space<vmem>>, vector<56x56xf32>
    %cst_11 = arith.constant dense<0.000000e+00> : vector<56x32xf32>
    %26 = tpu.matmul %25, %24, %cst_11 {dimension_numbers = #tpu.dot_dimension_numbers<[1], [0], [0], [1], [0, 0, 1, 1], [], []>} : vector<56x56xf32>, vector<56x32xf32>, vector<56x32xf32> -> vector<56x32xf32>
    %c0_12 = arith.constant 0 : index
    %c0_13 = arith.constant 0 : index
    %27 = vector.load %arg5[%c0_12, %c0_13] : memref<32x32xf32, #tpu.memory_space<vmem>>, vector<32x32xf32>
    %cst_14 = arith.constant dense<0.000000e+00> : vector<56x32xf32>
    %28 = tpu.matmul %24, %27, %cst_14 {dimension_numbers = #tpu.dot_dimension_numbers<[1], [0], [0], [1], [0, 0, 1, 1], [], []>} : vector<56x32xf32>, vector<32x32xf32>, vector<56x32xf32> -> vector<56x32xf32>
    %c0_15 = arith.constant 0 : index
    %c0_16 = arith.constant 0 : index
    %29 = vector.load %arg6[%c0_15, %c0_16] : memref<1x32xf32, #tpu.memory_space<vmem>>, vector<1x32xf32>
    %30 = vector.broadcast %29 : vector<1x32xf32> to vector<56x32xf32>
    %31 = arith.addf %28, %30 : vector<56x32xf32>
    %c0_17 = arith.constant 0 : index
    %c0_18 = arith.constant 0 : index
    %32 = vector.load %arg7[%c0_17, %c0_18] : memref<32x64xf32, #tpu.memory_space<vmem>>, vector<32x64xf32>
    %cst_19 = arith.constant dense<0.000000e+00> : vector<56x64xf32>
    %33 = tpu.matmul %26, %32, %cst_19 {dimension_numbers = #tpu.dot_dimension_numbers<[1], [0], [0], [1], [0, 0, 1, 1], [], []>} : vector<56x32xf32>, vector<32x64xf32>, vector<56x64xf32> -> vector<56x64xf32>
    %c0_20 = arith.constant 0 : index
    %c0_21 = arith.constant 0 : index
    %34 = vector.load %arg8[%c0_20, %c0_21] : memref<1x64xf32, #tpu.memory_space<vmem>>, vector<1x64xf32>
    %35 = vector.broadcast %34 : vector<1x64xf32> to vector<56x64xf32>
    %36 = arith.addf %33, %35 : vector<56x64xf32>
    %37 = vector.extract_strided_slice %36 {offsets = [0, 0], sizes = [56, 32], strides = [1, 1]} : vector<56x64xf32> to vector<56x32xf32>
    %38 = vector.extract_strided_slice %36 {offsets = [0, 32], sizes = [56, 32], strides = [1, 1]} : vector<56x64xf32> to vector<56x32xf32>
    %39 = tpu.iota {dimensions = array<i32: 1>} : vector<56x56xi32>
    %c49_i32 = arith.constant 49 : i32
    %40 = vector.broadcast %c49_i32 : i32 to vector<56x56xi32>
    %41 = arith.cmpi slt, %39, %40 : vector<56x56xi32>
    %42 = vector.extract_strided_slice %31 {offsets = [0, 0], sizes = [56, 16], strides = [1, 1]} : vector<56x32xf32> to vector<56x16xf32>
    %43 = vector.extract_strided_slice %37 {offsets = [0, 0], sizes = [56, 16], strides = [1, 1]} : vector<56x32xf32> to vector<56x16xf32>
    %44 = vector.extract_strided_slice %38 {offsets = [0, 0], sizes = [56, 16], strides = [1, 1]} : vector<56x32xf32> to vector<56x16xf32>
    %cst_22 = arith.constant dense<0.000000e+00> : vector<56x56xf32>
    %45 = tpu.matmul %42, %43, %cst_22 {dimension_numbers = #tpu.dot_dimension_numbers<[1], [1], [0], [0], [0, 0, 1, 0], [], []>} : vector<56x16xf32>, vector<56x16xf32>, vector<56x56xf32> -> vector<56x56xf32>
    %cst_23 = arith.constant -1.000000e+30 : f32
    %46 = vector.broadcast %cst_23 : f32 to vector<56x56xf32>
    %47 = arith.select %41, %45, %46 : vector<56x56xi1>, vector<56x56xf32>
    %cst_24 = arith.constant dense<0xFF800000> : vector<56xf32>
    %48 = vector.multi_reduction <maximumf>, %47, %cst_24 [1] : vector<56x56xf32> to vector<56xf32>
    %49 = vector.shape_cast %48 : vector<56xf32> to vector<56x1xf32>
    %50 = vector.broadcast %49 : vector<56x1xf32> to vector<56x56xf32>
    %51 = arith.subf %47, %50 : vector<56x56xf32>
    %52 = math.exp %51 : vector<56x56xf32>
    %cst_25 = arith.constant dense<0.000000e+00> : vector<56xf32>
    %53 = vector.multi_reduction <add>, %52, %cst_25 [1] : vector<56x56xf32> to vector<56xf32>
    %54 = vector.shape_cast %53 : vector<56xf32> to vector<56x1xf32>
    %55 = tpu.reciprocal %54 {approx = true} : vector<56x1xf32> -> vector<56x1xf32>
    %56 = vector.broadcast %55 : vector<56x1xf32> to vector<56x56xf32>
    %57 = arith.mulf %52, %56 : vector<56x56xf32>
    %cst_26 = arith.constant dense<0.000000e+00> : vector<56x16xf32>
    %58 = tpu.matmul %57, %44, %cst_26 {dimension_numbers = #tpu.dot_dimension_numbers<[1], [0], [0], [1], [0, 0, 1, 1], [], []>} : vector<56x56xf32>, vector<56x16xf32>, vector<56x16xf32> -> vector<56x16xf32>
    %59 = vector.extract_strided_slice %31 {offsets = [0, 16], sizes = [56, 16], strides = [1, 1]} : vector<56x32xf32> to vector<56x16xf32>
    %60 = vector.extract_strided_slice %37 {offsets = [0, 16], sizes = [56, 16], strides = [1, 1]} : vector<56x32xf32> to vector<56x16xf32>
    %61 = vector.extract_strided_slice %38 {offsets = [0, 16], sizes = [56, 16], strides = [1, 1]} : vector<56x32xf32> to vector<56x16xf32>
    %cst_27 = arith.constant dense<0.000000e+00> : vector<56x56xf32>
    %62 = tpu.matmul %59, %60, %cst_27 {dimension_numbers = #tpu.dot_dimension_numbers<[1], [1], [0], [0], [0, 0, 1, 0], [], []>} : vector<56x16xf32>, vector<56x16xf32>, vector<56x56xf32> -> vector<56x56xf32>
    %cst_28 = arith.constant -1.000000e+30 : f32
    %63 = vector.broadcast %cst_28 : f32 to vector<56x56xf32>
    %64 = arith.select %41, %62, %63 : vector<56x56xi1>, vector<56x56xf32>
    %cst_29 = arith.constant dense<0xFF800000> : vector<56xf32>
    %65 = vector.multi_reduction <maximumf>, %64, %cst_29 [1] : vector<56x56xf32> to vector<56xf32>
    %66 = vector.shape_cast %65 : vector<56xf32> to vector<56x1xf32>
    %67 = vector.broadcast %66 : vector<56x1xf32> to vector<56x56xf32>
    %68 = arith.subf %64, %67 : vector<56x56xf32>
    %69 = math.exp %68 : vector<56x56xf32>
    %cst_30 = arith.constant dense<0.000000e+00> : vector<56xf32>
    %70 = vector.multi_reduction <add>, %69, %cst_30 [1] : vector<56x56xf32> to vector<56xf32>
    %71 = vector.shape_cast %70 : vector<56xf32> to vector<56x1xf32>
    %72 = tpu.reciprocal %71 {approx = true} : vector<56x1xf32> -> vector<56x1xf32>
    %73 = vector.broadcast %72 : vector<56x1xf32> to vector<56x56xf32>
    %74 = arith.mulf %69, %73 : vector<56x56xf32>
    %cst_31 = arith.constant dense<0.000000e+00> : vector<56x16xf32>
    %75 = tpu.matmul %74, %61, %cst_31 {dimension_numbers = #tpu.dot_dimension_numbers<[1], [0], [0], [1], [0, 0, 1, 1], [], []>} : vector<56x56xf32>, vector<56x16xf32>, vector<56x16xf32> -> vector<56x16xf32>
    %76 = tpu.concatenate %58, %75 in 1 : vector<56x16xf32>, vector<56x16xf32> -> vector<56x32xf32>
    %c0_32 = arith.constant 0 : index
    %c0_33 = arith.constant 0 : index
    %77 = vector.load %arg9[%c0_32, %c0_33] : memref<32x32xf32, #tpu.memory_space<vmem>>, vector<32x32xf32>
    %cst_34 = arith.constant dense<0.000000e+00> : vector<56x32xf32>
    %78 = tpu.matmul %76, %77, %cst_34 {dimension_numbers = #tpu.dot_dimension_numbers<[1], [0], [0], [1], [0, 0, 1, 1], [], []>} : vector<56x32xf32>, vector<32x32xf32>, vector<56x32xf32> -> vector<56x32xf32>
    %c0_35 = arith.constant 0 : index
    %c0_36 = arith.constant 0 : index
    %79 = vector.load %arg10[%c0_35, %c0_36] : memref<1x32xf32, #tpu.memory_space<vmem>>, vector<1x32xf32>
    %80 = vector.broadcast %79 : vector<1x32xf32> to vector<56x32xf32>
    %81 = arith.addf %78, %80 : vector<56x32xf32>
    %cst_37 = arith.constant 5.000000e-01 : f32
    %82 = vector.broadcast %cst_37 : f32 to vector<56x32xf32>
    %83 = arith.mulf %82, %81 : vector<56x32xf32>
    %84 = arith.addf %0, %83 : vector<56x32xf32>
    %c0_38 = arith.constant 0 : index
    %c0_39 = arith.constant 0 : index
    %85 = vector.load %arg11[%c0_38, %c0_39] : memref<56x32xf32, #tpu.memory_space<vmem>>, vector<56x32xf32>
    tpu.vector_store %arg11[%c0_38, %c0_39], %84 {strides = array<i32>} : memref<56x32xf32, #tpu.memory_space<vmem>>, vector<56x32xf32>,
    return
  }
  func.func @transform_0(%arg0: i32) -> (i32, i32) {
    %c0_i32 = arith.constant 0 : i32
    %c0_i32_0 = arith.constant 0 : i32
    return %arg0, %c0_i32 : i32, i32
  }
  func.func @transform_1(%arg0: i32) -> (i32, i32) {
    %c0_i32 = arith.constant 0 : i32
    %c0_i32_0 = arith.constant 0 : i32
    %c0_i32_1 = arith.constant 0 : i32
    return %c0_i32, %c0_i32_0 : i32, i32
  }
  func.func @transform_2(%arg0: i32) -> (i32, i32) {
    %c0_i32 = arith.constant 0 : i32
    %c0_i32_0 = arith.constant 0 : i32
    %c0_i32_1 = arith.constant 0 : i32
    return %c0_i32, %c0_i32_0 : i32, i32
  }
  func.func @transform_3(%arg0: i32) -> (i32, i32) {
    %c0_i32 = arith.constant 0 : i32
    %c0_i32_0 = arith.constant 0 : i32
    %c0_i32_1 = arith.constant 0 : i32
    return %c0_i32, %c0_i32_0 : i32, i32
  }
  func.func @transform_4(%arg0: i32) -> (i32, i32) {
    %c0_i32 = arith.constant 0 : i32
    %c0_i32_0 = arith.constant 0 : i32
    %c0_i32_1 = arith.constant 0 : i32
    return %c0_i32, %c0_i32_0 : i32, i32
  }
  func.func @transform_5(%arg0: i32) -> (i32, i32) {
    %c0_i32 = arith.constant 0 : i32
    %c0_i32_0 = arith.constant 0 : i32
    %c0_i32_1 = arith.constant 0 : i32
    return %c0_i32, %c0_i32_0 : i32, i32
  }
  func.func @transform_6(%arg0: i32) -> (i32, i32) {
    %c0_i32 = arith.constant 0 : i32
    %c0_i32_0 = arith.constant 0 : i32
    %c0_i32_1 = arith.constant 0 : i32
    return %c0_i32, %c0_i32_0 : i32, i32
  }
  func.func @transform_7(%arg0: i32) -> (i32, i32) {
    %c0_i32 = arith.constant 0 : i32
    %c0_i32_0 = arith.constant 0 : i32
    %c0_i32_1 = arith.constant 0 : i32
    return %c0_i32, %c0_i32_0 : i32, i32
  }
  func.func @transform_8(%arg0: i32) -> (i32, i32) {
    %c0_i32 = arith.constant 0 : i32
    %c0_i32_0 = arith.constant 0 : i32
    %c0_i32_1 = arith.constant 0 : i32
    return %c0_i32, %c0_i32_0 : i32, i32
  }
  func.func @transform_9(%arg0: i32) -> (i32, i32) {
    %c0_i32 = arith.constant 0 : i32
    %c0_i32_0 = arith.constant 0 : i32
    %c0_i32_1 = arith.constant 0 : i32
    return %c0_i32, %c0_i32_0 : i32, i32
  }
  func.func @transform_10(%arg0: i32) -> (i32, i32) {
    %c0_i32 = arith.constant 0 : i32
    %c0_i32_0 = arith.constant 0 : i32
    return %arg0, %c0_i32 : i32, i32
  }
}

module attributes {stable_mosaic.version = 11 : i64} {
  func.func @_mlp_kernel(%arg0: i32, %arg1: memref<56x32xf32, #tpu.memory_space<vmem>>, %arg2: memref<1x32xf32, #tpu.memory_space<vmem>>, %arg3: memref<1x32xf32, #tpu.memory_space<vmem>>, %arg4: memref<32x64xf32, #tpu.memory_space<vmem>>, %arg5: memref<1x64xf32, #tpu.memory_space<vmem>>, %arg6: memref<64x32xf32, #tpu.memory_space<vmem>>, %arg7: memref<1x32xf32, #tpu.memory_space<vmem>>, %arg8: memref<56x32xf32, #tpu.memory_space<vmem>>) attributes {dimension_semantics = [#tpu.dimension_semantics<parallel>], iteration_bounds = array<i64: 2>, scalar_prefetch = 0 : i64, scratch_operands = 0 : i64, tpu.core_type = #tpu.core_type<tc>, window_params = [{transform_indices = @transform_0, window_bounds = array<i64: 56, 32>}, {pipeline_mode = #tpu.pipeline_mode<synchronous>, transform_indices = @transform_1, window_bounds = array<i64: 1, 32>}, {pipeline_mode = #tpu.pipeline_mode<synchronous>, transform_indices = @transform_2, window_bounds = array<i64: 1, 32>}, {pipeline_mode = #tpu.pipeline_mode<synchronous>, transform_indices = @transform_3, window_bounds = array<i64: 32, 64>}, {pipeline_mode = #tpu.pipeline_mode<synchronous>, transform_indices = @transform_4, window_bounds = array<i64: 1, 64>}, {pipeline_mode = #tpu.pipeline_mode<synchronous>, transform_indices = @transform_5, window_bounds = array<i64: 64, 32>}, {pipeline_mode = #tpu.pipeline_mode<synchronous>, transform_indices = @transform_6, window_bounds = array<i64: 1, 32>}, {transform_indices = @transform_7, window_bounds = array<i64: 56, 32>}]} {
    %c0 = arith.constant 0 : index
    %c0_0 = arith.constant 0 : index
    %0 = vector.load %arg1[%c0, %c0_0] : memref<56x32xf32, #tpu.memory_space<vmem>>, vector<56x32xf32>
    %c0_1 = arith.constant 0 : index
    %c0_2 = arith.constant 0 : index
    %1 = vector.load %arg2[%c0_1, %c0_2] : memref<1x32xf32, #tpu.memory_space<vmem>>, vector<1x32xf32>
    %c0_3 = arith.constant 0 : index
    %c0_4 = arith.constant 0 : index
    %2 = vector.load %arg3[%c0_3, %c0_4] : memref<1x32xf32, #tpu.memory_space<vmem>>, vector<1x32xf32>
    %cst = arith.constant dense<0.000000e+00> : vector<56xf32>
    %3 = vector.multi_reduction <add>, %0, %cst [1] : vector<56x32xf32> to vector<56xf32>
    %4 = vector.shape_cast %3 : vector<56xf32> to vector<56x1xf32>
    %cst_5 = arith.constant 3.200000e+01 : f32
    %5 = vector.broadcast %cst_5 : f32 to vector<56x1xf32>
    %6 = arith.divf %4, %5 : vector<56x1xf32>
    %7 = vector.broadcast %6 : vector<56x1xf32> to vector<56x32xf32>
    %8 = arith.subf %0, %7 : vector<56x32xf32>
    %9 = arith.mulf %8, %8 : vector<56x32xf32>
    %cst_6 = arith.constant dense<0.000000e+00> : vector<56xf32>
    %10 = vector.multi_reduction <add>, %9, %cst_6 [1] : vector<56x32xf32> to vector<56xf32>
    %11 = vector.shape_cast %10 : vector<56xf32> to vector<56x1xf32>
    %cst_7 = arith.constant 3.200000e+01 : f32
    %12 = vector.broadcast %cst_7 : f32 to vector<56x1xf32>
    %13 = arith.divf %11, %12 : vector<56x1xf32>
    %14 = vector.broadcast %6 : vector<56x1xf32> to vector<56x32xf32>
    %15 = arith.subf %0, %14 : vector<56x32xf32>
    %cst_8 = arith.constant 9.99999974E-6 : f32
    %16 = vector.broadcast %cst_8 : f32 to vector<56x1xf32>
    %17 = arith.addf %13, %16 : vector<56x1xf32>
    %18 = math.rsqrt %17 : vector<56x1xf32>
    %19 = vector.broadcast %18 : vector<56x1xf32> to vector<56x32xf32>
    %20 = arith.mulf %15, %19 : vector<56x32xf32>
    %21 = vector.broadcast %1 : vector<1x32xf32> to vector<56x32xf32>
    %22 = arith.mulf %20, %21 : vector<56x32xf32>
    %23 = vector.broadcast %2 : vector<1x32xf32> to vector<56x32xf32>
    %24 = arith.addf %22, %23 : vector<56x32xf32>
    %c0_9 = arith.constant 0 : index
    %c0_10 = arith.constant 0 : index
    %25 = vector.load %arg4[%c0_9, %c0_10] : memref<32x64xf32, #tpu.memory_space<vmem>>, vector<32x64xf32>
    %cst_11 = arith.constant dense<0.000000e+00> : vector<56x64xf32>
    %26 = tpu.matmul %24, %25, %cst_11 {dimension_numbers = #tpu.dot_dimension_numbers<[1], [0], [0], [1], [0, 0, 1, 1], [], []>} : vector<56x32xf32>, vector<32x64xf32>, vector<56x64xf32> -> vector<56x64xf32>
    %c0_12 = arith.constant 0 : index
    %c0_13 = arith.constant 0 : index
    %27 = vector.load %arg5[%c0_12, %c0_13] : memref<1x64xf32, #tpu.memory_space<vmem>>, vector<1x64xf32>
    %28 = vector.broadcast %27 : vector<1x64xf32> to vector<56x64xf32>
    %29 = arith.addf %26, %28 : vector<56x64xf32>
    %cst_14 = arith.constant 5.000000e-01 : f32
    %30 = vector.broadcast %cst_14 : f32 to vector<56x64xf32>
    %31 = arith.mulf %30, %29 : vector<56x64xf32>
    %cst_15 = arith.constant 0.707106769 : f32
    %32 = vector.broadcast %cst_15 : f32 to vector<56x64xf32>
    %33 = arith.mulf %29, %32 : vector<56x64xf32>
    %34 = math.erf %33 : vector<56x64xf32>
    %cst_16 = arith.constant 1.000000e+00 : f32
    %35 = vector.broadcast %cst_16 : f32 to vector<56x64xf32>
    %36 = arith.addf %35, %34 : vector<56x64xf32>
    %37 = arith.mulf %31, %36 : vector<56x64xf32>
    %c0_17 = arith.constant 0 : index
    %c0_18 = arith.constant 0 : index
    %38 = vector.load %arg6[%c0_17, %c0_18] : memref<64x32xf32, #tpu.memory_space<vmem>>, vector<64x32xf32>
    %cst_19 = arith.constant dense<0.000000e+00> : vector<56x32xf32>
    %39 = tpu.matmul %37, %38, %cst_19 {dimension_numbers = #tpu.dot_dimension_numbers<[1], [0], [0], [1], [0, 0, 1, 1], [], []>} : vector<56x64xf32>, vector<64x32xf32>, vector<56x32xf32> -> vector<56x32xf32>
    %c0_20 = arith.constant 0 : index
    %c0_21 = arith.constant 0 : index
    %40 = vector.load %arg7[%c0_20, %c0_21] : memref<1x32xf32, #tpu.memory_space<vmem>>, vector<1x32xf32>
    %41 = vector.broadcast %40 : vector<1x32xf32> to vector<56x32xf32>
    %42 = arith.addf %39, %41 : vector<56x32xf32>
    %43 = arith.addf %0, %42 : vector<56x32xf32>
    %c0_22 = arith.constant 0 : index
    %c0_23 = arith.constant 0 : index
    %44 = vector.load %arg8[%c0_22, %c0_23] : memref<56x32xf32, #tpu.memory_space<vmem>>, vector<56x32xf32>
    tpu.vector_store %arg8[%c0_22, %c0_23], %43 {strides = array<i32>} : memref<56x32xf32, #tpu.memory_space<vmem>>, vector<56x32xf32>,
    return
  }
  func.func @transform_0(%arg0: i32) -> (i32, i32) {
    %c0_i32 = arith.constant 0 : i32
    %c0_i32_0 = arith.constant 0 : i32
    return %arg0, %c0_i32 : i32, i32
  }
  func.func @transform_1(%arg0: i32) -> (i32, i32) {
    %c0_i32 = arith.constant 0 : i32
    %c0_i32_0 = arith.constant 0 : i32
    %c0_i32_1 = arith.constant 0 : i32
    return %c0_i32, %c0_i32_0 : i32, i32
  }
  func.func @transform_2(%arg0: i32) -> (i32, i32) {
    %c0_i32 = arith.constant 0 : i32
    %c0_i32_0 = arith.constant 0 : i32
    %c0_i32_1 = arith.constant 0 : i32
    return %c0_i32, %c0_i32_0 : i32, i32
  }
  func.func @transform_3(%arg0: i32) -> (i32, i32) {
    %c0_i32 = arith.constant 0 : i32
    %c0_i32_0 = arith.constant 0 : i32
    %c0_i32_1 = arith.constant 0 : i32
    return %c0_i32, %c0_i32_0 : i32, i32
  }
  func.func @transform_4(%arg0: i32) -> (i32, i32) {
    %c0_i32 = arith.constant 0 : i32
    %c0_i32_0 = arith.constant 0 : i32
    %c0_i32_1 = arith.constant 0 : i32
    return %c0_i32, %c0_i32_0 : i32, i32
  }
  func.func @transform_5(%arg0: i32) -> (i32, i32) {
    %c0_i32 = arith.constant 0 : i32
    %c0_i32_0 = arith.constant 0 : i32
    %c0_i32_1 = arith.constant 0 : i32
    return %c0_i32, %c0_i32_0 : i32, i32
  }
  func.func @transform_6(%arg0: i32) -> (i32, i32) {
    %c0_i32 = arith.constant 0 : i32
    %c0_i32_0 = arith.constant 0 : i32
    %c0_i32_1 = arith.constant 0 : i32
    return %c0_i32, %c0_i32_0 : i32, i32
  }
  func.func @transform_7(%arg0: i32) -> (i32, i32) {
    %c0_i32 = arith.constant 0 : i32
    %c0_i32_0 = arith.constant 0 : i32
    return %arg0, %c0_i32 : i32, i32
  }
}

module attributes {stable_mosaic.version = 11 : i64} {
  func.func @_head_kernel(%arg0: i32, %arg1: memref<56x32xf32, #tpu.memory_space<vmem>>, %arg2: memref<1x32xf32, #tpu.memory_space<vmem>>, %arg3: memref<1x32xf32, #tpu.memory_space<vmem>>, %arg4: memref<32x64xf32, #tpu.memory_space<vmem>>, %arg5: memref<1x64xf32, #tpu.memory_space<vmem>>, %arg6: memref<64x64xf32, #tpu.memory_space<vmem>>, %arg7: memref<1x64xf32, #tpu.memory_space<vmem>>, %arg8: memref<56x64xf32, #tpu.memory_space<vmem>>) attributes {dimension_semantics = [#tpu.dimension_semantics<parallel>], iteration_bounds = array<i64: 2>, scalar_prefetch = 0 : i64, scratch_operands = 0 : i64, tpu.core_type = #tpu.core_type<tc>, window_params = [{transform_indices = @transform_0, window_bounds = array<i64: 56, 32>}, {pipeline_mode = #tpu.pipeline_mode<synchronous>, transform_indices = @transform_1, window_bounds = array<i64: 1, 32>}, {pipeline_mode = #tpu.pipeline_mode<synchronous>, transform_indices = @transform_2, window_bounds = array<i64: 1, 32>}, {pipeline_mode = #tpu.pipeline_mode<synchronous>, transform_indices = @transform_3, window_bounds = array<i64: 32, 64>}, {pipeline_mode = #tpu.pipeline_mode<synchronous>, transform_indices = @transform_4, window_bounds = array<i64: 1, 64>}, {pipeline_mode = #tpu.pipeline_mode<synchronous>, transform_indices = @transform_5, window_bounds = array<i64: 64, 64>}, {pipeline_mode = #tpu.pipeline_mode<synchronous>, transform_indices = @transform_6, window_bounds = array<i64: 1, 64>}, {transform_indices = @transform_7, window_bounds = array<i64: 56, 64>}]} {
    %c0 = arith.constant 0 : index
    %c0_0 = arith.constant 0 : index
    %0 = vector.load %arg1[%c0, %c0_0] : memref<56x32xf32, #tpu.memory_space<vmem>>, vector<56x32xf32>
    %c0_1 = arith.constant 0 : index
    %c0_2 = arith.constant 0 : index
    %1 = vector.load %arg2[%c0_1, %c0_2] : memref<1x32xf32, #tpu.memory_space<vmem>>, vector<1x32xf32>
    %c0_3 = arith.constant 0 : index
    %c0_4 = arith.constant 0 : index
    %2 = vector.load %arg3[%c0_3, %c0_4] : memref<1x32xf32, #tpu.memory_space<vmem>>, vector<1x32xf32>
    %cst = arith.constant dense<0.000000e+00> : vector<56xf32>
    %3 = vector.multi_reduction <add>, %0, %cst [1] : vector<56x32xf32> to vector<56xf32>
    %4 = vector.shape_cast %3 : vector<56xf32> to vector<56x1xf32>
    %cst_5 = arith.constant 3.200000e+01 : f32
    %5 = vector.broadcast %cst_5 : f32 to vector<56x1xf32>
    %6 = arith.divf %4, %5 : vector<56x1xf32>
    %7 = vector.broadcast %6 : vector<56x1xf32> to vector<56x32xf32>
    %8 = arith.subf %0, %7 : vector<56x32xf32>
    %9 = arith.mulf %8, %8 : vector<56x32xf32>
    %cst_6 = arith.constant dense<0.000000e+00> : vector<56xf32>
    %10 = vector.multi_reduction <add>, %9, %cst_6 [1] : vector<56x32xf32> to vector<56xf32>
    %11 = vector.shape_cast %10 : vector<56xf32> to vector<56x1xf32>
    %cst_7 = arith.constant 3.200000e+01 : f32
    %12 = vector.broadcast %cst_7 : f32 to vector<56x1xf32>
    %13 = arith.divf %11, %12 : vector<56x1xf32>
    %14 = vector.broadcast %6 : vector<56x1xf32> to vector<56x32xf32>
    %15 = arith.subf %0, %14 : vector<56x32xf32>
    %cst_8 = arith.constant 9.99999974E-6 : f32
    %16 = vector.broadcast %cst_8 : f32 to vector<56x1xf32>
    %17 = arith.addf %13, %16 : vector<56x1xf32>
    %18 = math.rsqrt %17 : vector<56x1xf32>
    %19 = vector.broadcast %18 : vector<56x1xf32> to vector<56x32xf32>
    %20 = arith.mulf %15, %19 : vector<56x32xf32>
    %21 = vector.broadcast %1 : vector<1x32xf32> to vector<56x32xf32>
    %22 = arith.mulf %20, %21 : vector<56x32xf32>
    %23 = vector.broadcast %2 : vector<1x32xf32> to vector<56x32xf32>
    %24 = arith.addf %22, %23 : vector<56x32xf32>
    %c0_9 = arith.constant 0 : index
    %c0_10 = arith.constant 0 : index
    %25 = vector.load %arg4[%c0_9, %c0_10] : memref<32x64xf32, #tpu.memory_space<vmem>>, vector<32x64xf32>
    %cst_11 = arith.constant dense<0.000000e+00> : vector<56x64xf32>
    %26 = tpu.matmul %24, %25, %cst_11 {dimension_numbers = #tpu.dot_dimension_numbers<[1], [0], [0], [1], [0, 0, 1, 1], [], []>} : vector<56x32xf32>, vector<32x64xf32>, vector<56x64xf32> -> vector<56x64xf32>
    %c0_12 = arith.constant 0 : index
    %c0_13 = arith.constant 0 : index
    %27 = vector.load %arg5[%c0_12, %c0_13] : memref<1x64xf32, #tpu.memory_space<vmem>>, vector<1x64xf32>
    %28 = vector.broadcast %27 : vector<1x64xf32> to vector<56x64xf32>
    %29 = arith.addf %26, %28 : vector<56x64xf32>
    %cst_14 = arith.constant 5.000000e-01 : f32
    %30 = vector.broadcast %cst_14 : f32 to vector<56x64xf32>
    %31 = arith.mulf %30, %29 : vector<56x64xf32>
    %cst_15 = arith.constant 0.707106769 : f32
    %32 = vector.broadcast %cst_15 : f32 to vector<56x64xf32>
    %33 = arith.mulf %29, %32 : vector<56x64xf32>
    %34 = math.erf %33 : vector<56x64xf32>
    %cst_16 = arith.constant 1.000000e+00 : f32
    %35 = vector.broadcast %cst_16 : f32 to vector<56x64xf32>
    %36 = arith.addf %35, %34 : vector<56x64xf32>
    %37 = arith.mulf %31, %36 : vector<56x64xf32>
    %c0_17 = arith.constant 0 : index
    %c0_18 = arith.constant 0 : index
    %38 = vector.load %arg6[%c0_17, %c0_18] : memref<64x64xf32, #tpu.memory_space<vmem>>, vector<64x64xf32>
    %cst_19 = arith.constant dense<0.000000e+00> : vector<56x64xf32>
    %39 = tpu.matmul %37, %38, %cst_19 {dimension_numbers = #tpu.dot_dimension_numbers<[1], [0], [0], [1], [0, 0, 1, 1], [], []>} : vector<56x64xf32>, vector<64x64xf32>, vector<56x64xf32> -> vector<56x64xf32>
    %c0_20 = arith.constant 0 : index
    %c0_21 = arith.constant 0 : index
    %40 = vector.load %arg7[%c0_20, %c0_21] : memref<1x64xf32, #tpu.memory_space<vmem>>, vector<1x64xf32>
    %41 = vector.broadcast %40 : vector<1x64xf32> to vector<56x64xf32>
    %42 = arith.addf %39, %41 : vector<56x64xf32>
    %43 = math.tanh %42 : vector<56x64xf32>
    %c0_22 = arith.constant 0 : index
    %c0_23 = arith.constant 0 : index
    %44 = vector.load %arg8[%c0_22, %c0_23] : memref<56x64xf32, #tpu.memory_space<vmem>>, vector<56x64xf32>
    tpu.vector_store %arg8[%c0_22, %c0_23], %43 {strides = array<i32>} : memref<56x64xf32, #tpu.memory_space<vmem>>, vector<56x64xf32>,
    return
  }
  func.func @transform_0(%arg0: i32) -> (i32, i32) {
    %c0_i32 = arith.constant 0 : i32
    %c0_i32_0 = arith.constant 0 : i32
    return %arg0, %c0_i32 : i32, i32
  }
  func.func @transform_1(%arg0: i32) -> (i32, i32) {
    %c0_i32 = arith.constant 0 : i32
    %c0_i32_0 = arith.constant 0 : i32
    %c0_i32_1 = arith.constant 0 : i32
    return %c0_i32, %c0_i32_0 : i32, i32
  }
  func.func @transform_2(%arg0: i32) -> (i32, i32) {
    %c0_i32 = arith.constant 0 : i32
    %c0_i32_0 = arith.constant 0 : i32
    %c0_i32_1 = arith.constant 0 : i32
    return %c0_i32, %c0_i32_0 : i32, i32
  }
  func.func @transform_3(%arg0: i32) -> (i32, i32) {
    %c0_i32 = arith.constant 0 : i32
    %c0_i32_0 = arith.constant 0 : i32
    %c0_i32_1 = arith.constant 0 : i32
    return %c0_i32, %c0_i32_0 : i32, i32
  }
  func.func @transform_4(%arg0: i32) -> (i32, i32) {
    %c0_i32 = arith.constant 0 : i32
    %c0_i32_0 = arith.constant 0 : i32
    %c0_i32_1 = arith.constant 0 : i32
    return %c0_i32, %c0_i32_0 : i32, i32
  }
  func.func @transform_5(%arg0: i32) -> (i32, i32) {
    %c0_i32 = arith.constant 0 : i32
    %c0_i32_0 = arith.constant 0 : i32
    %c0_i32_1 = arith.constant 0 : i32
    return %c0_i32, %c0_i32_0 : i32, i32
  }
  func.func @transform_6(%arg0: i32) -> (i32, i32) {
    %c0_i32 = arith.constant 0 : i32
    %c0_i32_0 = arith.constant 0 : i32
    %c0_i32_1 = arith.constant 0 : i32
    return %c0_i32, %c0_i32_0 : i32, i32
  }
  func.func @transform_7(%arg0: i32) -> (i32, i32) {
    %c0_i32 = arith.constant 0 : i32
    %c0_i32_0 = arith.constant 0 : i32
    return %arg0, %c0_i32 : i32, i32
  }
}

</mosaic_0001>

<bundles_post_ra>
// kernel: vit_forward.8
= control target key start
LH: loop header
LB: loop body
LE: loop exit
PB: predicated region body
PF: predicated region fallthrough
CT: control target
= control target key end

     0   :  { %s553_s15 = smov 0   ;;  %s687_s0 = inlined_call_operand.vmem [shape: f32[112,64], index: 0, kind: input, shape index: {}]   ;;  %s688_s1 = inlined_call_operand.vmem [shape: f32[64,32], index: 1, kind: input, shape index: {}]   ;;  %s689_s2 = inlined_call_operand.vmem [shape: f32[1,32], index: 2, kind: input, shape index: {}]   ;;  %s690_s3 = inlined_call_operand.vmem [shape: f32[56,32], index: 3, kind: input, shape index: {}]   ;;  %s691_s4 = inlined_call_operand.vmem [shape: f32[112,32], index: 4, kind: output, shape index: {}]  }
   0x1 LB: > { %s423_s16 = sadd.s32 4294967295, %s524_s15   ;;  %p427_p0 = scmp.ge.s32.totalorder %s524_s15, 1  ;;  %s524_s15 = sphi %s553_s15, %s14_s15  }
   0x2   : > { %p163_p1 = scmp.lt.s32.totalorder %s524_s15, 3 }
   0x4   : > { %p164_p2 = pnand %p427_p0, %p163_p1 }
   0x5   : > { %s189_s19 = smul.u32 (!%p164_p2), 7, %s423_s16 }
   0x6   : > { %167 = sbr.rel (%p164_p2) target bundleno = 238 (0xee), region = 36 }
   0x7   : > { %p190_p3 = scmp.lt.s32.totalorder (!%p164_p2), %s189_s19, 13 }
   0xb   : > { %v215_v0 = vld [vmem:[%s688_s1 + $0x38] sm:$0xff]  ;;  %v526_v1 = vmov 0.0   ;;  %v214_v2 = vld [vmem:[%s688_s1 + $0x30] sm:$0xff]  ;;  %v213_v3 = vld [vmem:[%s688_s1 + $0x28] sm:$0xff]  ;;  %s693_s19 = smov (!%p190_p3, %s189_s19), 13  ;;  %vm223_vm0 = vcmask 523264  }
   0xc   : > { %455 = vmatprep.subr.mxu0 %v526_v1  ;;  %492 = vmatprep.subr.mxu1 %v526_v1  ;;  %v212_v4 = vld [vmem:[%s688_s1 + $0x20] sm:$0xff]  ;;  %v211_v5 = vld [vmem:[%s688_s1 + $0x18] sm:$0xff]  ;;  %s428_s28 = sshll.u32 %s693_s19, 3  ;;  %v210_v6 = vld [vmem:[%s688_s1 + $0x10] sm:$0xff]  ;;  %vm527_vm1 = vmmov 0   ;;  %vm359_vm2 = vcmask 261120  }
   0xd   : > { %456 = vmatpush3.msra.mxu0 %v215_v0  ;;  %500 = vmatpush3.msra.mxu1 %v215_v0  ;;  %v209_v7 = vld [vmem:[%s688_s1 + $0x8] sm:$0xff]  ;;  %s602_s9 = scalar_lea.vmem %s687_s0, %s428_s28  ;;  %v208_v8 = vld [vmem:[%s688_s1] sm:$0xff]  ;;  %s650_s20 = scalar_lea.vmem %s691_s4, %s428_s28  ;;  %v347_v36 = vld [vmem:[%s690_s3 + $0x10] sm:$0xff] }
   0xe   : > { %457 = vmatprep.subr.mxu0 %v526_v1  ;;  %493 = vmatprep.subr.mxu1 %v526_v1  ;;  %v201_v9 = vld [vmem:[%s602_s9] sm:$0xff]  ;;  %v202_v11 = vld [vmem:[%s602_s9 + $0x8] sm:$0xff]  ;;  %v203_v13 = vld [vmem:[%s602_s9 + $0x10] sm:$0xff] }
   0xf   : > { %458 = vmatpush3.msra.mxu0 %v214_v2  ;;  %501 = vmatpush3.msra.mxu1 %v214_v2  ;;  %v205_v10 = vld [vmem:[%s602_s9 + $0x20] sm:$0xff]  ;;  %v206_v12 = vld [vmem:[%s602_s9 + $0x28] sm:$0xff]  ;;  %v207_v14 = vld [vmem:[%s602_s9 + $0x30] sm:$0xff] }
  0x10   : > { %459 = vmatprep.subr.mxu0 %v526_v1  ;;  %494 = vmatprep.subr.mxu1 %v526_v1  ;;  %v204_v15 = vld [vmem:[%s602_s9 + $0x18] sm:$0xff]  ;;  %v430_v16 = vld [vmem:[%s689_s2] ss:$0 sm:$0xff]  ;;  %v346_v26 = vld [vmem:[%s690_s3 + $0x8] sm:$0xff] }
  0x11   : > { %460 = vmatpush3.msra.mxu0 %v213_v3  ;;  %502 = vmatpush3.msra.mxu1 %v213_v3  ;;  %v345_v18 = vld [vmem:[%s690_s3] sm:$0xff]  ;;  %v350_v32 = vld [vmem:[%s690_s3 + $0x28] sm:$0xff]  ;;  %v351_v42 = vld [vmem:[%s690_s3 + $0x30] sm:$0xff] }
  0x12   : > { %461 = vmatprep.subr.mxu0 %v526_v1  ;;  %495 = vmatprep.subr.mxu1 %v526_v1  ;;  %v349_v22 = vld [vmem:[%s690_s3 + $0x20] sm:$0xff]  ;;  %v348_v46 = vld [vmem:[%s690_s3 + $0x18] sm:$0xff] }
  0x13   : > { %462 = vmatpush3.msra.mxu0 %v212_v4  ;;  %503 = vmatpush3.msra.mxu1 %v212_v4 }
  0x14   : > { %463 = vmatprep.subr.mxu0 %v526_v1  ;;  %496 = vmatprep.subr.mxu1 %v526_v1 }
  0x15   : > { %464 = vmatpush3.msra.mxu0 %v211_v5  ;;  %504 = vmatpush3.msra.mxu1 %v211_v5 }
  0x16   : > { %465 = vmatprep.subr.mxu0 %v526_v1  ;;  %497 = vmatprep.subr.mxu1 %v526_v1 }
  0x17   : > { %466 = vmatpush3.msra.mxu0 %v210_v6  ;;  %505 = vmatpush3.msra.mxu1 %v210_v6 }
  0x18   : > { %467 = vmatprep.subr.mxu0 %v526_v1  ;;  %498 = vmatprep.subr.mxu1 %v526_v1 }
  0x19   : > { %468 = vmatpush3.msra.mxu0 %v209_v7  ;;  %506 = vmatpush3.msra.mxu1 %v209_v7 }
  0x1a   : > { %469 = vmatprep.subr.mxu0 %v526_v1  ;;  %471 = vmatprep.mubr.msk.f32.mxu0 %vm527_vm1, %v526_v1 }
  0x1b   : > { %470 = vmatpush3.msra.mxu0 %v208_v8  ;;  %499 = vmatprep.subr.mxu1 %v526_v1 }
  0x1c   : > { %472 = vmatmul.mubr.msk.f32.vlgmr.msra.gmra.mxu0 %vm223_vm0, %v201_v9  ;;  %507 = vmatpush3.msra.mxu1 %v208_v8 }
  0x1d   : > { %483 = vmatprep.mubr.msk.f32.mxu1 %vm527_vm1, %v526_v1  ;;  %474 = vmatprep.mubr.msk.f32.mxu0 %vm527_vm1, %v526_v1 }
  0x1e   : > { %484 = vmatmul.mubr.msk.f32.vlgmr.msra.gmra.mxu1 %vm223_vm0, %v205_v10 }
  0x1f   : > { %486 = vmatprep.mubr.msk.f32.mxu1 %vm527_vm1, %v526_v1 }
  0x20   : > { %475 = vmatmul.mubr.msk.f32.gmra.mxu0 %vm223_vm0, %v202_v11 }
  0x21   : > { %477 = vmatprep.mubr.msk.f32.mxu0 %vm527_vm1, %v526_v1 }
  0x22   : > { %487 = vmatmul.mubr.msk.f32.gmra.mxu1 %vm223_vm0, %v206_v12 }
  0x23   : > { %489 = vmatprep.mubr.msk.f32.mxu1 %vm527_vm1, %v526_v1 }
  0x24   : > { %478 = vmatmul.mubr.msk.f32.gmra.mxu0 %vm223_vm0, %v203_v13 }
  0x25   : > { %480 = vmatprep.mubr.msk.f32.mxu0 %vm527_vm1, %v526_v1 }
  0x26   : > { %490 = vmatmul.mubr.msk.f32.gmra.mxu1 %vm223_vm0, %v207_v14 }
  0x28   : > { %481 = vmatmul.mubr.msk.f32.gmra.mxu0 %vm223_vm0, %v204_v15 }
  0xdc   : > { %v311_v17 = vpop.f32.mrf.mxu0 }
  0xdd   : > { %v312_v19 = vadd.f32 %v430_v16, %v311_v17 }
  0xde   : > { %v473_v20 = vpop.f32.mrf.mxu0  ;;  %v331_v21 = vpop.f32.mrf.mxu1 }
  0xdf   : > { %v352_v23 = vadd.f32 %v345_v18, %v312_v19  ;;  %v332_v24 = vadd.f32 %v430_v16, %v331_v21 }
  0xe0   : > { %v316_v25 = vpop.f32.mrf.mxu0  ;;  %v485_v27 = vpop.f32.mrf.mxu1 }
  0xe1   : > { %360 = vst.msk [vmem:[%s650_s20] sm:$0xff] %vm359_vm2, %v352_v23  ;;  %v356_v28 = vadd.f32 %v349_v22, %v332_v24  ;;  %v317_v29 = vadd.f32 %v430_v16, %v316_v25 }
  0xe2   : > { %v476_v30 = vpop.f32.mrf.mxu0  ;;  %v336_v31 = vpop.f32.mrf.mxu1 }
  0xe3   : > { %364 = vst.msk [vmem:[%s650_s20 + $0x20] sm:$0xff] %vm359_vm2, %v356_v28  ;;  %v353_v33 = vadd.f32 %v346_v26, %v317_v29  ;;  %v337_v34 = vadd.f32 %v430_v16, %v336_v31 }
  0xe4   : > { %v321_v35 = vpop.f32.mrf.mxu0  ;;  %v488_v37 = vpop.f32.mrf.mxu1 }
  0xe5   : > { %361 = vst.msk [vmem:[%s650_s20 + $0x8] sm:$0xff] %vm359_vm2, %v353_v33  ;;  %v357_v38 = vadd.f32 %v350_v32, %v337_v34  ;;  %v322_v39 = vadd.f32 %v430_v16, %v321_v35 }
  0xe6   : > { %v479_v40 = vpop.f32.mrf.mxu0  ;;  %v341_v41 = vpop.f32.mrf.mxu1 }
  0xe7   : > { %365 = vst.msk [vmem:[%s650_s20 + $0x28] sm:$0xff] %vm359_vm2, %v357_v38  ;;  %v354_v43 = vadd.f32 %v347_v36, %v322_v39  ;;  %v342_v44 = vadd.f32 %v430_v16, %v341_v41 }
  0xe8   : > { %v326_v45 = vpop.f32.mrf.mxu0  ;;  %v491_v47 = vpop.f32.mrf.mxu1 }
  0xe9   : > { %362 = vst.msk [vmem:[%s650_s20 + $0x10] sm:$0xff] %vm359_vm2, %v354_v43  ;;  %v358_v48 = vadd.f32 %v351_v42, %v342_v44  ;;  %v327_v49 = vadd.f32 %v430_v16, %v326_v45 }
  0xea   : > { %v482_v50 = vpop.f32.mrf.mxu0 }
  0xeb   : > { %366 = vst.msk [vmem:[%s650_s20 + $0x30] sm:$0xff] %vm359_vm2, %v358_v48  ;;  %v355_v51 = vadd.f32 %v348_v46, %v327_v49 }
  0xed   : > { %363 = vst.msk [vmem:[%s650_s20 + $0x18] sm:$0xff] %vm359_vm2, %v355_v51 }
  0xee PF: > { %s14_s15 = sadd.s32 1, %s524_s15  }
  0xef   : > { %p11_p4 = scmp.ge.s32.totalorder %s14_s15, 4  }
  0xf1   :  { %13 = sbr.rel (!%p11_p4) target bundleno = 1 (0x1), region = 66 }

// kernel: vit_forward.11
= control target key start
LH: loop header
LB: loop body
LE: loop exit
PB: predicated region body
PF: predicated region fallthrough
CT: control target
= control target key end

     0   :  { %s1007_s24 = smov 0   ;;  %s1241_s0 = inlined_call_operand.vmem [shape: f32[112,32], index: 0, kind: input, shape index: {}]   ;;  %s1242_s1 = inlined_call_operand.vmem [shape: f32[1,32], index: 1, kind: input, shape index: {}]   ;;  %s1243_s2 = inlined_call_operand.vmem [shape: f32[1,32], index: 2, kind: input, shape index: {}]   ;;  %s1244_s3 = inlined_call_operand.vmem [shape: f32[32,64], index: 3, kind: input, shape index: {}]   ;;  %s1245_s4 = inlined_call_operand.vmem [shape: f32[1,64], index: 4, kind: input, shape index: {}]   ;;  %s1246_s5 = inlined_call_operand.vmem [shape: f32[64,32], index: 5, kind: input, shape index: {}]   ;;  %s1247_s6 = inlined_call_operand.vmem [shape: f32[1,32], index: 6, kind: input, shape index: {}]   ;;  %s1248_s7 = inlined_call_operand.vmem [shape: f32[112,32], index: 7, kind: output, shape index: {}]  }
   0x1 LB: > { %s784_s25 = sadd.s32 4294967295, %s963_s24   ;;  %p788_p0 = scmp.ge.s32.totalorder %s963_s24, 1  ;;  %s963_s24 = sphi %s1007_s24, %s17_s24  }
   0x2   : > { %p238_p1 = scmp.lt.s32.totalorder %s963_s24, 3 }
   0x4   : > { %p239_p2 = pnand %p788_p0, %p238_p1 }
   0x5   : > { %s270_s26 = smul.u32 (!%p239_p2), 7, %s784_s25 }
   0x6   : > { %242 = sbr.rel (%p239_p2) target bundleno = 761 (0x2f9), region = 48 }
   0x7   : > { %p271_p3 = scmp.lt.s32.totalorder (!%p239_p2), %s270_s26, 13 }
   0xb   : > { %s1250_s26 = smov (!%p271_p3, %s270_s26), 13  ;;  %vm291_vm0 = vcmask 261120   ;;  %v965_v49 = vmov 0.0   ;;  %v413_v50 = vld [vmem:[%s1244_s3 + $0x18] sm:$0xff]  ;;  %v412_v51 = vld [vmem:[%s1244_s3 + $0x10] sm:$0xff]  ;;  %vm966_vm1 = vmmov 0  }
   0xc   : > { %s789_s27 = sshll.u32 %s1250_s26, 3  ;;  %837 = vmatprep.subr.mxu0 %v965_v49  ;;  %903 = vmatprep.subr.mxu1 %v965_v49  ;;  %v411_v52 = vld [vmem:[%s1244_s3 + $0x8] sm:$0xff]  ;;  %v410_v53 = vld [vmem:[%s1244_s3] sm:$0xff]  ;;  %vm592_vm2 = vcmask 523264  }
   0xd   : > { %s274_s30 = scalar_lea.vmem %s1241_s0, %s789_s27  ;;  %838 = vmatpush3.msra.mxu0 %v413_v50  ;;  %845 = vmatprep.mubr.msk.f32.mxu0 %vm966_vm1, %v965_v49  ;;  %v583_v50 = vld [vmem:[%s1246_s5 + $0x30] sm:$0xff]  ;;  %s1215_s22 = scalar_lea.vmem %s1248_s7, %s789_s27 }
   0xe   : > { %v1023_v0 = vld [vmem:[%s274_s30] sm:$0xff]  ;;  %v1025_v1 = vld [vmem:[%s274_s30 + $0x10] sm:$0xff]  ;;  %v1027_v2 = vld [vmem:[%s274_s30 + $0x8] sm:$0xff]  ;;  %839 = vmatprep.subr.mxu0 %v965_v49  ;;  %885 = vmatprep.mubr.msk.f32.mxu1 %vm966_vm1, %v965_v49 }
   0xf   : > { %v292_v3 = vsel %vm291_vm0, %v1023_v0, 0.0  ;;  %v298_v4 = vsel %vm291_vm0, %v1025_v1, 0.0  ;;  %v1033_v5 = vld [vmem:[%s274_s30 + $0x18] sm:$0xff]  ;;  %v295_v6 = vsel %vm291_vm0, %v1027_v2, 0.0  ;;  %v1039_v8 = vld [vmem:[%s274_s30 + $0x20] sm:$0xff]  ;;  %v1041_v9 = vld [vmem:[%s274_s30 + $0x28] sm:$0xff]  ;;  %840 = vmatpush3.msra.mxu0 %v412_v51 }
  0x10   : > { %293 = vadd.xlane.f32.xlu0 %v292_v3  ;;  %299 = vadd.xlane.f32.xlu1 %v298_v4  ;;  %v301_v7 = vsel %vm291_vm0, %v1033_v5, 0.0  ;;  %v304_v10 = vsel %vm291_vm0, %v1039_v8, 0.0  ;;  %v307_v11 = vsel %vm291_vm0, %v1041_v9, 0.0  ;;  %v1047_v12 = vld [vmem:[%s274_s30 + $0x30] sm:$0xff]  ;;  %v582_v51 = vld [vmem:[%s1246_s5 + $0x28] sm:$0xff] }
  0x11   : > { %v310_v13 = vsel %vm291_vm0, %v1047_v12, 0.0  ;;  %841 = vmatprep.subr.mxu0 %v965_v49 }
  0x12   : > { %842 = vmatpush3.msra.mxu0 %v411_v52  ;;  %v581_v52 = vld [vmem:[%s1246_s5 + $0x20] sm:$0xff] }
  0x13   : > { %843 = vmatprep.subr.mxu0 %v965_v49 }
  0x14   : > { %296 = vadd.xlane.f32.xlu0 %v295_v6  ;;  %302 = vadd.xlane.f32.xlu1 %v301_v7 }
  0x15   : > { %844 = vmatpush3.msra.mxu0 %v410_v53  ;;  %v580_v53 = vld [vmem:[%s1246_s5 + $0x18] sm:$0xff] }
  0x16   : > { %866 = vmatprep.subr.mxu0 %v965_v49 }
  0x18   : > { %305 = vadd.xlane.f32.xlu0 %v304_v10  ;;  %308 = vadd.xlane.f32.xlu1 %v307_v11 }
  0x1c   : > { %311 = vadd.xlane.f32.xlu0 %v310_v13 }
  0x99   : > { %v294_v14 = vpop.xlane.xlu0 %293  ;;  %v300_v15 = vpop.xlane.xlu1 %299 }
  0x9a   : > { %v314_v16 = vmul.f32 0.03125, %v294_v14  ;;  %v316_v17 = vmul.f32 0.03125, %v300_v15 }
  0x9c   : > { %v1052_v18 = vsub.f32 %v1023_v0, %v314_v16  ;;  %v1055_v19 = vsub.f32 %v1025_v1, %v316_v17 }
  0x9d   : > { %v297_v20 = vpop.xlane.xlu0 %296  ;;  %v303_v21 = vpop.xlane.xlu1 %302 }
  0x9e   : > { %v315_v22 = vmul.f32 0.03125, %v297_v20  ;;  %v317_v23 = vmul.f32 0.03125, %v303_v21  ;;  %v328_v24 = vmul.f32 %v1052_v18, %v1052_v18  ;;  %v330_v25 = vmul.f32 %v1055_v19, %v1055_v19  ;;  %v791_v20 = vld [vmem:[%s1242_s1] ss:$0 sm:$0xff] }
  0xa0   : > { %v1062_v26 = vsub.f32 %v1027_v2, %v315_v22  ;;  %v1065_v27 = vsub.f32 %v1033_v5, %v317_v23  ;;  %v335_v28 = vsel %vm291_vm0, %v328_v24, 0.0  ;;  %v341_v31 = vsel %vm291_vm0, %v330_v25, 0.0  ;;  %v792_v23 = vld [vmem:[%s1243_s2] ss:$0 sm:$0xff] }
  0xa1   : > { %336 = vadd.xlane.f32.xlu1 %v335_v28  ;;  %v306_v29 = vpop.xlane.xlu0 %305  ;;  %v309_v30 = vpop.xlane.xlu1 %308 }
  0xa2   : > { %v318_v32 = vmul.f32 0.03125, %v306_v29  ;;  %v319_v33 = vmul.f32 0.03125, %v309_v30  ;;  %v329_v34 = vmul.f32 %v1062_v26, %v1062_v26  ;;  %v331_v35 = vmul.f32 %v1065_v27, %v1065_v27 }
  0xa4   : > { %v1074_v36 = vsub.f32 %v1039_v8, %v318_v32  ;;  %v1077_v37 = vsub.f32 %v1041_v9, %v319_v33  ;;  %v338_v38 = vsel %vm291_vm0, %v329_v34, 0.0  ;;  %v344_v41 = vsel %vm291_vm0, %v331_v35, 0.0 }
  0xa5   : > { %342 = vadd.xlane.f32.xlu1 %v341_v31  ;;  %339 = vadd.xlane.f32.xlu0 %v338_v38  ;;  %v312_v39 = vpop.xlane.xlu0 %311 }
  0xa6   : > { %v320_v40 = vmul.f32 0.03125, %v312_v39  ;;  %v332_v42 = vmul.f32 %v1074_v36, %v1074_v36  ;;  %v333_v43 = vmul.f32 %v1077_v37, %v1077_v37 }
  0xa8   : > { %v1086_v44 = vsub.f32 %v1047_v12, %v320_v40  ;;  %v347_v45 = vsel %vm291_vm0, %v332_v42, 0.0  ;;  %v350_v46 = vsel %vm291_vm0, %v333_v43, 0.0 }
  0xa9   : > { %345 = vadd.xlane.f32.xlu0 %v344_v41  ;;  %348 = vadd.xlane.f32.xlu1 %v347_v45 }
  0xaa   : > { %v334_v47 = vmul.f32 %v1086_v44, %v1086_v44 }
  0xac   : > { %v353_v48 = vsel %vm291_vm0, %v334_v47, 0.0 }
  0xad   : > { %351 = vadd.xlane.f32.xlu0 %v350_v46  ;;  %354 = vadd.xlane.f32.xlu1 %v353_v48 }
 0x12a   : > { %v337_v54 = vpop.xlane.xlu1 %336 }
 0x12b   : > { %v356_v55 = vmul.f32 0.03125, %v337_v54  ;;  %v579_v54 = vld [vmem:[%s1246_s5 + $0x10] sm:$0xff] }
 0x12d   : > { %v363_v56 = vadd.f32 1e-05, %v356_v55  ;;  %v578_v55 = vld [vmem:[%s1246_s5 + $0x8] sm:$0xff] }
 0x12e   : > { %v343_v57 = vpop.xlane.xlu1 %342  ;;  %v340_v58 = vpop.xlane.xlu0 %339 }
 0x12f   : > { %929 = vrsqrt.f32 %v363_v56  ;;  %v358_v59 = vmul.f32 0.03125, %v343_v57  ;;  %v357_v60 = vmul.f32 0.03125, %v340_v58  ;;  %v577_v56 = vld [vmem:[%s1246_s5] sm:$0xff] }
 0x130   : > { %v793_v57 = vld [vmem:[%s1245_s4] ss:$0 sm:$0xff] }
 0x131   : > { %v365_v61 = vadd.f32 1e-05, %v358_v59  ;;  %v364_v62 = vadd.f32 1e-05, %v357_v60 }
 0x132   : > { %v349_v63 = vpop.xlane.xlu1 %348  ;;  %v346_v3 = vpop.xlane.xlu0 %345 }
 0x133   : > { %931 = vrsqrt.f32 %v365_v61  ;;  %v360_v4 = vmul.f32 0.03125, %v349_v63  ;;  %v359_v6 = vmul.f32 0.03125, %v346_v3 }
 0x134   : > { %933 = vrsqrt.f32 %v364_v62 }
 0x135   : > { %v366_v7 = vadd.f32 1e-05, %v359_v6  ;;  %v367_v10 = vadd.f32 1e-05, %v360_v4 }
 0x136   : > { %v352_v11 = vpop.xlane.xlu0 %351  ;;  %v355_v13 = vpop.xlane.xlu1 %354 }
 0x137   : > { %v361_v14 = vmul.f32 0.03125, %v352_v11  ;;  %935 = vrsqrt.f32 %v366_v7  ;;  %v362_v15 = vmul.f32 0.03125, %v355_v13 }
 0x138   : > { %937 = vrsqrt.f32 %v367_v10 }
 0x139   : > { %v368_v16 = vadd.f32 1e-05, %v361_v14  ;;  %v369_v22 = vadd.f32 1e-05, %v362_v15 }
 0x13b   : > { %939 = vrsqrt.f32 %v368_v16 }
 0x13c   : > { %v930_v17 = vpop.eup %929  ;;  %941 = vrsqrt.f32 %v369_v22 }
 0x13d   : > { %v377_v21 = vmul.f32 %v930_v17, %v1052_v18 }
 0x13f   : > { %v390_v24 = vmul.f32 %v791_v20, %v377_v21 }
 0x140   : > { %v932_v25 = vpop.eup %931 }
 0x141   : > { %v934_v28 = vpop.eup %933  ;;  %v403_v29 = vadd.f32 %v792_v23, %v390_v24  ;;  %v379_v31 = vmul.f32 %v932_v25, %v1055_v19 }
 0x142   : > { %v378_v30 = vmul.f32 %v934_v28, %v1062_v26 }
 0x143   : > { %846 = vmatmul.mubr.msk.f32.vlgmr.msra.gmra.mxu0 %vm291_vm0, %v403_v29  ;;  %v392_v34 = vmul.f32 %v791_v20, %v379_v31 }
 0x144   : > { %848 = vmatprep.mubr.msk.f32.mxu0 %vm966_vm1, %v965_v49  ;;  %v391_v18 = vmul.f32 %v791_v20, %v378_v30  ;;  %v936_v32 = vpop.eup %935 }
 0x145   : > { %v380_v35 = vmul.f32 %v936_v32, %v1065_v27  ;;  %v938_v38 = vpop.eup %937  ;;  %v405_v26 = vadd.f32 %v792_v23, %v392_v34 }
 0x146   : > { %v404_v33 = vadd.f32 %v792_v23, %v391_v18  ;;  %v381_v19 = vmul.f32 %v938_v38, %v1074_v36 }
 0x147   : > { %v393_v39 = vmul.f32 %v791_v20, %v380_v35 }
 0x148   : > { %849 = vmatmul.mubr.msk.f32.gmra.mxu0 %vm291_vm0, %v404_v33  ;;  %v940_v40 = vpop.eup %939  ;;  %v394_v42 = vmul.f32 %v791_v20, %v381_v19 }
 0x149   : > { %851 = vmatprep.mubr.msk.f32.mxu0 %vm966_vm1, %v965_v49  ;;  %v406_v41 = vadd.f32 %v792_v23, %v393_v39  ;;  %v382_v27 = vmul.f32 %v940_v40, %v1077_v37  ;;  %v942_v43 = vpop.eup %941 }
 0x14a   : > { %v407_v45 = vadd.f32 %v792_v23, %v394_v42  ;;  %v383_v36 = vmul.f32 %v942_v43, %v1086_v44  ;;  %v584_v44 = vld [vmem:[%s1246_s5 + $0x38] sm:$0xff] }
 0x14b   : > { %v395_v46 = vmul.f32 %v791_v20, %v382_v27  ;;  %867 = vmatpush3.msra.mxu0 %v584_v44  ;;  %911 = vmatpush3.msra.mxu1 %v584_v44 }
 0x14c   : > { %852 = vmatmul.mubr.msk.f32.gmra.mxu0 %vm291_vm0, %v405_v26  ;;  %v396_v48 = vmul.f32 %v791_v20, %v383_v36  ;;  %868 = vmatprep.subr.mxu0 %v965_v49 }
 0x14d   : > { %854 = vmatprep.mubr.msk.f32.mxu0 %vm966_vm1, %v965_v49  ;;  %v408_v47 = vadd.f32 %v792_v23, %v395_v46  ;;  %904 = vmatprep.subr.mxu1 %v965_v49 }
 0x14e   : > { %v409_v37 = vadd.f32 %v792_v23, %v396_v48  ;;  %869 = vmatpush3.msra.mxu0 %v583_v50  ;;  %912 = vmatpush3.msra.mxu1 %v583_v50 }
 0x14f   : > { %870 = vmatprep.subr.mxu0 %v965_v49  ;;  %905 = vmatprep.subr.mxu1 %v965_v49 }
 0x150   : > { %855 = vmatmul.mubr.msk.f32.gmra.mxu0 %vm291_vm0, %v406_v41  ;;  %913 = vmatpush3.msra.mxu1 %v582_v51 }
 0x151   : > { %857 = vmatprep.mubr.msk.f32.mxu0 %vm966_vm1, %v965_v49  ;;  %871 = vmatpush3.msra.mxu0 %v582_v51 }
 0x152   : > { %872 = vmatprep.subr.mxu0 %v965_v49  ;;  %906 = vmatprep.subr.mxu1 %v965_v49 }
 0x153   : > { %873 = vmatpush3.msra.mxu0 %v581_v52  ;;  %914 = vmatpush3.msra.mxu1 %v581_v52 }
 0x154   : > { %858 = vmatmul.mubr.msk.f32.gmra.mxu0 %vm291_vm0, %v407_v45  ;;  %874 = vmatprep.subr.mxu0 %v965_v49 }
 0x155   : > { %860 = vmatprep.mubr.msk.f32.mxu0 %vm966_vm1, %v965_v49  ;;  %907 = vmatprep.subr.mxu1 %v965_v49 }
 0x156   : > { %875 = vmatpush3.msra.mxu0 %v580_v53  ;;  %915 = vmatpush3.msra.mxu1 %v580_v53 }
 0x157   : > { %876 = vmatprep.subr.mxu0 %v965_v49  ;;  %908 = vmatprep.subr.mxu1 %v965_v49 }
 0x158   : > { %861 = vmatmul.mubr.msk.f32.gmra.mxu0 %vm291_vm0, %v408_v47  ;;  %916 = vmatpush3.msra.mxu1 %v579_v54 }
 0x159   : > { %863 = vmatprep.mubr.msk.f32.mxu0 %vm966_vm1, %v965_v49  ;;  %877 = vmatpush3.msra.mxu0 %v579_v54 }
 0x15a   : > { %878 = vmatprep.subr.mxu0 %v965_v49  ;;  %909 = vmatprep.subr.mxu1 %v965_v49 }
 0x15b   : > { %879 = vmatpush3.msra.mxu0 %v578_v55  ;;  %917 = vmatpush3.msra.mxu1 %v578_v55 }
 0x15c   : > { %864 = vmatmul.mubr.msk.f32.gmra.mxu0 %vm291_vm0, %v409_v37  ;;  %880 = vmatprep.subr.mxu0 %v965_v49 }
 0x15d   : > { %882 = vmatprep.mubr.msk.f32.mxu0 %vm966_vm1, %v965_v49  ;;  %910 = vmatprep.subr.mxu1 %v965_v49 }
 0x15e   : > { %881 = vmatpush3.msra.mxu0 %v577_v56  ;;  %918 = vmatpush3.msra.mxu1 %v577_v56 }
 0x203   : > { %v508_v58 = vpop.f32.mrf.mxu0 }
 0x204   : > { %v509_v59 = vadd.f32 %v793_v57, %v508_v58  ;;  %v801_v58 = vld [vmem:[%s1247_s6] ss:$0 sm:$0xff] }
 0x205   : > { %v847_v60 = vpop.f32.mrf.mxu0 }
 0x206   : > { %v549_v61 = vmul.f32 0.70710677, %v509_v59  ;;  %v542_v22 = vmul.f32 0.5, %v509_v59 }
 0x208   : > { %943 = verf.f32 %v549_v61  ;;  %v513_v62 = vpop.f32.mrf.mxu0 }
 0x209   : > { %v514_v63 = vadd.f32 %v793_v57, %v513_v62 }
 0x20a   : > { %v850_v3 = vpop.f32.mrf.mxu0 }
 0x20b   : > { %v550_v4 = vmul.f32 0.70710677, %v514_v63  ;;  %v543_v32 = vmul.f32 0.5, %v514_v63 }
 0x20c   : > { %v518_v6 = vpop.f32.mrf.mxu0 }
 0x20d   : > { %945 = verf.f32 %v550_v4  ;;  %v519_v7 = vadd.f32 %v793_v57, %v518_v6 }
 0x20e   : > { %v853_v10 = vpop.f32.mrf.mxu0 }
 0x20f   : > { %v551_v11 = vmul.f32 0.70710677, %v519_v7  ;;  %v544_v40 = vmul.f32 0.5, %v519_v7 }
 0x210   : > { %v523_v13 = vpop.f32.mrf.mxu0 }
 0x211   : > { %947 = verf.f32 %v551_v11  ;;  %v524_v14 = vadd.f32 %v793_v57, %v523_v13 }
 0x212   : > { %v856_v15 = vpop.f32.mrf.mxu0 }
 0x213   : > { %v552_v16 = vmul.f32 0.70710677, %v524_v14  ;;  %v545_v45 = vmul.f32 0.5, %v524_v14 }
 0x214   : > { %v528_v17 = vpop.f32.mrf.mxu0 }
 0x215   : > { %v944_v20 = vpop.eup %943  ;;  %949 = verf.f32 %v552_v16  ;;  %v529_v21 = vadd.f32 %v793_v57, %v528_v17 }
 0x216   : > { %v563_v23 = vadd.f32 1.0, %v944_v20  ;;  %v859_v24 = vpop.f32.mrf.mxu0 }
 0x217   : > { %v553_v25 = vmul.f32 0.70710677, %v529_v21  ;;  %v546_v48 = vmul.f32 0.5, %v529_v21 }
 0x218   : > { %v570_v28 = vmul.f32 %v563_v23, %v542_v22  ;;  %v533_v29 = vpop.f32.mrf.mxu0 }
 0x219   : > { %951 = verf.f32 %v553_v25  ;;  %v534_v30 = vadd.f32 %v793_v57, %v533_v29 }
 0x21a   : > { %v946_v31 = vpop.eup %945  ;;  %v862_v18 = vpop.f32.mrf.mxu0  ;;  %883 = vmatmul.mubr.msk.f32.vlgmr.msra.gmra.mxu0 %vm592_vm2, %v570_v28 }
 0x21b   : > { %v564_v33 = vadd.f32 1.0, %v946_v31  ;;  %v554_v34 = vmul.f32 0.70710677, %v534_v30  ;;  %v547_v51 = vmul.f32 0.5, %v534_v30 }
 0x21c   : > { %v538_v35 = vpop.f32.mrf.mxu0 }
 0x21d   : > { %v571_v38 = vmul.f32 %v564_v33, %v543_v32  ;;  %953 = verf.f32 %v554_v34  ;;  %v539_v26 = vadd.f32 %v793_v57, %v538_v35 }
 0x21e   : > { %v948_v39 = vpop.eup %947  ;;  %v865_v19 = vpop.f32.mrf.mxu0 }
 0x21f   : > { %v565_v41 = vadd.f32 1.0, %v948_v39  ;;  %v555_v42 = vmul.f32 0.70710677, %v539_v26  ;;  %886 = vmatmul.mubr.msk.f32.vlgmr.msra.gmra.mxu1 %vm592_vm2, %v571_v38  ;;  %v548_v55 = vmul.f32 0.5, %v539_v26 }
 0x220   : > { %888 = vmatprep.mubr.msk.f32.mxu1 %vm966_vm1, %v965_v49 }
 0x221   : > { %v572_v27 = vmul.f32 %v565_v41, %v544_v40  ;;  %955 = verf.f32 %v555_v42 }
 0x222   : > { %v950_v43 = vpop.eup %949 }
 0x223   : > { %v566_v46 = vadd.f32 1.0, %v950_v43  ;;  %889 = vmatmul.mubr.msk.f32.gmra.mxu1 %vm592_vm2, %v572_v27 }
 0x224   : > { %891 = vmatprep.mubr.msk.f32.mxu1 %vm966_vm1, %v965_v49 }
 0x225   : > { %v573_v36 = vmul.f32 %v566_v46, %v545_v45 }
 0x226   : > { %v952_v47 = vpop.eup %951 }
 0x227   : > { %v567_v37 = vadd.f32 1.0, %v952_v47  ;;  %892 = vmatmul.mubr.msk.f32.gmra.mxu1 %vm592_vm2, %v573_v36 }
 0x228   : > { %894 = vmatprep.mubr.msk.f32.mxu1 %vm966_vm1, %v965_v49 }
 0x229   : > { %v574_v44 = vmul.f32 %v567_v37, %v546_v48 }
 0x22a   : > { %v954_v50 = vpop.eup %953 }
 0x22b   : > { %v568_v52 = vadd.f32 1.0, %v954_v50  ;;  %895 = vmatmul.mubr.msk.f32.gmra.mxu1 %vm592_vm2, %v574_v44 }
 0x22c   : > { %897 = vmatprep.mubr.msk.f32.mxu1 %vm966_vm1, %v965_v49 }
 0x22d   : > { %v575_v53 = vmul.f32 %v568_v52, %v547_v51 }
 0x22e   : > { %v956_v54 = vpop.eup %955 }
 0x22f   : > { %v569_v56 = vadd.f32 1.0, %v956_v54  ;;  %898 = vmatmul.mubr.msk.f32.gmra.mxu1 %vm592_vm2, %v575_v53 }
 0x230   : > { %900 = vmatprep.mubr.msk.f32.mxu1 %vm966_vm1, %v965_v49 }
 0x231   : > { %v576_v57 = vmul.f32 %v569_v56, %v548_v55 }
 0x233   : > { %901 = vmatmul.mubr.msk.f32.gmra.mxu1 %vm592_vm2, %v576_v57 }
 0x2da   : > { %v680_v59 = vpop.f32.mrf.mxu0 }
 0x2db   : > { %v681_v60 = vadd.f32 %v801_v58, %v680_v59 }
 0x2dc   : > { %v884_v61 = vpop.f32.mrf.mxu0 }
 0x2dd   : > { %v714_v49 = vadd.f32 %v681_v60, %v1023_v0 }
 0x2df   : > { %721 = vst.msk [vmem:[%s1215_s22] sm:$0xff] %vm291_vm0, %v714_v49  ;;  %v685_v62 = vpop.f32.mrf.mxu1 }
 0x2e0   : > { %v686_v63 = vadd.f32 %v801_v58, %v685_v62 }
 0x2e1   : > { %v887_v3 = vpop.f32.mrf.mxu1 }
 0x2e2   : > { %v715_v4 = vadd.f32 %v686_v63, %v1027_v2 }
 0x2e3   : > { %v690_v6 = vpop.f32.mrf.mxu1 }
 0x2e4   : > { %722 = vst.msk [vmem:[%s1215_s22 + $0x8] sm:$0xff] %vm291_vm0, %v715_v4  ;;  %v691_v7 = vadd.f32 %v801_v58, %v690_v6 }
 0x2e5   : > { %v890_v10 = vpop.f32.mrf.mxu1 }
 0x2e6   : > { %v716_v11 = vadd.f32 %v691_v7, %v1025_v1 }
 0x2e7   : > { %v695_v13 = vpop.f32.mrf.mxu1 }
 0x2e8   : > { %723 = vst.msk [vmem:[%s1215_s22 + $0x10] sm:$0xff] %vm291_vm0, %v716_v11  ;;  %v696_v0 = vadd.f32 %v801_v58, %v695_v13 }
 0x2e9   : > { %v893_v14 = vpop.f32.mrf.mxu1 }
 0x2ea   : > { %v717_v15 = vadd.f32 %v696_v0, %v1033_v5 }
 0x2eb   : > { %v700_v16 = vpop.f32.mrf.mxu1 }
 0x2ec   : > { %724 = vst.msk [vmem:[%s1215_s22 + $0x18] sm:$0xff] %vm291_vm0, %v717_v15  ;;  %v701_v2 = vadd.f32 %v801_v58, %v700_v16 }
 0x2ed   : > { %v896_v17 = vpop.f32.mrf.mxu1 }
 0x2ee   : > { %v718_v20 = vadd.f32 %v701_v2, %v1039_v8 }
 0x2ef   : > { %v705_v21 = vpop.f32.mrf.mxu1 }
 0x2f0   : > { %725 = vst.msk [vmem:[%s1215_s22 + $0x20] sm:$0xff] %vm291_vm0, %v718_v20  ;;  %v706_v1 = vadd.f32 %v801_v58, %v705_v21 }
 0x2f1   : > { %v899_v22 = vpop.f32.mrf.mxu1 }
 0x2f2   : > { %v719_v23 = vadd.f32 %v706_v1, %v1041_v9 }
 0x2f3   : > { %v710_v24 = vpop.f32.mrf.mxu1 }
 0x2f4   : > { %726 = vst.msk [vmem:[%s1215_s22 + $0x28] sm:$0xff] %vm291_vm0, %v719_v23  ;;  %v711_v25 = vadd.f32 %v801_v58, %v710_v24 }
 0x2f5   : > { %v902_v5 = vpop.f32.mrf.mxu1 }
 0x2f6   : > { %v720_v28 = vadd.f32 %v711_v25, %v1047_v12 }
 0x2f8   : > { %727 = vst.msk [vmem:[%s1215_s22 + $0x30] sm:$0xff] %vm291_vm0, %v720_v28 }
 0x2f9 PF: > { %s17_s24 = sadd.s32 1, %s963_s24  }
 0x2fa   : > { %p14_p4 = scmp.ge.s32.totalorder %s17_s24, 4  }
 0x2fc   :  { %16 = sbr.rel (!%p14_p4) target bundleno = 1 (0x1), region = 78 }

// kernel: vit_forward.9
= control target key start
LH: loop header
LB: loop body
LE: loop exit
PB: predicated region body
PF: predicated region fallthrough
CT: control target
= control target key end

     0   :  { %s3189_s24 = smov 0   ;;  %s4218_s0 = inlined_call_operand.vmem [shape: f32[112,32], index: 0, kind: input, shape index: {}]   ;;  %s4219_s1 = inlined_call_operand.vmem [shape: f32[1,32], index: 1, kind: input, shape index: {}]   ;;  %s4220_s2 = inlined_call_operand.vmem [shape: f32[1,32], index: 2, kind: input, shape index: {}]   ;;  %s4221_s3 = inlined_call_operand.vmem [shape: f32[32,96], index: 3, kind: input, shape index: {}]   ;;  %s4222_s4 = inlined_call_operand.vmem [shape: f32[1,96], index: 4, kind: input, shape index: {}]   ;;  %s4223_s5 = inlined_call_operand.vmem [shape: f32[32,32], index: 5, kind: input, shape index: {}]   ;;  %s4224_s6 = inlined_call_operand.vmem [shape: f32[1,32], index: 6, kind: input, shape index: {}]   ;;  %s4225_s7 = inlined_call_operand.vmem [shape: f32[112,32], index: 7, kind: output, shape index: {}]  }
   0x1 LB: > { %s2377_s25 = sadd.s32 4294967295, %s3131_s24   ;;  %p2381_p0 = scmp.ge.s32.totalorder %s3131_s24, 1  ;;  %s3131_s24 = sphi %s3189_s24, %s17_s24  }
   0x2   : > { %p238_p1 = scmp.lt.s32.totalorder %s3131_s24, 3 }
   0x4   : > { %p239_p2 = pnand %p2381_p0, %p238_p1 }
   0x6   : > { %242 = sbr.rel (%p239_p2) target bundleno = 1925 (0x785), region = 48 }
   0xb   : > { %s270_s26 = smul.u32 7, %s2377_s25  ;;  %vm291_vm0 = vcmask 261120   ;;  %v4226_v49 = vmov 0.0   ;;  %v413_v50 = vld [vmem:[%s4221_s3 + $0x18] sm:$0xff]  ;;  %v412_v51 = vld [vmem:[%s4221_s3 + $0x10] sm:$0xff]  ;;  %vm3134_vm1 = vmmov 0  }
   0xc   : > { %2622 = vmatprep.subr.mxu0 %v4226_v49  ;;  %2651 = vmatprep.subr.mxu1 %v4226_v49  ;;  %v411_v52 = vld [vmem:[%s4221_s3 + $0x8] sm:$0xff]  ;;  %v410_v53 = vld [vmem:[%s4221_s3] sm:$0xff]  ;;  %s3135_s22 = smov 96   ;;  %s3136_s23 = smov 88   ;;  %vm566_vm2 = vcmask 64512   ;;  %vm702_vm4 = vcmask 457728  }
   0xd   : > { %p271_p3 = scmp.lt.s32.totalorder %s270_s26, 13  ;;  %2623 = vmatpush3.msra.mxu0 %v413_v50  ;;  %2630 = vmatprep.mubr.msk.f32.mxu0 %vm3134_vm1, %v4226_v49  ;;  %s3137_s25 = smov 120   ;;  %vm2159_vm5 = vcmask 130048   ;;  %vm2167_vm6 = vcmask 195584  }
   0xe   : > { %2624 = vmatprep.subr.mxu0 %v4226_v49  ;;  %2665 = vmatprep.mubr.msk.f32.mxu1 %vm3134_vm1, %v4226_v49  ;;  %s3138_s28 = smov 80   ;;  %s3139_s29 = smov 112  }
   0xf   : > { %s4232_s26 = smov (!%p271_p3, %s270_s26), 13  ;;  %2625 = vmatpush3.msra.mxu0 %v412_v51  ;;  %s3140_s8 = smov 72  }
  0x10   : > { %s2382_s27 = sshll.u32 %s4232_s26, 3  ;;  %2626 = vmatprep.subr.mxu0 %v4226_v49  ;;  %s3141_s9 = smov 104  }
  0x11   : > { %s3205_s30 = scalar_lea.vmem %s4218_s0, %s2382_s27  ;;  %2627 = vmatpush3.msra.mxu0 %v411_v52  ;;  %v2386_v52 = vld [vmem:[%s4222_s4] ss:$0 sm:$0xff]  ;;  %s3142_s10 = smov 64  }
  0x12   : > { %v282_v0 = vld [vmem:[%s3205_s30] sm:$0xff]  ;;  %v284_v1 = vld [vmem:[%s3205_s30 + $0x10] sm:$0xff]  ;;  %v283_v2 = vld [vmem:[%s3205_s30 + $0x8] sm:$0xff]  ;;  %2628 = vmatprep.subr.mxu0 %v4226_v49  ;;  %s3143_s11 = smov 56   ;;  %s3144_s12 = smov 48  }
  0x13   : > { %v292_v3 = vsel %vm291_vm0, %v282_v0, 0.0  ;;  %v298_v4 = vsel %vm291_vm0, %v284_v1, 0.0  ;;  %v285_v5 = vld [vmem:[%s3205_s30 + $0x18] sm:$0xff]  ;;  %v295_v6 = vsel %vm291_vm0, %v283_v2, 0.0  ;;  %v286_v8 = vld [vmem:[%s3205_s30 + $0x20] sm:$0xff]  ;;  %v287_v9 = vld [vmem:[%s3205_s30 + $0x28] sm:$0xff]  ;;  %2629 = vmatpush3.msra.mxu0 %v410_v53 }
  0x14   : > { %293 = vadd.xlane.f32.xlu0 %v292_v3  ;;  %299 = vadd.xlane.f32.xlu1 %v298_v4  ;;  %v301_v7 = vsel %vm291_vm0, %v285_v5, 0.0  ;;  %v304_v10 = vsel %vm291_vm0, %v286_v8, 0.0  ;;  %v307_v11 = vsel %vm291_vm0, %v287_v9, 0.0  ;;  %v288_v12 = vld [vmem:[%s3205_s30 + $0x30] sm:$0xff]  ;;  %s3145_s13 = smov 40   ;;  %s3146_s14 = smov 8  }
  0x15   : > { %v310_v13 = vsel %vm291_vm0, %v288_v12, 0.0  ;;  %2686 = vmatprep.subr.mxu0 %v4226_v49  ;;  %s3147_s15 = smov 16  }
  0x18   : > { %296 = vadd.xlane.f32.xlu0 %v295_v6  ;;  %302 = vadd.xlane.f32.xlu1 %v301_v7 }
  0x1c   : > { %305 = vadd.xlane.f32.xlu0 %v304_v10  ;;  %308 = vadd.xlane.f32.xlu1 %v307_v11  ;;  %v2384_v11 = vld [vmem:[%s4219_s1] ss:$0 sm:$0xff] }
  0x20   : > { %311 = vadd.xlane.f32.xlu0 %v310_v13 }
  0x9d   : > { %v294_v14 = vpop.xlane.xlu0 %293  ;;  %v300_v15 = vpop.xlane.xlu1 %299 }
  0x9e   : > { %v314_v16 = vmul.f32 0.03125, %v294_v14  ;;  %v316_v17 = vmul.f32 0.03125, %v300_v15  ;;  %v2385_v14 = vld [vmem:[%s4220_s2] ss:$0 sm:$0xff] }
  0xa0   : > { %v3221_v18 = vsub.f32 %v282_v0, %v314_v16  ;;  %v3223_v19 = vsub.f32 %v284_v1, %v316_v17 }
  0xa1   : > { %v297_v20 = vpop.xlane.xlu0 %296  ;;  %v303_v21 = vpop.xlane.xlu1 %302 }
  0xa2   : > { %v315_v22 = vmul.f32 0.03125, %v297_v20  ;;  %v317_v23 = vmul.f32 0.03125, %v303_v21  ;;  %v328_v24 = vmul.f32 %v3221_v18, %v3221_v18  ;;  %v330_v25 = vmul.f32 %v3223_v19, %v3223_v19 }
  0xa4   : > { %v3229_v26 = vsub.f32 %v283_v2, %v315_v22  ;;  %v3231_v27 = vsub.f32 %v285_v5, %v317_v23  ;;  %v335_v28 = vsel %vm291_vm0, %v328_v24, 0.0  ;;  %v341_v31 = vsel %vm291_vm0, %v330_v25, 0.0 }
  0xa5   : > { %336 = vadd.xlane.f32.xlu1 %v335_v28  ;;  %v306_v29 = vpop.xlane.xlu0 %305  ;;  %v309_v30 = vpop.xlane.xlu1 %308 }
  0xa6   : > { %v318_v32 = vmul.f32 0.03125, %v306_v29  ;;  %v319_v33 = vmul.f32 0.03125, %v309_v30  ;;  %v329_v34 = vmul.f32 %v3229_v26, %v3229_v26  ;;  %v331_v35 = vmul.f32 %v3231_v27, %v3231_v27 }
  0xa8   : > { %v3239_v36 = vsub.f32 %v286_v8, %v318_v32  ;;  %v3241_v37 = vsub.f32 %v287_v9, %v319_v33  ;;  %v338_v38 = vsel %vm291_vm0, %v329_v34, 0.0  ;;  %v344_v41 = vsel %vm291_vm0, %v331_v35, 0.0 }
  0xa9   : > { %342 = vadd.xlane.f32.xlu1 %v341_v31  ;;  %339 = vadd.xlane.f32.xlu0 %v338_v38  ;;  %v312_v39 = vpop.xlane.xlu0 %311 }
  0xaa   : > { %v320_v40 = vmul.f32 0.03125, %v312_v39  ;;  %v332_v42 = vmul.f32 %v3239_v36, %v3239_v36  ;;  %v333_v43 = vmul.f32 %v3241_v37, %v3241_v37 }
  0xac   : > { %v3249_v44 = vsub.f32 %v288_v12, %v320_v40  ;;  %v347_v45 = vsel %vm291_vm0, %v332_v42, 0.0  ;;  %v350_v46 = vsel %vm291_vm0, %v333_v43, 0.0 }
  0xad   : > { %345 = vadd.xlane.f32.xlu0 %v344_v41  ;;  %348 = vadd.xlane.f32.xlu1 %v347_v45 }
  0xae   : > { %v334_v47 = vmul.f32 %v3249_v44, %v3249_v44 }
  0xb0   : > { %v353_v48 = vsel %vm291_vm0, %v334_v47, 0.0 }
  0xb1   : > { %351 = vadd.xlane.f32.xlu0 %v350_v46  ;;  %354 = vadd.xlane.f32.xlu1 %v353_v48 }
 0x12e   : > { %v337_v54 = vpop.xlane.xlu1 %336 }
 0x12f   : > { %v356_v55 = vmul.f32 0.03125, %v337_v54 }
 0x131   : > { %v363_v56 = vadd.f32 1e-05, %v356_v55 }
 0x132   : > { %v343_v57 = vpop.xlane.xlu1 %342  ;;  %v340_v58 = vpop.xlane.xlu0 %339 }
 0x133   : > { %2992 = vrsqrt.f32 %v363_v56  ;;  %v358_v59 = vmul.f32 0.03125, %v343_v57  ;;  %v357_v60 = vmul.f32 0.03125, %v340_v58 }
 0x135   : > { %v365_v61 = vadd.f32 1e-05, %v358_v59  ;;  %v364_v62 = vadd.f32 1e-05, %v357_v60 }
 0x136   : > { %v349_v63 = vpop.xlane.xlu1 %348  ;;  %v346_v0 = vpop.xlane.xlu0 %345 }
 0x137   : > { %2994 = vrsqrt.f32 %v365_v61  ;;  %v360_v1 = vmul.f32 0.03125, %v349_v63  ;;  %v359_v2 = vmul.f32 0.03125, %v346_v0 }
 0x138   : > { %2996 = vrsqrt.f32 %v364_v62 }
 0x139   : > { %v366_v3 = vadd.f32 1e-05, %v359_v2  ;;  %v367_v4 = vadd.f32 1e-05, %v360_v1 }
 0x13a   : > { %v352_v5 = vpop.xlane.xlu0 %351  ;;  %v355_v6 = vpop.xlane.xlu1 %354 }
 0x13b   : > { %v361_v7 = vmul.f32 0.03125, %v352_v5  ;;  %2998 = vrsqrt.f32 %v366_v3  ;;  %v362_v8 = vmul.f32 0.03125, %v355_v6 }
 0x13c   : > { %3000 = vrsqrt.f32 %v367_v4 }
 0x13d   : > { %v368_v9 = vadd.f32 1e-05, %v361_v7  ;;  %v369_v13 = vadd.f32 1e-05, %v362_v8 }
 0x13f   : > { %3002 = vrsqrt.f32 %v368_v9 }
 0x140   : > { %v2993_v10 = vpop.eup %2992  ;;  %3004 = vrsqrt.f32 %v369_v13 }
 0x141   : > { %v377_v12 = vmul.f32 %v2993_v10, %v3221_v18 }
 0x143   : > { %v390_v15 = vmul.f32 %v2384_v11, %v377_v12 }
 0x144   : > { %v2995_v16 = vpop.eup %2994 }
 0x145   : > { %v2997_v17 = vpop.eup %2996  ;;  %v403_v20 = vadd.f32 %v2385_v14, %v390_v15  ;;  %v379_v22 = vmul.f32 %v2995_v16, %v3223_v19 }
 0x146   : > { %v378_v21 = vmul.f32 %v2997_v17, %v3229_v26 }
 0x147   : > { %2631 = vmatmul.mubr.msk.f32.vlgmr.msra.gmra.mxu0 %vm291_vm0, %v403_v20  ;;  %v392_v25 = vmul.f32 %v2384_v11, %v379_v22 }
 0x148   : > { %2633 = vmatprep.mubr.msk.f32.mxu0 %vm3134_vm1, %v4226_v49  ;;  %v391_v18 = vmul.f32 %v2384_v11, %v378_v21  ;;  %v2999_v23 = vpop.eup %2998 }
 0x149   : > { %v380_v28 = vmul.f32 %v2999_v23, %v3231_v27  ;;  %v3001_v29 = vpop.eup %3000  ;;  %v405_v26 = vadd.f32 %v2385_v14, %v392_v25 }
 0x14a   : > { %v404_v24 = vadd.f32 %v2385_v14, %v391_v18  ;;  %v381_v19 = vmul.f32 %v3001_v29, %v3239_v36 }
 0x14b   : > { %v393_v30 = vmul.f32 %v2384_v11, %v380_v28 }
 0x14c   : > { %2634 = vmatmul.mubr.msk.f32.gmra.mxu0 %vm291_vm0, %v404_v24  ;;  %v3003_v31 = vpop.eup %3002  ;;  %v394_v33 = vmul.f32 %v2384_v11, %v381_v19 }
 0x14d   : > { %2636 = vmatprep.mubr.msk.f32.mxu0 %vm3134_vm1, %v4226_v49  ;;  %v406_v32 = vadd.f32 %v2385_v14, %v393_v30  ;;  %v382_v27 = vmul.f32 %v3003_v31, %v3241_v37  ;;  %v3005_v34 = vpop.eup %3004 }
 0x14e   : > { %v407_v35 = vadd.f32 %v2385_v14, %v394_v33  ;;  %v383_v36 = vmul.f32 %v3005_v34, %v3249_v44 }
 0x14f   : > { %v395_v38 = vmul.f32 %v2384_v11, %v382_v27 }
 0x150   : > { %2637 = vmatmul.mubr.msk.f32.gmra.mxu0 %vm291_vm0, %v405_v26  ;;  %v396_v40 = vmul.f32 %v2384_v11, %v383_v36 }
 0x151   : > { %2639 = vmatprep.mubr.msk.f32.mxu0 %vm3134_vm1, %v4226_v49  ;;  %v408_v39 = vadd.f32 %v2385_v14, %v395_v38 }
 0x152   : > { %v409_v37 = vadd.f32 %v2385_v14, %v396_v40 }
 0x154   : > { %2640 = vmatmul.mubr.msk.f32.gmra.mxu0 %vm291_vm0, %v406_v32 }
 0x155   : > { %2642 = vmatprep.mubr.msk.f32.mxu0 %vm3134_vm1, %v4226_v49 }
 0x158   : > { %2643 = vmatmul.mubr.msk.f32.gmra.mxu0 %vm291_vm0, %v407_v35 }
 0x159   : > { %2645 = vmatprep.mubr.msk.f32.mxu0 %vm3134_vm1, %v4226_v49 }
 0x15c   : > { %2646 = vmatmul.mubr.msk.f32.gmra.mxu0 %vm291_vm0, %v408_v39 }
 0x15d   : > { %2648 = vmatprep.mubr.msk.f32.mxu0 %vm3134_vm1, %v4226_v49 }
 0x160   : > { %2649 = vmatmul.mubr.msk.f32.gmra.mxu0 %vm291_vm0, %v409_v37 }
 0x161   : > { %2700 = vmatprep.mubr.msk.f32.mxu0 %vm3134_vm1, %v4226_v49 }
 0x207   : > { %v508_v41 = vpop.f32.mrf.mxu0 }
 0x208   : > { %v3330_v62 = vadd.f32 %v2386_v52, %v508_v41 }
 0x209   : > { %v2632_v42 = vpop.f32.mrf.mxu0 }
 0x20c   : > { %v513_v43 = vpop.f32.mrf.mxu0 }
 0x20d   : > { %v3332_v63 = vadd.f32 %v2386_v52, %v513_v43 }
 0x20e   : > { %v2635_v44 = vpop.f32.mrf.mxu0 }
 0x210   : > { %v518_v45 = vpop.f32.mrf.mxu0 }
 0x211   : > { %v3324_v60 = vadd.f32 %v2386_v52, %v518_v45 }
 0x212   : > { %v2638_v46 = vpop.f32.mrf.mxu0 }
 0x214   : > { %v523_v47 = vpop.f32.mrf.mxu0 }
 0x215   : > { %v3326_v61 = vadd.f32 %v2386_v52, %v523_v47 }
 0x216   : > { %v2641_v48 = vpop.f32.mrf.mxu0 }
 0x218   : > { %v528_v50 = vpop.f32.mrf.mxu0 }
 0x219   : > { %v3318_v57 = vadd.f32 %v2386_v52, %v528_v50 }
 0x21a   : > { %v2644_v51 = vpop.f32.mrf.mxu0 }
 0x21c   : > { %v533_v53 = vpop.f32.mrf.mxu0 }
 0x21d   : > { %v3315_v54 = vadd.f32 %v2386_v52, %v533_v53 }
 0x21e   : > { %v2647_v55 = vpop.f32.mrf.mxu0 }
 0x21f   : > { %562 = vrot.lane.b32.xlu1 %v3315_v54, %s3135_s22 }
 0x220   : > { %v538_v56 = vpop.f32.mrf.mxu0 }
 0x221   : > { %v3320_v58 = vadd.f32 %v2386_v52, %v538_v56 }
 0x222   : > { %v2650_v59 = vpop.f32.mrf.mxu0 }
 0x223   : > { %560 = vrot.lane.b32.xlu1 %v3318_v57, %s3135_s22  ;;  %564 = vrot.lane.b32.xlu0 %v3320_v58, %s3135_s22 }
 0x227   : > { %558 = vrot.lane.b32.xlu1 %v3326_v61, %s3135_s22  ;;  %556 = vrot.lane.b32.xlu0 %v3324_v60, %s3135_s22 }
 0x22b   : > { %554 = vrot.lane.b32.xlu1 %v3332_v63, %s3135_s22  ;;  %552 = vrot.lane.b32.xlu0 %v3330_v62, %s3135_s22 }
 0x22f   : > { %948 = vrot.lane.b32.xlu1 %v3320_v58, %s3136_s23  ;;  %946 = vrot.lane.b32.xlu0 %v3315_v54, %s3136_s23 }
 0x233   : > { %944 = vrot.lane.b32.xlu1 %v3318_v57, %s3136_s23  ;;  %942 = vrot.lane.b32.xlu0 %v3326_v61, %s3136_s23 }
 0x237   : > { %940 = vrot.lane.b32.xlu1 %v3324_v60, %s3136_s23  ;;  %938 = vrot.lane.b32.xlu0 %v3332_v63, %s3136_s23 }
 0x23b   : > { %936 = vrot.lane.b32.xlu1 %v3330_v62, %s3136_s23  ;;  %922 = vrot.lane.b32.xlu0 %v3330_v62, %s3137_s25 }
 0x23f   : > { %1330 = vrot.lane.b32.xlu1 %v3320_v58, %s3138_s28  ;;  %924 = vrot.lane.b32.xlu0 %v3332_v63, %s3137_s25 }
 0x243   : > { %1328 = vrot.lane.b32.xlu1 %v3315_v54, %s3138_s28  ;;  %926 = vrot.lane.b32.xlu0 %v3324_v60, %s3137_s25 }
 0x247   : > { %1326 = vrot.lane.b32.xlu1 %v3318_v57, %s3138_s28  ;;  %928 = vrot.lane.b32.xlu0 %v3326_v61, %s3137_s25 }
 0x24b   : > { %1324 = vrot.lane.b32.xlu1 %v3326_v61, %s3138_s28  ;;  %930 = vrot.lane.b32.xlu0 %v3318_v57, %s3137_s25 }
 0x24f   : > { %1322 = vrot.lane.b32.xlu1 %v3324_v60, %s3138_s28  ;;  %932 = vrot.lane.b32.xlu0 %v3315_v54, %s3137_s25 }
 0x253   : > { %1320 = vrot.lane.b32.xlu1 %v3332_v63, %s3138_s28  ;;  %934 = vrot.lane.b32.xlu0 %v3320_v58, %s3137_s25  ;;  %s3148_s25 = smov 24  }
 0x257   : > { %1318 = vrot.lane.b32.xlu1 %v3330_v62, %s3138_s28  ;;  %1304 = vrot.lane.b32.xlu0 %v3330_v62, %s3139_s29 }
 0x25b   : > { %1712 = vrot.lane.b32.xlu1 %v3320_v58, %s3140_s8  ;;  %1306 = vrot.lane.b32.xlu0 %v3332_v63, %s3139_s29 }
 0x25f   : > { %1710 = vrot.lane.b32.xlu1 %v3315_v54, %s3140_s8  ;;  %1308 = vrot.lane.b32.xlu0 %v3324_v60, %s3139_s29 }
 0x263   : > { %1708 = vrot.lane.b32.xlu1 %v3318_v57, %s3140_s8  ;;  %1310 = vrot.lane.b32.xlu0 %v3326_v61, %s3139_s29 }
 0x267   : > { %1706 = vrot.lane.b32.xlu1 %v3326_v61, %s3140_s8  ;;  %1312 = vrot.lane.b32.xlu0 %v3318_v57, %s3139_s29 }
 0x26b   : > { %1704 = vrot.lane.b32.xlu1 %v3324_v60, %s3140_s8  ;;  %1314 = vrot.lane.b32.xlu0 %v3315_v54, %s3139_s29 }
 0x26f   : > { %1702 = vrot.lane.b32.xlu1 %v3332_v63, %s3140_s8  ;;  %1316 = vrot.lane.b32.xlu0 %v3320_v58, %s3139_s29 }
 0x273   : > { %1700 = vrot.lane.b32.xlu1 %v3330_v62, %s3140_s8  ;;  %1686 = vrot.lane.b32.xlu0 %v3330_v62, %s3141_s9 }
 0x277   : > { %1688 = vrot.lane.b32.xlu1 %v3332_v63, %s3141_s9  ;;  %1690 = vrot.lane.b32.xlu0 %v3324_v60, %s3141_s9 }
 0x27b   : > { %1692 = vrot.lane.b32.xlu1 %v3326_v61, %s3141_s9  ;;  %1694 = vrot.lane.b32.xlu0 %v3318_v57, %s3141_s9 }
 0x27f   : > { %1696 = vrot.lane.b32.xlu1 %v3315_v54, %s3141_s9  ;;  %1698 = vrot.lane.b32.xlu0 %v3320_v58, %s3141_s9 }
 0x283   : > { %788 = vrot.lane.b32.xlu1 %v3318_v57, %s3142_s10  ;;  %790 = vrot.lane.b32.xlu0 %v3315_v54, %s3142_s10 }
 0x287   : > { %786 = vrot.lane.b32.xlu1 %v3326_v61, %s3142_s10  ;;  %784 = vrot.lane.b32.xlu0 %v3324_v60, %s3142_s10 }
 0x28b   : > { %1170 = vrot.lane.b32.xlu1 %v3318_v57, %s3143_s11  ;;  %782 = vrot.lane.b32.xlu0 %v3332_v63, %s3142_s10 }
 0x28f   : > { %1164 = vrot.lane.b32.xlu1 %v3332_v63, %s3143_s11  ;;  %780 = vrot.lane.b32.xlu0 %v3330_v62, %s3142_s10 }
 0x291   : > { %v563_v0 = vpop.permute.xlu1 %562 }
 0x293   : > { %1552 = vrot.lane.b32.xlu1 %v3318_v57, %s3144_s12  ;;  %1172 = vrot.lane.b32.xlu0 %v3315_v54, %s3143_s11 }
 0x295   : > { %v561_v1 = vpop.permute.xlu1 %560  ;;  %v565_v2 = vpop.permute.xlu0 %564 }
 0x296   : > { %2652 = vmatpush3.xpose.msk.msra.mxu1 %vm566_vm2, %v565_v2 }
 0x297   : > { %1546 = vrot.lane.b32.xlu1 %v3332_v63, %s3144_s12  ;;  %1168 = vrot.lane.b32.xlu0 %v3326_v61, %s3143_s11 }
 0x298   : > { %2653 = vmatprep.subr.mxu1 %v4226_v49 }
 0x299   : > { %v559_v3 = vpop.permute.xlu1 %558  ;;  %v557_v4 = vpop.permute.xlu0 %556 }
 0x29a   : > { %2654 = vmatpush3.xpose.msk.msra.mxu1 %vm566_vm2, %v563_v0 }
 0x29b   : > { %792 = vrot.lane.b32.xlu1 %v3320_v58, %s3142_s10  ;;  %1166 = vrot.lane.b32.xlu0 %v3324_v60, %s3143_s11  ;;  %s4192_s10 = scalar_lea.vmem %s4225_s7, %s2382_s27 }
 0x29c   : > { %2655 = vmatprep.subr.mxu1 %v4226_v49 }
 0x29d   : > { %v555_v5 = vpop.permute.xlu1 %554  ;;  %v553_v6 = vpop.permute.xlu0 %552 }
 0x29e   : > { %2656 = vmatpush3.xpose.msk.msra.mxu1 %vm566_vm2, %v561_v1 }
 0x29f   : > { %1174 = vrot.lane.b32.xlu1 %v3320_v58, %s3143_s11  ;;  %1162 = vrot.lane.b32.xlu0 %v3330_v62, %s3143_s11 }
 0x2a0   : > { %2657 = vmatprep.subr.mxu1 %v4226_v49 }
 0x2a1   : > { %v949_v7 = vpop.permute.xlu1 %948  ;;  %v947_v8 = vpop.permute.xlu0 %946 }
 0x2a2   : > { %2658 = vmatpush3.xpose.msk.msra.mxu1 %vm566_vm2, %v559_v3  ;;  %v542_v3 = vlaneseq }
 0x2a3   : > { %1556 = vrot.lane.b32.xlu1 %v3320_v58, %s3144_s12  ;;  %1554 = vrot.lane.b32.xlu0 %v3315_v54, %s3144_s12 }
 0x2a4   : > { %2659 = vmatprep.subr.mxu1 %v4226_v49 }
 0x2a5   : > { %v945_v9 = vpop.permute.xlu1 %944  ;;  %v943_v10 = vpop.permute.xlu0 %942 }
 0x2a6   : > { %2660 = vmatpush3.xpose.msk.msra.mxu1 %vm566_vm2, %v557_v4  ;;  %v3570_v4 = vand.u32 127, %v542_v3 }
 0x2a7   : > { %1550 = vrot.lane.b32.xlu0 %v3326_v61, %s3144_s12  ;;  %2661 = vmatprep.subr.mxu1 %v4226_v49 }
 0x2a8   : > { %vm544_vm3 = vcmp.lt.s32.totalorder %v3570_v4, 49 }
 0x2a9   : > { %v941_v11 = vpop.permute.xlu1 %940  ;;  %v939_v12 = vpop.permute.xlu0 %938 }
 0x2aa   : > { %2662 = vmatpush3.xpose.msk.msra.mxu1 %vm566_vm2, %v555_v5 }
 0x2ab   : > { %1548 = vrot.lane.b32.xlu0 %v3324_v60, %s3144_s12  ;;  %2663 = vmatprep.subr.mxu1 %v4226_v49 }
 0x2ad   : > { %v937_v13 = vpop.permute.xlu1 %936  ;;  %v923_v14 = vpop.permute.xlu0 %922 }
 0x2ae   : > { %2664 = vmatpush3.xpose.msk.msra.mxu1 %vm566_vm2, %v553_v6 }
 0x2af   : > { %1544 = vrot.lane.b32.xlu0 %v3330_v62, %s3144_s12  ;;  %2721 = vmatprep.subr.mxu1 %v4226_v49 }
 0x2b1   : > { %v1331_v15 = vpop.permute.xlu1 %1330  ;;  %2666 = vmatmul.mubr.msk.f32.vlgmr.msra.gmra.mxu1 %vm566_vm2, %v3330_v62  ;;  %v925_v16 = vpop.permute.xlu0 %924 }
 0x2b2   : > { %2722 = vmatpush3.xpose.msk.msra.mxu1 %vm566_vm2, %v949_v7  ;;  %2668 = vmatprep.mubr.msk.f32.mxu1 %vm3134_vm1, %v4226_v49 }
 0x2b3   : > { %1936 = vrot.lane.b32.xlu0 %v3315_v54, %s3145_s13  ;;  %2723 = vmatprep.subr.mxu1 %v4226_v49 }
 0x2b5   : > { %v1329_v17 = vpop.permute.xlu1 %1328  ;;  %2669 = vmatmul.mubr.msk.f32.gmra.mxu1 %vm566_vm2, %v3332_v63  ;;  %v927_v20 = vpop.permute.xlu0 %926 }
 0x2b6   : > { %2724 = vmatpush3.xpose.msk.msra.mxu1 %vm566_vm2, %v947_v8  ;;  %2671 = vmatprep.mubr.msk.f32.mxu1 %vm3134_vm1, %v4226_v49 }
 0x2b7   : > { %2725 = vmatprep.subr.mxu1 %v4226_v49 }
 0x2b9   : > { %v1327_v21 = vpop.permute.xlu1 %1326  ;;  %2672 = vmatmul.mubr.msk.f32.gmra.mxu1 %vm566_vm2, %v3324_v60  ;;  %v929_v22 = vpop.permute.xlu0 %928 }
 0x2ba   : > { %2726 = vmatpush3.xpose.msk.msra.mxu1 %vm566_vm2, %v945_v9  ;;  %2674 = vmatprep.mubr.msk.f32.mxu1 %vm3134_vm1, %v4226_v49 }
 0x2bb   : > { %2727 = vmatprep.subr.mxu1 %v4226_v49 }
 0x2bd   : > { %v1325_v18 = vpop.permute.xlu1 %1324  ;;  %2675 = vmatmul.mubr.msk.f32.gmra.mxu1 %vm566_vm2, %v3326_v61  ;;  %v931_v23 = vpop.permute.xlu0 %930 }
 0x2be   : > { %2728 = vmatpush3.xpose.msk.msra.mxu1 %vm566_vm2, %v943_v10  ;;  %2677 = vmatprep.mubr.msk.f32.mxu1 %vm3134_vm1, %v4226_v49 }
 0x2bf   : > { %2729 = vmatprep.subr.mxu1 %v4226_v49 }
 0x2c1   : > { %v1323_v24 = vpop.permute.xlu1 %1322  ;;  %2678 = vmatmul.mubr.msk.f32.gmra.mxu1 %vm566_vm2, %v3318_v57  ;;  %v933_v25 = vpop.permute.xlu0 %932 }
 0x2c2   : > { %2730 = vmatpush3.xpose.msk.msra.mxu1 %vm566_vm2, %v941_v11  ;;  %2680 = vmatprep.mubr.msk.f32.mxu1 %vm3134_vm1, %v4226_v49 }
 0x2c3   : > { %2731 = vmatprep.subr.mxu1 %v4226_v49 }
 0x2c5   : > { %v1321_v28 = vpop.permute.xlu1 %1320  ;;  %2681 = vmatmul.mubr.msk.f32.gmra.mxu1 %vm566_vm2, %v3315_v54  ;;  %v935_v29 = vpop.permute.xlu0 %934 }
 0x2c6   : > { %2732 = vmatpush3.xpose.msk.msra.mxu1 %vm566_vm2, %v939_v12  ;;  %2683 = vmatprep.mubr.msk.f32.mxu1 %vm3134_vm1, %v4226_v49 }
 0x2c7   : > { %2733 = vmatprep.subr.mxu1 %v4226_v49 }
 0x2c9   : > { %v1319_v26 = vpop.permute.xlu1 %1318  ;;  %2684 = vmatmul.mubr.msk.f32.gmra.mxu1 %vm566_vm2, %v3320_v58  ;;  %v1305_v30 = vpop.permute.xlu0 %1304 }
 0x2ca   : > { %2734 = vmatpush3.xpose.msk.msra.mxu1 %vm566_vm2, %v937_v13  ;;  %2735 = vmatprep.mubr.msk.f32.mxu1 %vm3134_vm1, %v4226_v49 }
 0x2cb   : > { %2791 = vmatprep.subr.mxu1 %v4226_v49 }
 0x2cd   : > { %v1713_v19 = vpop.permute.xlu1 %1712  ;;  %2736 = vmatmul.mubr.msk.f32.vlgmr.msra.gmra.mxu1 %vm566_vm2, %v923_v14  ;;  %v1307_v31 = vpop.permute.xlu0 %1306 }
 0x2ce   : > { %2792 = vmatpush3.xpose.msk.msra.mxu1 %vm566_vm2, %v1331_v15  ;;  %2738 = vmatprep.mubr.msk.f32.mxu1 %vm3134_vm1, %v4226_v49 }
 0x2cf   : > { %2793 = vmatprep.subr.mxu1 %v4226_v49 }
 0x2d1   : > { %v1711_v32 = vpop.permute.xlu1 %1710  ;;  %2739 = vmatmul.mubr.msk.f32.gmra.mxu1 %vm566_vm2, %v925_v16  ;;  %v1309_v33 = vpop.permute.xlu0 %1308 }
 0x2d2   : > { %2794 = vmatpush3.xpose.msk.msra.mxu1 %vm566_vm2, %v1329_v17  ;;  %2741 = vmatprep.mubr.msk.f32.mxu1 %vm3134_vm1, %v4226_v49 }
 0x2d3   : > { %2795 = vmatprep.subr.mxu1 %v4226_v49 }
 0x2d5   : > { %v1709_v27 = vpop.permute.xlu1 %1708  ;;  %2742 = vmatmul.mubr.msk.f32.gmra.mxu1 %vm566_vm2, %v927_v20  ;;  %v1311_v34 = vpop.permute.xlu0 %1310 }
 0x2d6   : > { %2796 = vmatpush3.xpose.msk.msra.mxu1 %vm566_vm2, %v1327_v21  ;;  %2744 = vmatprep.mubr.msk.f32.mxu1 %vm3134_vm1, %v4226_v49 }
 0x2d7   : > { %2797 = vmatprep.subr.mxu1 %v4226_v49 }
 0x2d9   : > { %v1707_v35 = vpop.permute.xlu1 %1706  ;;  %2745 = vmatmul.mubr.msk.f32.gmra.mxu1 %vm566_vm2, %v929_v22  ;;  %v1313_v38 = vpop.permute.xlu0 %1312 }
 0x2da   : > { %2798 = vmatpush3.xpose.msk.msra.mxu1 %vm566_vm2, %v1325_v18  ;;  %2747 = vmatprep.mubr.msk.f32.mxu1 %vm3134_vm1, %v4226_v49 }
 0x2db   : > { %2799 = vmatprep.subr.mxu1 %v4226_v49 }
 0x2dd   : > { %v1705_v36 = vpop.permute.xlu1 %1704  ;;  %2748 = vmatmul.mubr.msk.f32.gmra.mxu1 %vm566_vm2, %v931_v23  ;;  %v1315_v40 = vpop.permute.xlu0 %1314 }
 0x2de   : > { %2800 = vmatpush3.xpose.msk.msra.mxu1 %vm566_vm2, %v1323_v24  ;;  %2750 = vmatprep.mubr.msk.f32.mxu1 %vm3134_vm1, %v4226_v49 }
 0x2df   : > { %2801 = vmatprep.subr.mxu1 %v4226_v49 }
 0x2e1   : > { %v1703_v39 = vpop.permute.xlu1 %1702  ;;  %2751 = vmatmul.mubr.msk.f32.gmra.mxu1 %vm566_vm2, %v933_v25  ;;  %v1317_v41 = vpop.permute.xlu0 %1316 }
 0x2e2   : > { %2802 = vmatpush3.xpose.msk.msra.mxu1 %vm566_vm2, %v1321_v28  ;;  %2753 = vmatprep.mubr.msk.f32.mxu1 %vm3134_vm1, %v4226_v49 }
 0x2e3   : > { %2803 = vmatprep.subr.mxu1 %v4226_v49 }
 0x2e5   : > { %v1701_v37 = vpop.permute.xlu1 %1700  ;;  %2754 = vmatmul.mubr.msk.f32.gmra.mxu1 %vm566_vm2, %v935_v29  ;;  %v1687_v44 = vpop.permute.xlu0 %1686 }
 0x2e6   : > { %2804 = vmatpush3.xpose.msk.msra.mxu1 %vm566_vm2, %v1319_v26  ;;  %2805 = vmatprep.mubr.msk.f32.mxu1 %vm3134_vm1, %v4226_v49 }
 0x2e7   : > { %2861 = vmatprep.subr.mxu1 %v4226_v49 }
 0x2e9   : > { %v1689_v42 = vpop.permute.xlu1 %1688  ;;  %2806 = vmatmul.mubr.msk.f32.vlgmr.msra.gmra.mxu1 %vm566_vm2, %v1305_v30  ;;  %v1691_v46 = vpop.permute.xlu0 %1690 }
 0x2ea   : > { %2862 = vmatpush3.xpose.msk.msra.mxu1 %vm566_vm2, %v1713_v19  ;;  %2808 = vmatprep.mubr.msk.f32.mxu1 %vm3134_vm1, %v4226_v49 }
 0x2eb   : > { %2863 = vmatprep.subr.mxu1 %v4226_v49 }
 0x2ed   : > { %v1693_v43 = vpop.permute.xlu1 %1692  ;;  %2809 = vmatmul.mubr.msk.f32.gmra.mxu1 %vm566_vm2, %v1307_v31  ;;  %v1695_v50 = vpop.permute.xlu0 %1694 }
 0x2ee   : > { %2864 = vmatpush3.xpose.msk.msra.mxu1 %vm566_vm2, %v1711_v32  ;;  %2811 = vmatprep.mubr.msk.f32.mxu1 %vm3134_vm1, %v4226_v49 }
 0x2ef   : > { %2865 = vmatprep.subr.mxu1 %v4226_v49 }
 0x2f1   : > { %v1697_v45 = vpop.permute.xlu1 %1696  ;;  %2812 = vmatmul.mubr.msk.f32.gmra.mxu1 %vm566_vm2, %v1309_v33  ;;  %v1699_v52 = vpop.permute.xlu0 %1698 }
 0x2f2   : > { %2866 = vmatpush3.xpose.msk.msra.mxu1 %vm566_vm2, %v1709_v27  ;;  %2814 = vmatprep.mubr.msk.f32.mxu1 %vm3134_vm1, %v4226_v49 }
 0x2f3   : > { %2867 = vmatprep.subr.mxu1 %v4226_v49 }
 0x2f5   : > { %v789_v47 = vpop.permute.xlu1 %788  ;;  %2815 = vmatmul.mubr.msk.f32.gmra.mxu1 %vm566_vm2, %v1311_v34  ;;  %v791_v55 = vpop.permute.xlu0 %790 }
 0x2f6   : > { %2868 = vmatpush3.xpose.msk.msra.mxu1 %vm566_vm2, %v1707_v35  ;;  %2817 = vmatprep.mubr.msk.f32.mxu1 %vm3134_vm1, %v4226_v49 }
 0x2f7   : > { %2869 = vmatprep.subr.mxu1 %v4226_v49 }
 0x2f9   : > { %v787_v48 = vpop.permute.xlu1 %786  ;;  %2818 = vmatmul.mubr.msk.f32.gmra.mxu1 %vm566_vm2, %v1313_v38  ;;  %v785_v59 = vpop.permute.xlu0 %784 }
 0x2fa   : > { %2870 = vmatpush3.xpose.msk.msra.mxu1 %vm566_vm2, %v1705_v36  ;;  %2820 = vmatprep.mubr.msk.f32.mxu1 %vm3134_vm1, %v4226_v49 }
 0x2fb   : > { %2871 = vmatprep.subr.mxu1 %v4226_v49 }
 0x2fd   : > { %v3524_v51 = vpop.permute.xlu1 %1170  ;;  %2821 = vmatmul.mubr.msk.f32.gmra.mxu1 %vm566_vm2, %v1315_v40  ;;  %v783_v1 = vpop.permute.xlu0 %782 }
 0x2fe   : > { %2872 = vmatpush3.xpose.msk.msra.mxu1 %vm566_vm2, %v1703_v39  ;;  %2823 = vmatprep.mubr.msk.f32.mxu1 %vm3134_vm1, %v4226_v49 }
 0x2ff   : > { %2873 = vmatprep.subr.mxu1 %v4226_v49 }
 0x301   : > { %v3531_v53 = vpop.permute.xlu1 %1164  ;;  %2824 = vmatmul.mubr.msk.f32.gmra.mxu1 %vm566_vm2, %v1317_v41  ;;  %v781_v2 = vpop.permute.xlu0 %780 }
 0x302   : > { %2874 = vmatpush3.xpose.msk.msra.mxu1 %vm566_vm2, %v1701_v37  ;;  %2875 = vmatprep.mubr.msk.f32.mxu1 %vm3134_vm1, %v4226_v49 }
 0x303   : > { %2960 = vmatprep.subr.mxu1 %v4226_v49 }
 0x305   : > { %v3538_v54 = vpop.permute.xlu1 %1552  ;;  %2876 = vmatmul.mubr.msk.f32.vlgmr.msra.gmra.mxu1 %vm566_vm2, %v1687_v44 }
 0x306   : > { %2878 = vmatprep.mubr.msk.f32.mxu1 %vm3134_vm1, %v4226_v49 }
 0x309   : > { %v3543_v56 = vpop.permute.xlu1 %1546  ;;  %2879 = vmatmul.mubr.msk.f32.gmra.mxu1 %vm566_vm2, %v1689_v42 }
 0x30a   : > { %2881 = vmatprep.mubr.msk.f32.mxu1 %vm3134_vm1, %v4226_v49 }
 0x30d   : > { %v793_v0 = vpop.permute.xlu1 %792  ;;  %2882 = vmatmul.mubr.msk.f32.gmra.mxu1 %vm566_vm2, %v1691_v46 }
 0x30e   : > { %2687 = vmatpush3.msra.mxu0 %v793_v0  ;;  %2884 = vmatprep.mubr.msk.f32.mxu1 %vm3134_vm1, %v4226_v49 }
 0x30f   : > { %2688 = vmatprep.subr.mxu0 %v4226_v49 }
 0x310   : > { %2689 = vmatpush3.msra.mxu0 %v791_v55 }
 0x311   : > { %2690 = vmatprep.subr.mxu0 %v4226_v49  ;;  %2885 = vmatmul.mubr.msk.f32.gmra.mxu1 %vm566_vm2, %v1693_v43 }
 0x312   : > { %2691 = vmatpush3.msra.mxu0 %v789_v47  ;;  %2887 = vmatprep.mubr.msk.f32.mxu1 %vm3134_vm1, %v4226_v49 }
 0x313   : > { %2692 = vmatprep.subr.mxu0 %v4226_v49 }
 0x314   : > { %2693 = vmatpush3.msra.mxu0 %v787_v48 }
 0x315   : > { %2694 = vmatprep.subr.mxu0 %v4226_v49  ;;  %2888 = vmatmul.mubr.msk.f32.gmra.mxu1 %vm566_vm2, %v1695_v50 }
 0x316   : > { %2695 = vmatpush3.msra.mxu0 %v785_v59  ;;  %2890 = vmatprep.mubr.msk.f32.mxu1 %vm3134_vm1, %v4226_v49 }
 0x317   : > { %2696 = vmatprep.subr.mxu0 %v4226_v49 }
 0x318   : > { %2697 = vmatpush3.msra.mxu0 %v783_v1 }
 0x319   : > { %2698 = vmatprep.subr.mxu0 %v4226_v49  ;;  %2891 = vmatmul.mubr.msk.f32.gmra.mxu1 %vm566_vm2, %v1697_v45 }
 0x31a   : > { %2699 = vmatpush3.msra.mxu0 %v781_v2  ;;  %2893 = vmatprep.mubr.msk.f32.mxu1 %vm3134_vm1, %v4226_v49 }
 0x31b   : > { %2756 = vmatprep.subr.mxu0 %v4226_v49 }
 0x31d   : > { %2894 = vmatmul.mubr.msk.f32.gmra.mxu1 %vm566_vm2, %v1699_v52 }
 0x31e   : > { %2945 = vmatprep.mubr.msk.f32.mxu1 %vm3134_vm1, %v4226_v49 }
 0x371   : > { %v661_v5 = vpop.f32.mrf.mxu1 }
 0x372   : > { %v3575_v6 = vsel %vm544_vm3, %v661_v5, -1e+30 }
 0x373   : > { %v2667_v7 = vpop.f32.mrf.mxu1  ;;  %v703_v8 = vsel %vm702_vm4, %v3575_v6, -inf }
 0x374   : > { %704 = vmax.xlane.f32.xlu1 %v703_v8 }
 0x375   : > { %v666_v9 = vpop.f32.mrf.mxu1 }
 0x376   : > { %v3581_v10 = vsel %vm544_vm3, %v666_v9, -1e+30 }
 0x377   : > { %v2670_v11 = vpop.f32.mrf.mxu1  ;;  %v706_v12 = vsel %vm702_vm4, %v3581_v10, -inf }
 0x378   : > { %707 = vmax.xlane.f32.xlu0 %v706_v12 }
 0x379   : > { %v671_v13 = vpop.f32.mrf.mxu1 }
 0x37a   : > { %v3587_v14 = vsel %vm544_vm3, %v671_v13, -1e+30 }
 0x37b   : > { %v2673_v15 = vpop.f32.mrf.mxu1  ;;  %v709_v16 = vsel %vm702_vm4, %v3587_v14, -inf }
 0x37c   : > { %710 = vmax.xlane.f32.xlu0 %v709_v16 }
 0x37d   : > { %v676_v17 = vpop.f32.mrf.mxu1 }
 0x37e   : > { %v3593_v20 = vsel %vm544_vm3, %v676_v17, -1e+30 }
 0x37f   : > { %v2676_v21 = vpop.f32.mrf.mxu1  ;;  %v712_v22 = vsel %vm702_vm4, %v3593_v20, -inf }
 0x380   : > { %713 = vmax.xlane.f32.xlu0 %v712_v22 }
 0x381   : > { %v681_v18 = vpop.f32.mrf.mxu1 }
 0x382   : > { %v3625_v46 = vsel %vm544_vm3, %v681_v18, -1e+30 }
 0x383   : > { %v2679_v23 = vpop.f32.mrf.mxu1  ;;  %v715_v55 = vsel %vm702_vm4, %v3625_v46, -inf }
 0x385   : > { %1938 = vrot.lane.b32.xlu1 %v3320_v58, %s3145_s13  ;;  %v686_v24 = vpop.f32.mrf.mxu1 }
 0x386   : > { %v3601_v25 = vsel %vm544_vm3, %v686_v24, -1e+30 }
 0x387   : > { %v2682_v28 = vpop.f32.mrf.mxu1  ;;  %v718_v29 = vsel %vm702_vm4, %v3601_v25, -inf }
 0x388   : > { %719 = vmax.xlane.f32.xlu0 %v718_v29 }
 0x389   : > { %v691_v26 = vpop.f32.mrf.mxu1 }
 0x38a   : > { %v3637_v59 = vsel %vm544_vm3, %v691_v26, -1e+30 }
 0x38b   : > { %v2685_v30 = vpop.f32.mrf.mxu1  ;;  %v721_v2 = vsel %vm702_vm4, %v3637_v59, -inf }
 0x38d   : > { %v1044_v19 = vpop.f32.mrf.mxu1 }
 0x38e   : > { %v3607_v31 = vsel %vm544_vm3, %v1044_v19, -1e+30 }
 0x38f   : > { %v2737_v32 = vpop.f32.mrf.mxu1  ;;  %v1085_v58 = vsel %vm702_vm4, %v3607_v31, -inf }
 0x390   : > { %1086 = vmax.xlane.f32.xlu0 %v1085_v58 }
 0x391   : > { %v1049_v33 = vpop.f32.mrf.mxu1 }
 0x392   : > { %v3643_v3 = vsel %vm544_vm3, %v1049_v33, -1e+30 }
 0x393   : > { %v2740_v27 = vpop.f32.mrf.mxu1  ;;  %v1088_v11 = vsel %vm702_vm4, %v3643_v3, -inf }
 0x395   : > { %v1054_v34 = vpop.f32.mrf.mxu1 }
 0x396   : > { %v3613_v35 = vsel %vm544_vm3, %v1054_v34, -1e+30 }
 0x397   : > { %v1091_v38 = vsel %vm702_vm4, %v3613_v35, -inf  ;;  %v2743_v36 = vpop.f32.mrf.mxu1 }
 0x398   : > { %1092 = vmax.xlane.f32.xlu0 %v1091_v38 }
 0x399   : > { %v1059_v39 = vpop.f32.mrf.mxu1 }
 0x39a   : > { %v3655_v12 = vsel %vm544_vm3, %v1059_v39, -1e+30 }
 0x39b   : > { %v2746_v40 = vpop.f32.mrf.mxu1  ;;  %v1094_v16 = vsel %vm702_vm4, %v3655_v12, -inf }
 0x39d   : > { %v1064_v37 = vpop.f32.mrf.mxu1 }
 0x39e   : > { %v3619_v41 = vsel %vm544_vm3, %v1064_v37, -1e+30 }
 0x39f   : > { %v1097_v42 = vsel %vm702_vm4, %v3619_v41, -inf  ;;  %v2749_v43 = vpop.f32.mrf.mxu1 }
 0x3a0   : > { %1098 = vmax.xlane.f32.xlu0 %v1097_v42 }
 0x3a1   : > { %v1069_v44 = vpop.f32.mrf.mxu1 }
 0x3a2   : > { %v3661_v17 = vsel %vm544_vm3, %v1069_v44, -1e+30 }
 0x3a3   : > { %v2752_v45 = vpop.f32.mrf.mxu1  ;;  %v1100_v24 = vsel %vm702_vm4, %v3661_v17, -inf }
 0x3a5   : > { %v1074_v47 = vpop.f32.mrf.mxu1 }
 0x3a6   : > { %v3629_v48 = vsel %vm544_vm3, %v1074_v47, -1e+30 }
 0x3a7   : > { %v1103_v50 = vsel %vm702_vm4, %v3629_v48, -inf  ;;  %v2755_v52 = vpop.f32.mrf.mxu1 }
 0x3a8   : > { %1104 = vmax.xlane.f32.xlu0 %v1103_v50 }
 0x3a9   : > { %716 = vmax.xlane.f32.xlu1 %v715_v55  ;;  %v1426_v0 = vpop.f32.mrf.mxu1 }
 0x3aa   : > { %v3673_v28 = vsel %vm544_vm3, %v1426_v0, -1e+30 }
 0x3ab   : > { %v2807_v1 = vpop.f32.mrf.mxu1  ;;  %v1467_v30 = vsel %vm702_vm4, %v3673_v28, -inf }
 0x3ac   : > { %v3713_v1 = vpop.permute.xlu0 %1172 }
 0x3ad   : > { %722 = vmax.xlane.f32.xlu1 %v721_v2  ;;  %v1431_v5 = vpop.f32.mrf.mxu1 }
 0x3ae   : > { %v3647_v7 = vsel %vm544_vm3, %v1431_v5, -1e+30 }
 0x3af   : > { %v1470_v8 = vsel %vm702_vm4, %v3647_v7, -inf  ;;  %v2810_v9 = vpop.f32.mrf.mxu1 }
 0x3b0   : > { %1471 = vmax.xlane.f32.xlu0 %v1470_v8 }
 0x3b1   : > { %1089 = vmax.xlane.f32.xlu1 %v1088_v11  ;;  %v1436_v13 = vpop.f32.mrf.mxu1 }
 0x3b2   : > { %v3679_v19 = vsel %vm544_vm3, %v1436_v13, -1e+30 }
 0x3b3   : > { %v2813_v15 = vpop.f32.mrf.mxu1  ;;  %v1473_v34 = vsel %vm702_vm4, %v3679_v19, -inf }
 0x3b4   : > { %v3725_v15 = vpop.permute.xlu0 %1168 }
 0x3b5   : > { %1095 = vmax.xlane.f32.xlu1 %v1094_v16  ;;  %v1441_v21 = vpop.f32.mrf.mxu1 }
 0x3b6   : > { %v3665_v22 = vsel %vm544_vm3, %v1441_v21, -1e+30 }
 0x3b7   : > { %v1476_v18 = vsel %vm702_vm4, %v3665_v22, -inf  ;;  %v2816_v23 = vpop.f32.mrf.mxu1 }
 0x3b8   : > { %1477 = vmax.xlane.f32.xlu0 %v1476_v18 }
 0x3b9   : > { %1101 = vmax.xlane.f32.xlu1 %v1100_v24  ;;  %v1446_v29 = vpop.f32.mrf.mxu1 }
 0x3ba   : > { %v3691_v38 = vsel %vm544_vm3, %v1446_v29, -1e+30 }
 0x3bb   : > { %v2819_v26 = vpop.f32.mrf.mxu1  ;;  %v1479_v40 = vsel %vm702_vm4, %v3691_v38, -inf }
 0x3bc   : > { %v3735_v26 = vpop.permute.xlu0 %1166 }
 0x3bd   : > { %1468 = vmax.xlane.f32.xlu1 %v1467_v30  ;;  %v1451_v32 = vpop.f32.mrf.mxu1 }
 0x3be   : > { %v3683_v58 = vsel %vm544_vm3, %v1451_v32, -1e+30 }
 0x3bf   : > { %v1482_v33 = vsel %vm702_vm4, %v3683_v58, -inf  ;;  %v2822_v27 = vpop.f32.mrf.mxu1 }
 0x3c0   : > { %1483 = vmax.xlane.f32.xlu0 %v1482_v33 }
 0x3c1   : > { %1474 = vmax.xlane.f32.xlu1 %v1473_v34  ;;  %v1456_v36 = vpop.f32.mrf.mxu1 }
 0x3c2   : > { %v3697_v37 = vsel %vm544_vm3, %v1456_v36, -1e+30 }
 0x3c3   : > { %v2825_v39 = vpop.f32.mrf.mxu1  ;;  %v1485_v47 = vsel %vm702_vm4, %v3697_v37, -inf }
 0x3c4   : > { %v3747_v39 = vpop.permute.xlu0 %1162 }
 0x3c5   : > { %1480 = vmax.xlane.f32.xlu1 %v1479_v40  ;;  %v1808_v42 = vpop.f32.mrf.mxu1 }
 0x3c6   : > { %v3701_v43 = vsel %vm544_vm3, %v1808_v42, -1e+30 }
 0x3c7   : > { %v1849_v44 = vsel %vm702_vm4, %v3701_v43, -inf  ;;  %v2877_v45 = vpop.f32.mrf.mxu1 }
 0x3c8   : > { %1850 = vmax.xlane.f32.xlu0 %v1849_v44  ;;  %v3751_v44 = vpop.permute.xlu0 %1554 }
 0x3c9   : > { %1486 = vmax.xlane.f32.xlu1 %v1485_v47  ;;  %v1813_v50 = vpop.f32.mrf.mxu1 }
 0x3ca   : > { %v3709_v52 = vsel %vm544_vm3, %v1813_v50, -1e+30  ;;  %v3757_v50 = vpop.permute.xlu1 %1174 }
 0x3cb   : > { %v1852_v55 = vsel %vm702_vm4, %v3709_v52, -inf  ;;  %v2880_v0 = vpop.f32.mrf.mxu1 }
 0x3cc   : > { %v3753_v45 = vpop.permute.xlu0 %1550 }
 0x3cd   : > { %1853 = vmax.xlane.f32.xlu1 %v1852_v55  ;;  %v1818_v2 = vpop.f32.mrf.mxu1 }
 0x3ce   : > { %v3717_v5 = vsel %vm544_vm3, %v1818_v2, -1e+30  ;;  %v3761_v4 = vpop.permute.xlu1 %1556 }
 0x3cf   : > { %v1855_v8 = vsel %vm702_vm4, %v3717_v5, -inf  ;;  %v2883_v9 = vpop.f32.mrf.mxu1 }
 0x3d0   : > { %v3755_v47 = vpop.permute.xlu0 %1548 }
 0x3d1   : > { %1856 = vmax.xlane.f32.xlu1 %v1855_v8  ;;  %v1823_v11 = vpop.f32.mrf.mxu1 }
 0x3d2   : > { %v3723_v13 = vsel %vm544_vm3, %v1823_v11, -1e+30 }
 0x3d3   : > { %v1858_v16 = vsel %vm702_vm4, %v3723_v13, -inf  ;;  %v2886_v21 = vpop.f32.mrf.mxu1 }
 0x3d4   : > { %v3759_v55 = vpop.permute.xlu0 %1544 }
 0x3d5   : > { %1859 = vmax.xlane.f32.xlu1 %v1858_v16  ;;  %v1828_v18 = vpop.f32.mrf.mxu1 }
 0x3d6   : > { %v3731_v23 = vsel %vm544_vm3, %v1828_v18, -1e+30 }
 0x3d7   : > { %v1861_v24 = vsel %vm702_vm4, %v3731_v23, -inf  ;;  %v2889_v29 = vpop.f32.mrf.mxu1 }
 0x3d8   : > { %v3763_v0 = vpop.permute.xlu0 %1936 }
 0x3d9   : > { %1862 = vmax.xlane.f32.xlu1 %v1861_v24  ;;  %v1833_v30 = vpop.f32.mrf.mxu1  ;;  %4228 = vst [vmem:[#allocation2_spill] sm:$0xff] %v3763_v0 }
 0x3da   : > { %v3739_v32 = vsel %vm544_vm3, %v1833_v30, -1e+30 }
 0x3db   : > { %v1864_v33 = vsel %vm702_vm4, %v3739_v32, -inf  ;;  %v2892_v27 = vpop.f32.mrf.mxu1 }
 0x3dc   : > { %1865 = vmax.xlane.f32.xlu0 %v1864_v33 }
 0x3dd   : > { %v1838_v34 = vpop.f32.mrf.mxu1 }
 0x3de   : > { %v3745_v36 = vsel %vm544_vm3, %v1838_v34, -1e+30 }
 0x3df   : > { %v1867_v40 = vsel %vm702_vm4, %v3745_v36, -inf  ;;  %v2895_v42 = vpop.f32.mrf.mxu1 }
 0x3e0   : > { %1868 = vmax.xlane.f32.xlu1 %v1867_v40 }
 0x3fd   : > { %v705_v2 = vpop.xlane.xlu1 %704 }
 0x3fe   : > { %v724_v8 = vsub.f32 %v3575_v6, %v705_v2 }
 0x400   : > { %v731_v9 = vmul.f32 1.442695, %v724_v8 }
 0x401   : > { %v708_v11 = vpop.xlane.xlu0 %707  ;;  %v3785_v8 = vpop.permute.xlu1 %1938 }
 0x402   : > { %3006 = vpow2.f32 %v731_v9  ;;  %v725_v16 = vsub.f32 %v3581_v10, %v708_v11 }
 0x404   : > { %v733_v21 = vmul.f32 1.442695, %v725_v16 }
 0x405   : > { %v711_v18 = vpop.xlane.xlu0 %710 }
 0x406   : > { %3008 = vpow2.f32 %v733_v21  ;;  %v726_v24 = vsub.f32 %v3587_v14, %v711_v18 }
 0x408   : > { %v735_v29 = vmul.f32 1.442695, %v726_v24 }
 0x409   : > { %v714_v30 = vpop.xlane.xlu0 %713 }
 0x40a   : > { %3010 = vpow2.f32 %v735_v29  ;;  %v727_v33 = vsub.f32 %v3593_v20, %v714_v30 }
 0x40c   : > { %v737_v27 = vmul.f32 1.442695, %v727_v33 }
 0x40e   : > { %3012 = vpow2.f32 %v737_v27 }
 0x40f   : > { %v3769_v34 = vpop.eup %3006 }
 0x410   : > { %v745_v6 = vsel %vm702_vm4, %v3769_v34, 0.0 }
 0x411   : > { %746 = vadd.xlane.f32.xlu0 %v745_v6  ;;  %v720_v9 = vpop.xlane.xlu0 %719 }
 0x412   : > { %v729_v11 = vsub.f32 %v3601_v25, %v720_v9 }
 0x413   : > { %v3773_v40 = vpop.eup %3008 }
 0x414   : > { %v748_v10 = vsel %vm702_vm4, %v3773_v40, 0.0  ;;  %v741_v18 = vmul.f32 1.442695, %v729_v11 }
 0x415   : > { %749 = vadd.xlane.f32.xlu0 %v748_v10 }
 0x417   : > { %v3777_v14 = vpop.eup %3010 }
 0x418   : > { %v751_v42 = vsel %vm702_vm4, %v3777_v14, 0.0 }
 0x419   : > { %752 = vadd.xlane.f32.xlu0 %v751_v42  ;;  %v1087_v9 = vpop.xlane.xlu0 %1086 }
 0x41b   : > { %v3781_v20 = vpop.eup %3012 }
 0x41c   : > { %v754_v2 = vsel %vm702_vm4, %v3781_v20, 0.0 }
 0x41d   : > { %755 = vadd.xlane.f32.xlu0 %v754_v2 }
 0x432   : > { %v717_v16 = vpop.xlane.xlu1 %716 }
 0x433   : > { %v728_v21 = vsub.f32 %v3625_v46, %v717_v16  ;;  %v1093_v16 = vpop.xlane.xlu0 %1092 }
 0x435   : > { %v739_v24 = vmul.f32 1.442695, %v728_v21  ;;  %v1106_v21 = vsub.f32 %v3607_v31, %v1087_v9 }
 0x436   : > { %v723_v29 = vpop.xlane.xlu1 %722 }
 0x437   : > { %3014 = vpow2.f32 %v739_v24  ;;  %v730_v30 = vsub.f32 %v3637_v59, %v723_v29 }
 0x438   : > { %3016 = vpow2.f32 %v741_v18  ;;  %v1099_v18 = vpop.xlane.xlu0 %1098 }
 0x439   : > { %v743_v33 = vmul.f32 1.442695, %v730_v30  ;;  %v1113_v30 = vmul.f32 1.442695, %v1106_v21 }
 0x43a   : > { %v1090_v59 = vpop.xlane.xlu1 %1089 }
 0x43b   : > { %3018 = vpow2.f32 %v743_v33  ;;  %v1107_v24 = vsub.f32 %v3643_v3, %v1090_v59  ;;  %v1108_v33 = vsub.f32 %v3613_v35, %v1093_v16 }
 0x43c   : > { %3020 = vpow2.f32 %v1113_v30 }
 0x43e   : > { %v1096_v2 = vpop.xlane.xlu1 %1095 }
 0x43f   : > { %v1109_v31 = vsub.f32 %v3655_v12, %v1096_v2 }
 0x441   : > { %v1119_v3 = vmul.f32 1.442695, %v1109_v31 }
 0x442   : > { %v1102_v11 = vpop.xlane.xlu1 %1101 }
 0x443   : > { %v1111_v59 = vsub.f32 %v3661_v17, %v1102_v11 }
 0x444   : > { %v3790_v27 = vpop.eup %3014 }
 0x445   : > { %v757_v6 = vsel %vm702_vm4, %v3790_v27, 0.0  ;;  %v3794_v10 = vpop.eup %3016 }
 0x446   : > { %758 = vadd.xlane.f32.xlu0 %v757_v6  ;;  %v760_v42 = vsel %vm702_vm4, %v3794_v10, 0.0  ;;  %v1469_v29 = vpop.xlane.xlu1 %1468  ;;  %v1110_v6 = vsub.f32 %v3619_v41, %v1099_v18  ;;  %v1123_v41 = vmul.f32 1.442695, %v1111_v59 }
 0x447   : > { %v1488_v16 = vsub.f32 %v3673_v28, %v1469_v29 }
 0x448   : > { %v3796_v25 = vpop.eup %3018  ;;  %v1121_v0 = vmul.f32 1.442695, %v1110_v6 }
 0x449   : > { %v763_v46 = vsel %vm702_vm4, %v3796_v25, 0.0  ;;  %v3820_v18 = vpop.eup %3020  ;;  %v1495_v12 = vmul.f32 1.442695, %v1488_v16 }
 0x44a   : > { %764 = vadd.xlane.f32.xlu1 %v763_v46  ;;  %761 = vadd.xlane.f32.xlu0 %v760_v42  ;;  %v1105_v46 = vpop.xlane.xlu0 %1104  ;;  %v1115_v42 = vmul.f32 1.442695, %v1107_v24  ;;  %v1127_v2 = vsel %vm702_vm4, %v3820_v18, 0.0 }
 0x44b   : > { %v1112_v49 = vsub.f32 %v3629_v48, %v1105_v46 }
 0x44c   : > { %3022 = vpow2.f32 %v1115_v42 }
 0x44d   : > { %v1125_v9 = vmul.f32 1.442695, %v1112_v49 }
 0x44e   : > { %v3816_v21 = vpop.xlane.xlu0 %1471 }
 0x452   : > { %v1478_v17 = vpop.xlane.xlu0 %1477 }
 0x453   : > { %v1491_v28 = vsub.f32 %v3665_v22, %v1478_v17 }
 0x455   : > { %v1501_v42 = vmul.f32 1.442695, %v1491_v28 }
 0x45b   : > { %1934 = vrot.lane.b32.xlu1 %v3318_v57, %s3145_s13  ;;  %v1117_v57 = vmul.f32 1.442695, %v1108_v33  ;;  %v1484_v33 = vpop.xlane.xlu0 %1483 }
 0x45c   : > { %v1493_v22 = vsub.f32 %v3683_v58, %v1484_v33 }
 0x45d   : > { %3024 = vpow2.f32 %v1117_v57 }
 0x45e   : > { %3026 = vpow2.f32 %v1121_v0  ;;  %v3823_v0 = vpop.eup %3022  ;;  %v1505_v59 = vmul.f32 1.442695, %v1493_v22 }
 0x45f   : > { %3028 = vpow2.f32 %v1125_v9  ;;  %v1130_v29 = vsel %vm702_vm4, %v3823_v0, 0.0  ;;  %v1851_v31 = vpop.xlane.xlu0 %1850 }
 0x460   : > { %1932 = vrot.lane.b32.xlu0 %v3326_v61, %s3145_s13  ;;  %v1475_v61 = vpop.xlane.xlu1 %1474  ;;  %3030 = vpow2.f32 %v1119_v3 }
 0x461   : > { %3032 = vpow2.f32 %v1123_v41  ;;  %v1490_v49 = vsub.f32 %v3679_v19, %v1475_v61  ;;  %v1870_v41 = vsub.f32 %v3701_v43, %v1851_v31 }
 0x462   : > { %3034 = vpow2.f32 %v1495_v12 }
 0x463   : > { %v1499_v24 = vmul.f32 1.442695, %v1490_v49  ;;  %v1877_v12 = vmul.f32 1.442695, %v1870_v41 }
 0x464   : > { %v3813_v35 = vpop.xlane.xlu1 %1480 }
 0x465   : > { %3036 = vpow2.f32 %v1499_v24 }
 0x466   : > { %3038 = vpow2.f32 %v1501_v42 }
 0x467   : > { %3040 = vpow2.f32 %v1505_v59 }
 0x468   : > { %v3818_v48 = vpop.xlane.xlu1 %1486  ;;  %3042 = vpow2.f32 %v1877_v12 }
 0x46a   : > { %v3827_v11 = vpop.eup %3024 }
 0x46b   : > { %v3832_v30 = vpop.eup %3026  ;;  %v1133_v19 = vsel %vm702_vm4, %v3827_v11, 0.0 }
 0x46c   : > { %v3834_v6 = vpop.xlane.xlu1 %1853  ;;  %v3838_v46 = vpop.eup %3028  ;;  %v1139_v57 = vsel %vm702_vm4, %v3832_v30, 0.0 }
 0x46d   : > { %v3843_v61 = vpop.eup %3030  ;;  %v1145_v3 = vsel %vm702_vm4, %v3838_v46, 0.0 }
 0x46e   : > { %v1136_v58 = vsel %vm702_vm4, %v3843_v61, 0.0  ;;  %v3850_v16 = vpop.eup %3032 }
 0x46f   : > { %v1142_v17 = vsel %vm702_vm4, %v3850_v16, 0.0 }
 0x470   : > { %v1857_v9 = vpop.xlane.xlu1 %1856 }
 0x471   : > { %v1872_v49 = vsub.f32 %v3717_v5, %v1857_v9 }
 0x473   : > { %v1881_v43 = vmul.f32 1.442695, %v1872_v49 }
 0x474   : > { %v1860_v28 = vpop.xlane.xlu1 %1859 }
 0x475   : > { %v1873_v24 = vsub.f32 %v3723_v13, %v1860_v28  ;;  %3044 = vpow2.f32 %v1881_v43  ;;  %v1489_v43 = vsub.f32 %v3647_v7, %v3816_v21 }
 0x477   : > { %v1883_v5 = vmul.f32 1.442695, %v1873_v24 }
 0x479   : > { %3046 = vpow2.f32 %v1883_v5  ;;  %v1492_v5 = vsub.f32 %v3691_v38, %v3813_v35  ;;  %v4229_v38 = vmov 0.0  }
 0x47b   : > { %v1503_v21 = vmul.f32 1.442695, %v1492_v5 }
 0x47f   : > { %1131 = vadd.xlane.f32.xlu1 %v1130_v29  ;;  %1128 = vadd.xlane.f32.xlu0 %v1127_v2  ;;  %v3855_v2 = vpop.eup %3034 }
 0x480   : > { %v1509_v29 = vsel %vm702_vm4, %v3855_v2, 0.0  ;;  %v3860_v33 = vpop.eup %3036 }
 0x481   : > { %v1515_v22 = vsel %vm702_vm4, %v3860_v33, 0.0 }
 0x483   : > { %1134 = vadd.xlane.f32.xlu1 %v1133_v19  ;;  %1140 = vadd.xlane.f32.xlu0 %v1139_v57  ;;  %v1866_v19 = vpop.xlane.xlu0 %1865  ;;  %v3865_v57 = vpop.eup %3038 }
 0x484   : > { %v1875_v42 = vsub.f32 %v3739_v32, %v1866_v19  ;;  %v1518_v13 = vsel %vm702_vm4, %v3865_v57, 0.0  ;;  %v3869_v9 = vpop.eup %3040  ;;  %v1497_v19 = vmul.f32 1.442695, %v1489_v43 }
 0x485   : > { %v1524_v59 = vsel %vm702_vm4, %v3869_v9, 0.0  ;;  %v3873_v32 = vpop.eup %3042 }
 0x486   : > { %v1887_v31 = vmul.f32 1.442695, %v1875_v42  ;;  %v3879_v12 = vpop.eup %3044 }
 0x487   : > { %1137 = vadd.xlane.f32.xlu1 %v1136_v58  ;;  %1146 = vadd.xlane.f32.xlu0 %v1145_v3  ;;  %v1891_v58 = vsel %vm702_vm4, %v3873_v32, 0.0  ;;  %v3883_v28 = vpop.eup %3046 }
 0x488   : > { %3048 = vpow2.f32 %v1887_v31  ;;  %v1900_v24 = vsel %vm702_vm4, %v3883_v28, 0.0  ;;  %v1494_v31 = vsub.f32 %v3697_v37, %v3818_v48  ;;  %v1871_v37 = vsub.f32 %v3709_v52, %v3834_v6 }
 0x48a   : > { %v1507_v35 = vmul.f32 1.442695, %v1494_v31 }
 0x48b   : > { %1143 = vadd.xlane.f32.xlu1 %v1142_v17  ;;  %v1897_v17 = vsel %vm702_vm4, %v3879_v12, 0.0 }
 0x48f   : > { %1510 = vadd.xlane.f32.xlu1 %v1509_v29 }
 0x493   : > { %1516 = vadd.xlane.f32.xlu1 %v1515_v22 }
 0x495   : > { %v3889_v29 = vpop.eup %3048 }
 0x496   : > { %v1906_v7 = vsel %vm702_vm4, %v3889_v29, 0.0 }
 0x497   : > { %1519 = vadd.xlane.f32.xlu1 %v1518_v13 }
 0x49a   : > { %v747_v3 = vpop.xlane.xlu0 %746 }
 0x49b   : > { %3050 = vrcp.f32 %v747_v3  ;;  %1525 = vadd.xlane.f32.xlu1 %v1524_v59 }
 0x49d   : > { %1930 = vrot.lane.b32.xlu0 %v3324_v60, %s3145_s13 }
 0x49e   : > { %v750_v41 = vpop.xlane.xlu0 %749 }
 0x49f   : > { %3052 = vrcp.f32 %v750_v41  ;;  %1892 = vadd.xlane.f32.xlu1 %v1891_v58 }
 0x4a2   : > { %v753_v49 = vpop.xlane.xlu0 %752 }
 0x4a3   : > { %3054 = vrcp.f32 %v753_v49  ;;  %1898 = vadd.xlane.f32.xlu1 %v1897_v17 }
 0x4a6   : > { %v756_v60 = vpop.xlane.xlu0 %755 }
 0x4a7   : > { %3056 = vrcp.f32 %v756_v60  ;;  %1901 = vadd.xlane.f32.xlu1 %v1900_v24 }
 0x4a8   : > { %v3051_v42 = vpop.eup %3050  ;;  %3058 = vpow2.f32 %v1497_v19 }
 0x4a9   : > { %v773_v22 = vmul.f32 %v3051_v42, %v3769_v34  ;;  %3060 = vpow2.f32 %v1503_v21 }
 0x4aa   : > { %3062 = vpow2.f32 %v1507_v35 }
 0x4ab   : > { %1907 = vadd.xlane.f32.xlu1 %v1906_v7  ;;  %2701 = vmatmul.mubr.msk.f32.vlgmr.msra.gmra.mxu0 %vm702_vm4, %v773_v22 }
 0x4ac   : > { %v3053_v13 = vpop.eup %3052  ;;  %2757 = vmatpush3.msra.mxu0 %v3757_v50  ;;  %2703 = vmatprep.mubr.msk.f32.mxu0 %vm3134_vm1, %v4229_v38  ;;  %v1863_v50 = vpop.xlane.xlu1 %1862 }
 0x4ad   : > { %2758 = vmatprep.subr.mxu0 %v4229_v38  ;;  %v774_v34 = vmul.f32 %v3053_v13, %v3773_v40  ;;  %v1879_v40 = vmul.f32 1.442695, %v1871_v37  ;;  %v1874_v52 = vsub.f32 %v3731_v23, %v1863_v50 }
 0x4ae   : > { %2759 = vmatpush3.msra.mxu0 %v3713_v1 }
 0x4af   : > { %2760 = vmatprep.subr.mxu0 %v4229_v38  ;;  %2704 = vmatmul.mubr.msk.f32.gmra.mxu0 %vm702_vm4, %v774_v34  ;;  %3064 = vpow2.f32 %v1879_v40 }
 0x4b0   : > { %v3055_v48 = vpop.eup %3054  ;;  %2761 = vmatpush3.msra.mxu0 %v3524_v51  ;;  %2706 = vmatprep.mubr.msk.f32.mxu0 %vm3134_vm1, %v4229_v38  ;;  %v1869_v3 = vpop.xlane.xlu1 %1868 }
 0x4b1   : > { %2762 = vmatprep.subr.mxu0 %v4229_v38  ;;  %v775_v1 = vmul.f32 %v3055_v48, %v3777_v14  ;;  %v1876_v23 = vsub.f32 %v3745_v36, %v1869_v3 }
 0x4b2   : > { %2763 = vmatpush3.msra.mxu0 %v3725_v15  ;;  %v1885_v15 = vmul.f32 1.442695, %v1874_v52 }
 0x4b3   : > { %2764 = vmatprep.subr.mxu0 %v4229_v38  ;;  %2707 = vmatmul.mubr.msk.f32.gmra.mxu0 %vm702_vm4, %v775_v1 }
 0x4b4   : > { %v3057_v6 = vpop.eup %3056  ;;  %2765 = vmatpush3.msra.mxu0 %v3735_v26  ;;  %2709 = vmatprep.mubr.msk.f32.mxu0 %vm3134_vm1, %v4229_v38  ;;  %3066 = vpow2.f32 %v1885_v15  ;;  %v1889_v26 = vmul.f32 1.442695, %v1876_v23 }
 0x4b5   : > { %2766 = vmatprep.subr.mxu0 %v4229_v38  ;;  %v776_v51 = vmul.f32 %v3057_v6, %v3781_v20  ;;  %v3927_v14 = vpop.eup %3058 }
 0x4b6   : > { %2767 = vmatpush3.msra.mxu0 %v3531_v53  ;;  %v1512_v53 = vsel %vm702_vm4, %v3927_v14, 0.0  ;;  %v3935_v20 = vpop.eup %3060  ;;  %3068 = vpow2.f32 %v1889_v26 }
 0x4b7   : > { %2768 = vmatprep.subr.mxu0 %v4229_v38  ;;  %2710 = vmatmul.mubr.msk.f32.gmra.mxu0 %vm702_vm4, %v776_v51  ;;  %v1521_v36 = vsel %vm702_vm4, %v3935_v20, 0.0 }
 0x4b8   : > { %2769 = vmatpush3.msra.mxu0 %v3747_v39  ;;  %2712 = vmatprep.mubr.msk.f32.mxu0 %vm3134_vm1, %v4229_v38  ;;  %v3941_v39 = vpop.eup %3062 }
 0x4b9   : > { %2826 = vmatprep.subr.mxu0 %v4229_v38  ;;  %v1527_v59 = vsel %vm702_vm4, %v3941_v39, 0.0 }
 0x4bc   : > { %1513 = vadd.xlane.f32.xlu0 %v1512_v53  ;;  %1928 = vrot.lane.b32.xlu1 %v3332_v63, %s3145_s13  ;;  %v3945_v41 = vpop.eup %3064 }
 0x4bd   : > { %v1894_v58 = vsel %vm702_vm4, %v3945_v41, 0.0 }
 0x4c0   : > { %1522 = vadd.xlane.f32.xlu0 %v1521_v36 }
 0x4c1   : > { %v3949_v49 = vpop.eup %3066 }
 0x4c2   : > { %v1903_v63 = vsel %vm702_vm4, %v3949_v49, 0.0 }
 0x4c3   : > { %v3953_v17 = vpop.eup %3068 }
 0x4c4   : > { %1528 = vadd.xlane.f32.xlu0 %v1527_v59  ;;  %v1909_v60 = vsel %vm702_vm4, %v3953_v17, 0.0 }
 0x4c8   : > { %1895 = vadd.xlane.f32.xlu0 %v1894_v58 }
 0x4cc   : > { %1904 = vadd.xlane.f32.xlu0 %v1903_v63 }
 0x4cf   : > { %v759_v43 = vpop.xlane.xlu0 %758 }
 0x4d0   : > { %3070 = vrcp.f32 %v759_v43  ;;  %1910 = vadd.xlane.f32.xlu0 %v1909_v60 }
 0x4d3   : > { %v762_v24 = vpop.xlane.xlu0 %761  ;;  %v765_v19 = vpop.xlane.xlu1 %764 }
 0x4d4   : > { %3072 = vrcp.f32 %v762_v24 }
 0x4d5   : > { %3074 = vrcp.f32 %v765_v19 }
 0x4d7   : > { %v3973_v13 = vpop.permute.xlu0 %1932 }
 0x4dd   : > { %v3071_v5 = vpop.eup %3070 }
 0x4de   : > { %v777_v42 = vmul.f32 %v3071_v5, %v3790_v27  ;;  %v3971_v27 = vpop.permute.xlu1 %1934 }
 0x4e0   : > { %2713 = vmatmul.mubr.msk.f32.gmra.mxu0 %vm702_vm4, %v777_v42 }
 0x4e1   : > { %2715 = vmatprep.mubr.msk.f32.mxu0 %vm3134_vm1, %v4229_v38  ;;  %v3073_v22 = vpop.eup %3072 }
 0x4e2   : > { %v778_v7 = vmul.f32 %v3073_v22, %v3794_v10  ;;  %v3075_v21 = vpop.eup %3074 }
 0x4e3   : > { %v779_v31 = vmul.f32 %v3075_v21, %v3796_v25 }
 0x4e4   : > { %2716 = vmatmul.mubr.msk.f32.gmra.mxu0 %vm702_vm4, %v778_v7 }
 0x4e5   : > { %2718 = vmatprep.mubr.msk.f32.mxu0 %vm3134_vm1, %v4229_v38 }
 0x4e6   : > { %1926 = vrot.lane.b32.xlu0 %v3330_v62, %s3145_s13 }
 0x4e8   : > { %2719 = vmatmul.mubr.msk.f32.gmra.mxu0 %vm702_vm4, %v779_v31 }
 0x4e9   : > { %2770 = vmatprep.mubr.msk.f32.mxu0 %vm3134_vm1, %v4229_v38 }
 0x508   : > { %v1132_v10 = vpop.xlane.xlu1 %1131  ;;  %v1129_v34 = vpop.xlane.xlu0 %1128 }
 0x509   : > { %3076 = vrcp.f32 %v1129_v34 }
 0x50a   : > { %3078 = vrcp.f32 %v1132_v10 }
 0x50c   : > { %v1135_v35 = vpop.xlane.xlu1 %1134  ;;  %v1141_v48 = vpop.xlane.xlu0 %1140 }
 0x50d   : > { %3080 = vrcp.f32 %v1135_v35 }
 0x510   : > { %v1138_v62 = vpop.xlane.xlu1 %1137  ;;  %v1147_v51 = vpop.xlane.xlu0 %1146 }
 0x511   : > { %3082 = vrcp.f32 %v1138_v62 }
 0x512   : > { %3084 = vrcp.f32 %v1141_v48 }
 0x514   : > { %v1144_v37 = vpop.xlane.xlu1 %1143 }
 0x515   : > { %3086 = vrcp.f32 %v1144_v37 }
 0x516   : > { %v3077_v25 = vpop.eup %3076  ;;  %3088 = vrcp.f32 %v1147_v51 }
 0x517   : > { %v1155_v50 = vmul.f32 %v3077_v25, %v3820_v18  ;;  %v3079_v40 = vpop.eup %3078 }
 0x518   : > { %v1511_v1 = vpop.xlane.xlu1 %1510  ;;  %v1156_v6 = vmul.f32 %v3079_v40, %v3823_v0 }
 0x519   : > { %2771 = vmatmul.mubr.msk.f32.vlgmr.msra.gmra.mxu0 %vm702_vm4, %v1155_v50  ;;  %3090 = vrcp.f32 %v1511_v1 }
 0x51a   : > { %2827 = vmatpush3.msra.mxu0 %v3761_v4  ;;  %2773 = vmatprep.mubr.msk.f32.mxu0 %vm3134_vm1, %v4229_v38  ;;  %v3081_v3 = vpop.eup %3080 }
 0x51b   : > { %2828 = vmatprep.subr.mxu0 %v4229_v38  ;;  %v1157_v18 = vmul.f32 %v3081_v3, %v3827_v11 }
 0x51c   : > { %v3981_v52 = vpop.xlane.xlu1 %1516  ;;  %2829 = vmatpush3.msra.mxu0 %v3751_v44 }
 0x51d   : > { %2830 = vmatprep.subr.mxu0 %v4229_v38  ;;  %2774 = vmatmul.mubr.msk.f32.gmra.mxu0 %vm702_vm4, %v1156_v6 }
 0x51e   : > { %2831 = vmatpush3.msra.mxu0 %v3538_v54  ;;  %2776 = vmatprep.mubr.msk.f32.mxu0 %vm3134_vm1, %v4229_v38  ;;  %v3083_v0 = vpop.eup %3082 }
 0x51f   : > { %2832 = vmatprep.subr.mxu0 %v4229_v38  ;;  %v1158_v44 = vmul.f32 %v3083_v0, %v3843_v61  ;;  %v3085_v15 = vpop.eup %3084 }
 0x520   : > { %v1520_v4 = vpop.xlane.xlu1 %1519  ;;  %2833 = vmatpush3.msra.mxu0 %v3753_v45 }
 0x521   : > { %2834 = vmatprep.subr.mxu0 %v4229_v38  ;;  %2777 = vmatmul.mubr.msk.f32.gmra.mxu0 %vm702_vm4, %v1157_v18 }
 0x522   : > { %2835 = vmatpush3.msra.mxu0 %v3755_v47  ;;  %2779 = vmatprep.mubr.msk.f32.mxu0 %vm3134_vm1, %v4229_v38  ;;  %v1159_v47 = vmul.f32 %v3085_v15, %v3832_v30  ;;  %v3087_v11 = vpop.eup %3086 }
 0x523   : > { %2836 = vmatprep.subr.mxu0 %v4229_v38  ;;  %v3089_v61 = vpop.eup %3088 }
 0x524   : > { %v1526_v54 = vpop.xlane.xlu1 %1525  ;;  %2837 = vmatpush3.msra.mxu0 %v3543_v56  ;;  %v1160_v56 = vmul.f32 %v3087_v11, %v3850_v16  ;;  %v4230_v16 = vld [vmem:[#allocation2_spill] sm:$0xff] }
 0x525   : > { %2838 = vmatprep.subr.mxu0 %v4229_v38  ;;  %2780 = vmatmul.mubr.msk.f32.gmra.mxu0 %vm702_vm4, %v1158_v44 }
 0x526   : > { %2839 = vmatpush3.msra.mxu0 %v3759_v55  ;;  %2782 = vmatprep.mubr.msk.f32.mxu0 %vm3134_vm1, %v4229_v38  ;;  %v1161_v55 = vmul.f32 %v3089_v61, %v3838_v46  ;;  %v3091_v30 = vpop.eup %3090 }
 0x527   : > { %2896 = vmatprep.subr.mxu0 %v4229_v38  ;;  %v1537_v26 = vmul.f32 %v3091_v30, %v3855_v2  ;;  %v1931_v2 = vpop.permute.xlu0 %1930 }
 0x528   : > { %v1893_v45 = vpop.xlane.xlu1 %1892 }
 0x529   : > { %2783 = vmatmul.mubr.msk.f32.gmra.mxu0 %vm702_vm4, %v1159_v47 }
 0x52a   : > { %2785 = vmatprep.mubr.msk.f32.mxu0 %vm3134_vm1, %v4229_v38 }
 0x52c   : > { %v1899_v23 = vpop.xlane.xlu1 %1898 }
 0x52d   : > { %2786 = vmatmul.mubr.msk.f32.gmra.mxu0 %vm702_vm4, %v1160_v56 }
 0x52e   : > { %2788 = vmatprep.mubr.msk.f32.mxu0 %vm3134_vm1, %v4229_v38 }
 0x530   : > { %v1902_v53 = vpop.xlane.xlu1 %1901 }
 0x531   : > { %2789 = vmatmul.mubr.msk.f32.gmra.mxu0 %vm702_vm4, %v1161_v55 }
 0x532   : > { %2840 = vmatprep.mubr.msk.f32.mxu0 %vm3134_vm1, %v4229_v38 }
 0x534   : > { %v4026_v46 = vpop.xlane.xlu1 %1907 }
 0x535   : > { %2841 = vmatmul.mubr.msk.f32.vlgmr.msra.gmra.mxu0 %vm702_vm4, %v1537_v26 }
 0x536   : > { %2897 = vmatpush3.msra.mxu0 %v3785_v8  ;;  %2843 = vmatprep.mubr.msk.f32.mxu0 %vm3134_vm1, %v4229_v38 }
 0x537   : > { %2898 = vmatprep.subr.mxu0 %v4229_v38 }
 0x538   : > { %2899 = vmatpush3.msra.mxu0 %v4230_v16  ;;  %v1929_v8 = vpop.permute.xlu1 %1928 }
 0x539   : > { %2900 = vmatprep.subr.mxu0 %v4229_v38 }
 0x53a   : > { %2901 = vmatpush3.msra.mxu0 %v3971_v27 }
 0x53b   : > { %2902 = vmatprep.subr.mxu0 %v4229_v38 }
 0x53c   : > { %2903 = vmatpush3.msra.mxu0 %v3973_v13 }
 0x53d   : > { %2904 = vmatprep.subr.mxu0 %v4229_v38 }
 0x53e   : > { %2905 = vmatpush3.msra.mxu0 %v1931_v2 }
 0x53f   : > { %2906 = vmatprep.subr.mxu0 %v4229_v38 }
 0x540   : > { %2907 = vmatpush3.msra.mxu0 %v1929_v8 }
 0x541   : > { %2908 = vmatprep.subr.mxu0 %v4229_v38 }
 0x545   : > { %v1514_v36 = vpop.xlane.xlu0 %1513 }
 0x546   : > { %3092 = vrcp.f32 %v1514_v36  ;;  %v2178_v36 = vld [vmem:[%s4223_s5 + $0x18] sm:$0xff] }
 0x547   : > { %3094 = vrcp.f32 %v3981_v52  ;;  %2964 = vmatpush3.msra.mxu1 %v2178_v36 }
 0x548   : > { %3096 = vrcp.f32 %v1520_v4  ;;  %2961 = vmatprep.subr.mxu1 %v4229_v38 }
 0x549   : > { %v1523_v59 = vpop.xlane.xlu0 %1522 }
 0x54a   : > { %3098 = vrcp.f32 %v1523_v59 }
 0x54b   : > { %3100 = vrcp.f32 %v1526_v54 }
 0x54d   : > { %v1529_v58 = vpop.xlane.xlu0 %1528 }
 0x54e   : > { %3102 = vrcp.f32 %v1529_v58 }
 0x54f   : > { %3104 = vrcp.f32 %v1893_v45 }
 0x551   : > { %v1896_v63 = vpop.xlane.xlu0 %1895 }
 0x552   : > { %3106 = vrcp.f32 %v1896_v63 }
 0x553   : > { %v3093_v43 = vpop.eup %3092  ;;  %3108 = vrcp.f32 %v1899_v23 }
 0x554   : > { %v1538_v60 = vmul.f32 %v3093_v43, %v3927_v14  ;;  %v3095_v24 = vpop.eup %3094  ;;  %3110 = vrcp.f32 %v1902_v53  ;;  %v2177_v43 = vld [vmem:[%s4223_s5 + $0x10] sm:$0xff] }
 0x555   : > { %v1905_v19 = vpop.xlane.xlu0 %1904  ;;  %v1539_v5 = vmul.f32 %v3095_v24, %v3860_v33  ;;  %v3097_v42 = vpop.eup %3096  ;;  %2965 = vmatpush3.msra.mxu1 %v2177_v43 }
 0x556   : > { %2844 = vmatmul.mubr.msk.f32.gmra.mxu0 %vm702_vm4, %v1538_v60  ;;  %v1540_v14 = vmul.f32 %v3097_v42, %v3865_v57  ;;  %3112 = vrcp.f32 %v1905_v19  ;;  %v2176_v60 = vld [vmem:[%s4223_s5 + $0x8] sm:$0xff]  ;;  %2962 = vmatprep.subr.mxu1 %v4229_v38 }
 0x557   : > { %2846 = vmatprep.mubr.msk.f32.mxu0 %vm3134_vm1, %v4229_v38  ;;  %v3099_v7 = vpop.eup %3098  ;;  %3114 = vrcp.f32 %v4026_v46  ;;  %2966 = vmatpush3.msra.mxu1 %v2176_v60 }
 0x558   : > { %v1541_v33 = vmul.f32 %v3099_v7, %v3935_v20  ;;  %v3101_v31 = vpop.eup %3100  ;;  %2963 = vmatprep.subr.mxu1 %v4229_v38 }
 0x559   : > { %v1911_v22 = vpop.xlane.xlu0 %1910  ;;  %v1542_v57 = vmul.f32 %v3101_v31, %v3869_v9 }
 0x55a   : > { %2847 = vmatmul.mubr.msk.f32.gmra.mxu0 %vm702_vm4, %v1539_v5  ;;  %3116 = vrcp.f32 %v1911_v22  ;;  %v2175_v22 = vld [vmem:[%s4223_s5] sm:$0xff] }
 0x55b   : > { %2849 = vmatprep.mubr.msk.f32.mxu0 %vm3134_vm1, %v4229_v38  ;;  %v3103_v27 = vpop.eup %3102  ;;  %2967 = vmatpush3.msra.mxu1 %v2175_v22 }
 0x55c   : > { %v1543_v20 = vmul.f32 %v3103_v27, %v3941_v39  ;;  %v3105_v13 = vpop.eup %3104 }
 0x55d   : > { %v1927_v21 = vpop.permute.xlu0 %1926  ;;  %v1919_v34 = vmul.f32 %v3105_v13, %v3873_v32 }
 0x55e   : > { %2850 = vmatmul.mubr.msk.f32.gmra.mxu0 %vm702_vm4, %v1540_v14 }
 0x55f   : > { %2909 = vmatpush3.msra.mxu0 %v1927_v21  ;;  %2852 = vmatprep.mubr.msk.f32.mxu0 %vm3134_vm1, %v4229_v38  ;;  %v3107_v9 = vpop.eup %3106 }
 0x560   : > { %2931 = vmatprep.subr.mxu0 %v4229_v38  ;;  %v1920_v39 = vmul.f32 %v3107_v9, %v3945_v41  ;;  %v3109_v37 = vpop.eup %3108 }
 0x561   : > { %v1921_v32 = vmul.f32 %v3109_v37, %v3879_v12  ;;  %v3111_v50 = vpop.eup %3110 }
 0x562   : > { %2853 = vmatmul.mubr.msk.f32.gmra.mxu0 %vm702_vm4, %v1541_v33  ;;  %v1922_v41 = vmul.f32 %v3111_v50, %v3883_v28 }
 0x563   : > { %2855 = vmatprep.mubr.msk.f32.mxu0 %vm3134_vm1, %v4229_v38  ;;  %v3113_v52 = vpop.eup %3112 }
 0x564   : > { %v1923_v12 = vmul.f32 %v3113_v52, %v3949_v49  ;;  %v3115_v3 = vpop.eup %3114 }
 0x565   : > { %v1924_v51 = vmul.f32 %v3115_v3, %v3889_v29 }
 0x566   : > { %2856 = vmatmul.mubr.msk.f32.gmra.mxu0 %vm702_vm4, %v1542_v57 }
 0x567   : > { %2858 = vmatprep.mubr.msk.f32.mxu0 %vm3134_vm1, %v4229_v38  ;;  %v3117_v4 = vpop.eup %3116 }
 0x568   : > { %v1925_v28 = vmul.f32 %v3117_v4, %v3953_v17 }
 0x56a   : > { %2859 = vmatmul.mubr.msk.f32.gmra.mxu0 %vm702_vm4, %v1543_v20 }
 0x56b   : > { %v4059_v10 = vpop.f32.mrf.mxu0  ;;  %2910 = vmatprep.mubr.msk.f32.mxu0 %vm3134_vm1, %v4229_v38 }
 0x56d   : > { %v2702_v35 = vpop.f32.mrf.mxu0 }
 0x56e   : > { %2911 = vmatmul.mubr.msk.f32.vlgmr.msra.gmra.mxu0 %vm702_vm4, %v1919_v34 }
 0x56f   : > { %v4065_v62 = vpop.f32.mrf.mxu0  ;;  %2913 = vmatprep.mubr.msk.f32.mxu0 %vm3134_vm1, %v4229_v38  ;;  %2932 = vmatpush3.msra.mxu0 %v2178_v36 }
 0x570   : > { %2933 = vmatprep.subr.mxu0 %v4229_v38 }
 0x571   : > { %v2705_v48 = vpop.f32.mrf.mxu0  ;;  %2934 = vmatpush3.msra.mxu0 %v2177_v43 }
 0x572   : > { %2914 = vmatmul.mubr.msk.f32.gmra.mxu0 %vm702_vm4, %v1920_v39  ;;  %2935 = vmatprep.subr.mxu0 %v4229_v38 }
 0x573   : > { %v4072_v25 = vpop.f32.mrf.mxu0  ;;  %2916 = vmatprep.mubr.msk.f32.mxu0 %vm3134_vm1, %v4229_v38  ;;  %2936 = vmatpush3.msra.mxu0 %v2176_v60 }
 0x574   : > { %2937 = vmatprep.subr.mxu0 %v4229_v38 }
 0x575   : > { %v2708_v1 = vpop.f32.mrf.mxu0  ;;  %2938 = vmatpush3.msra.mxu0 %v2175_v22  ;;  %v2478_v22 = vld [vmem:[%s4224_s6] ss:$0 sm:$0xff] }
 0x576   : > { %2917 = vmatmul.mubr.msk.f32.gmra.mxu0 %vm702_vm4, %v1921_v32 }
 0x577   : > { %v4078_v40 = vpop.f32.mrf.mxu0  ;;  %2919 = vmatprep.mubr.msk.f32.mxu0 %vm3134_vm1, %v4229_v38 }
 0x579   : > { %v2711_v6 = vpop.f32.mrf.mxu0 }
 0x57a   : > { %2920 = vmatmul.mubr.msk.f32.gmra.mxu0 %vm702_vm4, %v1922_v41 }
 0x57b   : > { %2922 = vmatprep.mubr.msk.f32.mxu0 %vm3134_vm1, %v4229_v38 }
 0x57e   : > { %2923 = vmatmul.mubr.msk.f32.gmra.mxu0 %vm702_vm4, %v1923_v12 }
 0x57f   : > { %2925 = vmatprep.mubr.msk.f32.mxu0 %vm3134_vm1, %v4229_v38 }
 0x582   : > { %2926 = vmatmul.mubr.msk.f32.gmra.mxu0 %vm702_vm4, %v1924_v51 }
 0x583   : > { %2928 = vmatprep.mubr.msk.f32.mxu0 %vm3134_vm1, %v4229_v38 }
 0x586   : > { %2929 = vmatmul.mubr.msk.f32.gmra.mxu0 %vm702_vm4, %v1925_v28 }
 0x587   : > { %2939 = vmatprep.mubr.msk.f32.mxu0 %vm3134_vm1, %v4229_v38 }
 0x5a0   : > { %v4098_v49 = vpop.f32.mrf.mxu0 }
 0x5a2   : > { %v2714_v18 = vpop.f32.mrf.mxu0 }
 0x5a4   : > { %v4100_v0 = vpop.f32.mrf.mxu0 }
 0x5a6   : > { %v2717_v54 = vpop.f32.mrf.mxu0 }
 0x5a8   : > { %v4102_v29 = vpop.f32.mrf.mxu0 }
 0x5aa   : > { %v2720_v44 = vpop.f32.mrf.mxu0 }
 0x5d9   : > { %v1270_v15 = vpop.f32.mrf.mxu0 }
 0x5da   : > { %2075 = vrot.lane.b32.xlu0 %v1270_v15, %s3146_s14 }
 0x5db   : > { %v2772_v45 = vpop.f32.mrf.mxu0 }
 0x5dd   : > { %v4105_v17 = vpop.f32.mrf.mxu0 }
 0x5df   : > { %v2775_v47 = vpop.f32.mrf.mxu0 }
 0x5e1   : > { %v1280_v11 = vpop.f32.mrf.mxu0 }
 0x5e2   : > { %2079 = vrot.lane.b32.xlu1 %v1280_v11, %s3146_s14 }
 0x5e3   : > { %v2778_v56 = vpop.f32.mrf.mxu0 }
 0x5e5   : > { %v1285_v61 = vpop.f32.mrf.mxu0 }
 0x5e6   : > { %2081 = vrot.lane.b32.xlu1 %v1285_v61, %s3146_s14 }
 0x5e7   : > { %v2781_v23 = vpop.f32.mrf.mxu0 }
 0x5e9   : > { %v1290_v55 = vpop.f32.mrf.mxu0 }
 0x5ea   : > { %2083 = vrot.lane.b32.xlu1 %v1290_v55, %s3146_s14 }
 0x5eb   : > { %v2784_v30 = vpop.f32.mrf.mxu0 }
 0x5ed   : > { %v1295_v26 = vpop.f32.mrf.mxu0 }
 0x5ee   : > { %2085 = vrot.lane.b32.xlu1 %v1295_v26, %s3146_s14 }
 0x5ef   : > { %v2787_v53 = vpop.f32.mrf.mxu0 }
 0x5f1   : > { %v1300_v16 = vpop.f32.mrf.mxu0 }
 0x5f3   : > { %v2790_v46 = vpop.f32.mrf.mxu0 }
 0x5f5   : > { %v1652_v2 = vpop.f32.mrf.mxu0 }
 0x5f6   : > { %2103 = vrot.lane.b32.xlu0 %v1652_v2, %s3147_s15 }
 0x5f7   : > { %v2842_v8 = vpop.f32.mrf.mxu0 }
 0x616   : > { %v1657_v59 = vpop.f32.mrf.mxu0 }
 0x618   : > { %v2845_v58 = vpop.f32.mrf.mxu0 }
 0x61a   : > { %v1662_v63 = vpop.f32.mrf.mxu0 }
 0x61b   : > { %2107 = vrot.lane.b32.xlu1 %v1662_v63, %s3147_s15 }
 0x61c   : > { %v2848_v24 = vpop.f32.mrf.mxu0 }
 0x61e   : > { %v1667_v19 = vpop.f32.mrf.mxu0 }
 0x61f   : > { %2109 = vrot.lane.b32.xlu1 %v1667_v19, %s3147_s15 }
 0x620   : > { %v2851_v5 = vpop.f32.mrf.mxu0 }
 0x622   : > { %v1672_v42 = vpop.f32.mrf.mxu0 }
 0x623   : > { %2111 = vrot.lane.b32.xlu0 %v1672_v42, %s3147_s15 }
 0x624   : > { %v2854_v14 = vpop.f32.mrf.mxu0 }
 0x626   : > { %v1677_v7 = vpop.f32.mrf.mxu0 }
 0x627   : > { %2113 = vrot.lane.b32.xlu1 %v1677_v7, %s3147_s15 }
 0x628   : > { %v2857_v21 = vpop.f32.mrf.mxu0 }
 0x62a   : > { %v1682_v33 = vpop.f32.mrf.mxu0 }
 0x62c   : > { %v2860_v31 = vpop.f32.mrf.mxu0 }
 0x62e   : > { %v2034_v57 = vpop.f32.mrf.mxu0 }
 0x62f   : > { %2131 = vrot.lane.b32.xlu0 %v2034_v57, %s3148_s25 }
 0x630   : > { %v2912_v27 = vpop.f32.mrf.mxu0 }
 0x631   : > { %v3119_v27 = vld [vmem:[%s3205_s30 + $0x10] sm:$0xff] }
 0x632   : > { %v2039_v20 = vpop.f32.mrf.mxu0 }
 0x634   : > { %v2915_v13 = vpop.f32.mrf.mxu0 }
 0x636   : > { %v2044_v34 = vpop.f32.mrf.mxu0 }
 0x637   : > { %2135 = vrot.lane.b32.xlu1 %v2044_v34, %s3148_s25 }
 0x638   : > { %v2918_v9 = vpop.f32.mrf.mxu0 }
 0x63a   : > { %v2049_v35 = vpop.f32.mrf.mxu0 }
 0x63b   : > { %2087 = vrot.lane.b32.xlu1 %v1300_v16, %s3146_s14  ;;  %2137 = vrot.lane.b32.xlu0 %v2049_v35, %s3148_s25  ;;  %v3120_v35 = vld [vmem:[%s3205_s30 + $0x18] sm:$0xff] }
 0x63c   : > { %v2921_v39 = vpop.f32.mrf.mxu0 }
 0x63e   : > { %v2054_v37 = vpop.f32.mrf.mxu0 }
 0x63f   : > { %2115 = vrot.lane.b32.xlu1 %v1682_v33, %s3147_s15  ;;  %2077 = vrot.lane.b32.xlu0 %v4105_v17, %s3146_s14 }
 0x640   : > { %v2924_v48 = vpop.f32.mrf.mxu0 }
 0x642   : > { %v2059_v32 = vpop.f32.mrf.mxu0 }
 0x643   : > { %2105 = vrot.lane.b32.xlu0 %v1657_v59, %s3147_s15  ;;  %2139 = vrot.lane.b32.xlu1 %v2054_v37, %s3148_s25 }
 0x644   : > { %v2927_v50 = vpop.f32.mrf.mxu0 }
 0x645   : > { %v3121_v50 = vld [vmem:[%s3205_s30 + $0x20] sm:$0xff] }
 0x646   : > { %v2064_v1 = vpop.f32.mrf.mxu0 }
 0x647   : > { %2133 = vrot.lane.b32.xlu0 %v2039_v20, %s3148_s25  ;;  %2141 = vrot.lane.b32.xlu1 %v2059_v32, %s3148_s25 }
 0x648   : > { %v2930_v41 = vpop.f32.mrf.mxu0 }
 0x64b   : > { %2143 = vrot.lane.b32.xlu1 %v2064_v1, %s3148_s25 }
 0x64c   : > { %v2076_v3 = vpop.permute.xlu0 %2075 }
 0x64d   : > { %v2152_v54 = vsel %vm566_vm2, %v4059_v10, %v2076_v3 }
 0x654   : > { %v2080_v52 = vpop.permute.xlu1 %2079 }
 0x655   : > { %v2154_v11 = vsel %vm566_vm2, %v4072_v25, %v2080_v52 }
 0x658   : > { %v2082_v6 = vpop.permute.xlu1 %2081 }
 0x659   : > { %v2155_v23 = vsel %vm566_vm2, %v4078_v40, %v2082_v6 }
 0x65c   : > { %v2084_v12 = vpop.permute.xlu1 %2083 }
 0x65d   : > { %v2156_v46 = vsel %vm566_vm2, %v4098_v49, %v2084_v12 }
 0x660   : > { %v2086_v51 = vpop.permute.xlu1 %2085 }
 0x661   : > { %v2157_v59 = vsel %vm566_vm2, %v4100_v0, %v2086_v51 }
 0x668   : > { %v2104_v4 = vpop.permute.xlu0 %2103 }
 0x669   : > { %v2160_v44 = vsel %vm2159_vm5, %v2152_v54, %v2104_v4  ;;  %v3122_v4 = vld [vmem:[%s3205_s30 + $0x8] sm:$0xff] }
 0x68d   : > { %v2108_v28 = vpop.permute.xlu1 %2107 }
 0x68e   : > { %v2162_v56 = vsel %vm2159_vm5, %v2154_v11, %v2108_v28 }
 0x691   : > { %v2110_v15 = vpop.permute.xlu1 %2109 }
 0x692   : > { %v2163_v55 = vsel %vm2159_vm5, %v2155_v23, %v2110_v15 }
 0x695   : > { %v2112_v18 = vpop.permute.xlu0 %2111 }
 0x696   : > { %v2164_v40 = vsel %vm2159_vm5, %v2156_v46, %v2112_v18  ;;  %v3123_v18 = vld [vmem:[%s3205_s30 + $0x28] sm:$0xff] }
 0x699   : > { %v2114_v47 = vpop.permute.xlu1 %2113 }
 0x69a   : > { %v2165_v63 = vsel %vm2159_vm5, %v2157_v59, %v2114_v47 }
 0x6a1   : > { %v2132_v45 = vpop.permute.xlu0 %2131 }
 0x6a2   : > { %v2168_v17 = vsel %vm2167_vm6, %v2160_v44, %v2132_v45 }
 0x6a3   : > { %2940 = vmatmul.mubr.msk.f32.vlgmr.msra.gmra.mxu0 %vm291_vm0, %v2168_v17  ;;  %v3124_v17 = vld [vmem:[%s3205_s30 + $0x30] sm:$0xff] }
 0x6a4   : > { %2942 = vmatprep.mubr.msk.f32.mxu0 %vm3134_vm1, %v4229_v38 }
 0x6a9   : > { %v2136_v61 = vpop.permute.xlu1 %2135 }
 0x6aa   : > { %v2170_v10 = vsel %vm2167_vm6, %v2162_v56, %v2136_v61 }
 0x6ab   : > { %2946 = vmatmul.mubr.msk.f32.vlgmr.msra.gmra.mxu1 %vm291_vm0, %v2170_v10 }
 0x6ac   : > { %2948 = vmatprep.mubr.msk.f32.mxu1 %vm3134_vm1, %v4229_v38 }
 0x6ad   : > { %v2088_v30 = vpop.permute.xlu1 %2087  ;;  %v2138_v26 = vpop.permute.xlu0 %2137 }
 0x6ae   : > { %v2171_v53 = vsel %vm2167_vm6, %v2163_v55, %v2138_v26 }
 0x6af   : > { %2949 = vmatmul.mubr.msk.f32.gmra.mxu1 %vm291_vm0, %v2171_v53 }
 0x6b0   : > { %2951 = vmatprep.mubr.msk.f32.mxu1 %vm3134_vm1, %v4229_v38 }
 0x6b1   : > { %v2116_v25 = vpop.permute.xlu1 %2115  ;;  %v2078_v16 = vpop.permute.xlu0 %2077 }
 0x6b2   : > { %v2153_v58 = vsel %vm566_vm2, %v4065_v62, %v2078_v16  ;;  %v2158_v62 = vsel %vm566_vm2, %v4102_v29, %v2088_v30  ;;  %v3118_v29 = vld [vmem:[%s3205_s30] sm:$0xff] }
 0x6b3   : > { %v2166_v0 = vsel %vm2159_vm5, %v2158_v62, %v2116_v25 }
 0x6b5   : > { %v2106_v2 = vpop.permute.xlu0 %2105  ;;  %v2140_v8 = vpop.permute.xlu1 %2139 }
 0x6b6   : > { %v2172_v36 = vsel %vm2167_vm6, %v2164_v40, %v2140_v8  ;;  %v2161_v49 = vsel %vm2159_vm5, %v2153_v58, %v2106_v2 }
 0x6b7   : > { %2952 = vmatmul.mubr.msk.f32.gmra.mxu1 %vm291_vm0, %v2172_v36 }
 0x6b8   : > { %2954 = vmatprep.mubr.msk.f32.mxu1 %vm3134_vm1, %v4229_v38 }
 0x6b9   : > { %v2134_v43 = vpop.permute.xlu0 %2133  ;;  %v2142_v60 = vpop.permute.xlu1 %2141 }
 0x6ba   : > { %v2169_v24 = vsel %vm2167_vm6, %v2161_v49, %v2134_v43  ;;  %v2173_v19 = vsel %vm2167_vm6, %v2165_v63, %v2142_v60 }
 0x6bb   : > { %2943 = vmatmul.mubr.msk.f32.gmra.mxu0 %vm291_vm0, %v2169_v24  ;;  %2955 = vmatmul.mubr.msk.f32.gmra.mxu1 %vm291_vm0, %v2173_v19 }
 0x6bc   : > { %2957 = vmatprep.mubr.msk.f32.mxu1 %vm3134_vm1, %v4229_v38 }
 0x6bd   : > { %v2144_v5 = vpop.permute.xlu1 %2143 }
 0x6be   : > { %v2174_v42 = vsel %vm2167_vm6, %v2166_v0, %v2144_v5 }
 0x6bf   : > { %2958 = vmatmul.mubr.msk.f32.gmra.mxu1 %vm291_vm0, %v2174_v42 }
 0x763   : > { %v2273_v14 = vpop.f32.mrf.mxu0 }
 0x764   : > { %v2274_v7 = vadd.f32 %v2478_v22, %v2273_v14 }
 0x765   : > { %v2941_v38 = vpop.f32.mrf.mxu0 }
 0x766   : > { %v2307_v21 = vadd.f32 %v3118_v29, %v2274_v7 }
 0x768   : > { %2314 = vst.msk [vmem:[%s4192_s10] sm:$0xff] %vm291_vm0, %v2307_v21 }
 0x76b   : > { %v2283_v33 = vpop.f32.mrf.mxu1 }
 0x76c   : > { %v2284_v31 = vadd.f32 %v2478_v22, %v2283_v33 }
 0x76d   : > { %v2947_v57 = vpop.f32.mrf.mxu1 }
 0x76e   : > { %v2309_v20 = vadd.f32 %v3119_v27, %v2284_v31 }
 0x76f   : > { %v2288_v13 = vpop.f32.mrf.mxu1 }
 0x770   : > { %2316 = vst.msk [vmem:[%s4192_s10 + $0x10] sm:$0xff] %vm291_vm0, %v2309_v20  ;;  %v2289_v34 = vadd.f32 %v2478_v22, %v2288_v13 }
 0x771   : > { %v2950_v9 = vpop.f32.mrf.mxu1 }
 0x772   : > { %v2310_v39 = vadd.f32 %v3120_v35, %v2289_v34 }
 0x774   : > { %2317 = vst.msk [vmem:[%s4192_s10 + $0x18] sm:$0xff] %vm291_vm0, %v2310_v39 }
 0x777   : > { %v2293_v37 = vpop.f32.mrf.mxu1 }
 0x778   : > { %v2294_v48 = vadd.f32 %v2478_v22, %v2293_v37 }
 0x779   : > { %v2953_v32 = vpop.f32.mrf.mxu1 }
 0x77a   : > { %v2311_v1 = vadd.f32 %v3121_v50, %v2294_v48 }
 0x77b   : > { %v2278_v41 = vpop.f32.mrf.mxu0  ;;  %v2298_v52 = vpop.f32.mrf.mxu1 }
 0x77c   : > { %2318 = vst.msk [vmem:[%s4192_s10 + $0x20] sm:$0xff] %vm291_vm0, %v2311_v1  ;;  %v2279_v6 = vadd.f32 %v2478_v22, %v2278_v41  ;;  %v2299_v12 = vadd.f32 %v2478_v22, %v2298_v52 }
 0x77d   : > { %v2944_v3 = vpop.f32.mrf.mxu0  ;;  %v2956_v51 = vpop.f32.mrf.mxu1 }
 0x77e   : > { %v2308_v28 = vadd.f32 %v3122_v4, %v2279_v6  ;;  %v2312_v54 = vadd.f32 %v3123_v18, %v2299_v12 }
 0x77f   : > { %v2303_v44 = vpop.f32.mrf.mxu1 }
 0x780   : > { %2315 = vst.msk [vmem:[%s4192_s10 + $0x8] sm:$0xff] %vm291_vm0, %v2308_v28  ;;  %2319 = vst.msk [vmem:[%s4192_s10 + $0x28] sm:$0xff] %vm291_vm0, %v2312_v54  ;;  %v2304_v15 = vadd.f32 %v2478_v22, %v2303_v44 }
 0x781   : > { %v2959_v45 = vpop.f32.mrf.mxu1 }
 0x782   : > { %v2313_v47 = vadd.f32 %v3124_v17, %v2304_v15 }
 0x784   : > { %2320 = vst.msk [vmem:[%s4192_s10 + $0x30] sm:$0xff] %vm291_vm0, %v2313_v47 }
 0x785 PF: > { %s17_s24 = sadd.s32 1, %s3131_s24  }
 0x786   : > { %p14_p4 = scmp.ge.s32.totalorder %s17_s24, 4  }
 0x788   :  { %16 = sbr.rel (!%p14_p4) target bundleno = 1 (0x1), region = 78 }

// kernel: vit_forward.10
= control target key start
LH: loop header
LB: loop body
LE: loop exit
PB: predicated region body
PF: predicated region fallthrough
CT: control target
= control target key end

     0   :  { %s2491_s13 = smov 0   ;;  %s3165_s0 = inlined_call_operand.vmem [shape: f32[112,32], index: 0, kind: input, shape index: {}]   ;;  %s3166_s1 = inlined_call_operand.vmem [shape: f32[1,32], index: 1, kind: input, shape index: {}]   ;;  %s3167_s2 = inlined_call_operand.vmem [shape: f32[1,32], index: 2, kind: input, shape index: {}]   ;;  %s3168_s3 = inlined_call_operand.vmem [shape: f32[56,56], index: 3, kind: input, shape index: {}]   ;;  %s3169_s4 = inlined_call_operand.vmem [shape: f32[32,32], index: 4, kind: input, shape index: {}]   ;;  %s3170_s5 = inlined_call_operand.vmem [shape: f32[1,32], index: 5, kind: input, shape index: {}]   ;;  %s3171_s6 = inlined_call_operand.vmem [shape: f32[32,64], index: 6, kind: input, shape index: {}]   ;;  %s3172_s7 = inlined_call_operand.vmem [shape: f32[1,64], index: 7, kind: input, shape index: {}]   ;;  %s3173_s8 = inlined_call_operand.vmem [shape: f32[32,32], index: 8, kind: input, shape index: {}]   ;;  %s3174_s9 = inlined_call_operand.vmem [shape: f32[1,32], index: 9, kind: input, shape index: {}]   ;;  %s3175_s10 = inlined_call_operand.vmem [shape: f32[112,32], index: 10, kind: output, shape index: {}]  }
   0x1 LB: > { %s1882_s14 = sadd.s32 4294967295, %s2428_s13   ;;  %p1886_p0 = scmp.ge.s32.totalorder %s2428_s13, 1  ;;  %s2428_s13 = sphi %s2491_s13, %s20_s13  }
   0x2   : > { %p313_p1 = scmp.lt.s32.totalorder %s2428_s13, 3 }
   0x4   : > { %p314_p2 = pnand %p1886_p0, %p313_p1 }
   0x5   : > { %s351_s15 = smul.u32 (!%p314_p2), 7, %s1882_s14  ;;  %s2432_s24 = smov (!%p314_p2), 112  }
   0x6   : > { %317 = sbr.rel (%p314_p2) target bundleno = 1990 (0x7c6), region = 60  ;;  %s2433_s27 = smov (!%p314_p2), 96  }
   0x7   : > { %p352_p3 = scmp.lt.s32.totalorder (!%p314_p2), %s351_s15, 13  ;;  %s2434_s28 = smov (!%p314_p2), 80  }
   0x8   : > { %s2435_s21 = smov (!%p314_p2), 16  }
   0xb   : > { %s3177_s15 = smov (!%p352_p3, %s351_s15), 13  ;;  %vm372_vm0 = vcmask 261120   ;;  %v2430_v49 = vmov 0.0   ;;  %v623_v50 = vld [vmem:[%s3169_s4 + $0x18] sm:$0xff]  ;;  %v622_v51 = vld [vmem:[%s3169_s4 + $0x10] sm:$0xff]  ;;  %v621_v52 = vld [vmem:[%s3169_s4 + $0x8] sm:$0xff] }
   0xc   : > { %s1887_s16 = sshll.u32 %s3177_s15, 3  ;;  %2069 = vmatprep.subr.mxu0 %v2430_v49  ;;  %2104 = vmatprep.subr.mxu1 %v2430_v49  ;;  %v620_v53 = vld [vmem:[%s3169_s4] sm:$0xff]  ;;  %vm2431_vm1 = vmmov 0   ;;  %vm498_vm2 = vcmask 457728   ;;  %vm887_vm3 = vcmask 130048  }
   0xd   : > { %s2507_s19 = scalar_lea.vmem %s3165_s0, %s1887_s16  ;;  %2105 = vmatpush3.msra.mxu1 %v623_v50  ;;  %2112 = vmatprep.mubr.msk.f32.mxu1 %vm2431_vm1, %v2430_v49  ;;  %v496_v50 = vld [vmem:[%s3168_s3 + $0x28] sm:$0xff]  ;;  %s3139_s26 = scalar_lea.vmem %s3175_s10, %s1887_s16 }
   0xe   : > { %v369_v0 = vld [vmem:[%s2507_s19 + $0x30] sm:$0xff]  ;;  %v368_v1 = vld [vmem:[%s2507_s19 + $0x28] sm:$0xff]  ;;  %v367_v2 = vld [vmem:[%s2507_s19 + $0x20] sm:$0xff]  ;;  %2106 = vmatprep.subr.mxu1 %v2430_v49  ;;  %2083 = vmatprep.mubr.msk.f32.mxu0 %vm2431_vm1, %v2430_v49 }
   0xf   : > { %v391_v3 = vsel %vm372_vm0, %v369_v0, 0.0  ;;  %v385_v4 = vsel %vm372_vm0, %v367_v2, 0.0  ;;  %v366_v5 = vld [vmem:[%s2507_s19 + $0x18] sm:$0xff]  ;;  %v388_v6 = vsel %vm372_vm0, %v368_v1, 0.0  ;;  %v365_v8 = vld [vmem:[%s2507_s19 + $0x10] sm:$0xff]  ;;  %v364_v9 = vld [vmem:[%s2507_s19 + $0x8] sm:$0xff]  ;;  %2107 = vmatpush3.msra.mxu1 %v622_v51 }
  0x10   : > { %392 = vadd.xlane.f32.xlu0 %v391_v3  ;;  %386 = vadd.xlane.f32.xlu1 %v385_v4  ;;  %v382_v7 = vsel %vm372_vm0, %v366_v5, 0.0  ;;  %v379_v10 = vsel %vm372_vm0, %v365_v8, 0.0  ;;  %v376_v11 = vsel %vm372_vm0, %v364_v9, 0.0  ;;  %v363_v12 = vld [vmem:[%s2507_s19] sm:$0xff]  ;;  %v497_v51 = vld [vmem:[%s3168_s3 + $0x30] sm:$0xff] }
  0x11   : > { %v373_v13 = vsel %vm372_vm0, %v363_v12, 0.0  ;;  %2108 = vmatprep.subr.mxu1 %v2430_v49 }
  0x12   : > { %2109 = vmatpush3.msra.mxu1 %v621_v52  ;;  %v752_v52 = vld [vmem:[%s3171_s6] sm:$0xff] }
  0x13   : > { %2110 = vmatprep.subr.mxu1 %v2430_v49 }
  0x14   : > { %389 = vadd.xlane.f32.xlu0 %v388_v6  ;;  %383 = vadd.xlane.f32.xlu1 %v382_v7 }
  0x15   : > { %2111 = vmatpush3.msra.mxu1 %v620_v53 }
  0x16   : > { %2133 = vmatprep.subr.mxu1 %v2430_v49 }
  0x18   : > { %380 = vadd.xlane.f32.xlu0 %v379_v10  ;;  %377 = vadd.xlane.f32.xlu1 %v376_v11 }
  0x1c   : > { %374 = vadd.xlane.f32.xlu0 %v373_v13 }
  0x99   : > { %v393_v14 = vpop.xlane.xlu0 %392  ;;  %v387_v15 = vpop.xlane.xlu1 %386 }
  0x9a   : > { %v401_v16 = vmul.f32 0.03125, %v393_v14  ;;  %v399_v17 = vmul.f32 0.03125, %v387_v15  ;;  %v1890_v14 = vld [vmem:[%s3167_s2] ss:$0 sm:$0xff] }
  0x9c   : > { %v2523_v18 = vsub.f32 %v369_v0, %v401_v16  ;;  %v2525_v19 = vsub.f32 %v367_v2, %v399_v17 }
  0x9d   : > { %v390_v20 = vpop.xlane.xlu0 %389  ;;  %v384_v21 = vpop.xlane.xlu1 %383 }
  0x9e   : > { %v400_v22 = vmul.f32 0.03125, %v390_v20  ;;  %v398_v23 = vmul.f32 0.03125, %v384_v21  ;;  %v415_v24 = vmul.f32 %v2523_v18, %v2523_v18  ;;  %v413_v25 = vmul.f32 %v2525_v19, %v2525_v19 }
  0xa0   : > { %v2531_v26 = vsub.f32 %v368_v1, %v400_v22  ;;  %v2533_v27 = vsub.f32 %v366_v5, %v398_v23  ;;  %v434_v28 = vsel %vm372_vm0, %v415_v24, 0.0  ;;  %v428_v30 = vsel %vm372_vm0, %v413_v25, 0.0 }
  0xa1   : > { %v381_v29 = vpop.xlane.xlu0 %380  ;;  %435 = vadd.xlane.f32.xlu1 %v434_v28  ;;  %v378_v31 = vpop.xlane.xlu1 %377 }
  0xa2   : > { %v397_v32 = vmul.f32 0.03125, %v381_v29  ;;  %v396_v33 = vmul.f32 0.03125, %v378_v31  ;;  %v414_v34 = vmul.f32 %v2531_v26, %v2531_v26  ;;  %v412_v35 = vmul.f32 %v2533_v27, %v2533_v27 }
  0xa4   : > { %v2541_v36 = vsub.f32 %v365_v8, %v397_v32  ;;  %v2543_v37 = vsub.f32 %v364_v9, %v396_v33  ;;  %v431_v38 = vsel %vm372_vm0, %v414_v34, 0.0  ;;  %v425_v42 = vsel %vm372_vm0, %v412_v35, 0.0 }
  0xa5   : > { %429 = vadd.xlane.f32.xlu1 %v428_v30  ;;  %432 = vadd.xlane.f32.xlu0 %v431_v38  ;;  %v375_v39 = vpop.xlane.xlu0 %374 }
  0xa6   : > { %v395_v40 = vmul.f32 0.03125, %v375_v39  ;;  %v411_v41 = vmul.f32 %v2541_v36, %v2541_v36  ;;  %v410_v43 = vmul.f32 %v2543_v37, %v2543_v37 }
  0xa8   : > { %v2551_v44 = vsub.f32 %v363_v12, %v395_v40  ;;  %v422_v45 = vsel %vm372_vm0, %v411_v41, 0.0  ;;  %v419_v46 = vsel %vm372_vm0, %v410_v43, 0.0  ;;  %v1889_v12 = vld [vmem:[%s3166_s1] ss:$0 sm:$0xff]  ;;  %v754_v43 = vld [vmem:[%s3171_s6 + $0x10] sm:$0xff] }
  0xa9   : > { %423 = vadd.xlane.f32.xlu1 %v422_v45  ;;  %426 = vadd.xlane.f32.xlu0 %v425_v42  ;;  %v755_v42 = vld [vmem:[%s3171_s6 + $0x18] sm:$0xff]  ;;  %v753_v45 = vld [vmem:[%s3171_s6 + $0x8] sm:$0xff] }
  0xaa   : > { %v409_v47 = vmul.f32 %v2551_v44, %v2551_v44 }
  0xac   : > { %v416_v48 = vsel %vm372_vm0, %v409_v47, 0.0  ;;  %v494_v47 = vld [vmem:[%s3168_s3 + $0x18] sm:$0xff] }
  0xad   : > { %420 = vadd.xlane.f32.xlu0 %v419_v46  ;;  %417 = vadd.xlane.f32.xlu1 %v416_v48  ;;  %v493_v46 = vld [vmem:[%s3168_s3 + $0x10] sm:$0xff]  ;;  %v495_v48 = vld [vmem:[%s3168_s3 + $0x20] sm:$0xff] }
 0x12a   : > { %v436_v54 = vpop.xlane.xlu1 %435 }
 0x12b   : > { %v443_v55 = vmul.f32 0.03125, %v436_v54 }
 0x12d   : > { %v450_v56 = vadd.f32 1e-05, %v443_v55 }
 0x12e   : > { %v430_v57 = vpop.xlane.xlu1 %429  ;;  %v433_v58 = vpop.xlane.xlu0 %432 }
 0x12f   : > { %2345 = vrsqrt.f32 %v450_v56  ;;  %v441_v59 = vmul.f32 0.03125, %v430_v57  ;;  %v442_v60 = vmul.f32 0.03125, %v433_v58 }
 0x131   : > { %v448_v61 = vadd.f32 1e-05, %v441_v59  ;;  %v449_v62 = vadd.f32 1e-05, %v442_v60 }
 0x132   : > { %v424_v63 = vpop.xlane.xlu1 %423  ;;  %v427_v0 = vpop.xlane.xlu0 %426 }
 0x133   : > { %2347 = vrsqrt.f32 %v448_v61  ;;  %v439_v1 = vmul.f32 0.03125, %v424_v63  ;;  %v440_v2 = vmul.f32 0.03125, %v427_v0 }
 0x134   : > { %2349 = vrsqrt.f32 %v449_v62 }
 0x135   : > { %v446_v3 = vadd.f32 1e-05, %v439_v1  ;;  %v447_v4 = vadd.f32 1e-05, %v440_v2 }
 0x136   : > { %v418_v5 = vpop.xlane.xlu1 %417  ;;  %v421_v6 = vpop.xlane.xlu0 %420 }
 0x137   : > { %2351 = vrsqrt.f32 %v446_v3  ;;  %v437_v7 = vmul.f32 0.03125, %v418_v5  ;;  %v438_v8 = vmul.f32 0.03125, %v421_v6 }
 0x138   : > { %2353 = vrsqrt.f32 %v447_v4 }
 0x139   : > { %v444_v9 = vadd.f32 1e-05, %v437_v7  ;;  %v445_v10 = vadd.f32 1e-05, %v438_v8 }
 0x13b   : > { %2355 = vrsqrt.f32 %v444_v9 }
 0x13c   : > { %v2346_v11 = vpop.eup %2345  ;;  %2357 = vrsqrt.f32 %v445_v10 }
 0x13d   : > { %v464_v13 = vmul.f32 %v2346_v11, %v2523_v18 }
 0x13f   : > { %v477_v15 = vmul.f32 %v1889_v12, %v464_v13 }
 0x140   : > { %v2348_v16 = vpop.eup %2347 }
 0x141   : > { %v2350_v17 = vpop.eup %2349  ;;  %v2587_v20 = vadd.f32 %v1890_v14, %v477_v15  ;;  %v462_v21 = vmul.f32 %v2348_v16, %v2525_v19 }
 0x142   : > { %v463_v22 = vmul.f32 %v2350_v17, %v2531_v26 }
 0x143   : > { %2070 = vmatpush3.msra.mxu0 %v2587_v20  ;;  %v475_v18 = vmul.f32 %v1889_v12, %v462_v21 }
 0x144   : > { %v2352_v23 = vpop.eup %2351  ;;  %2071 = vmatprep.subr.mxu0 %v2430_v49  ;;  %v476_v24 = vmul.f32 %v1889_v12, %v463_v22 }
 0x145   : > { %v2354_v25 = vpop.eup %2353  ;;  %v460_v28 = vmul.f32 %v2352_v23, %v2541_v36  ;;  %v488_v32 = vadd.f32 %v1890_v14, %v475_v18 }
 0x146   : > { %v489_v29 = vadd.f32 %v1890_v14, %v476_v24  ;;  %v461_v30 = vmul.f32 %v2354_v25, %v2533_v27 }
 0x147   : > { %v473_v19 = vmul.f32 %v1889_v12, %v460_v28 }
 0x148   : > { %v2356_v31 = vpop.eup %2355  ;;  %2072 = vmatpush3.msra.mxu0 %v489_v29  ;;  %v474_v33 = vmul.f32 %v1889_v12, %v461_v30  ;;  %v1906_v30 = vld [vmem:[%s3172_s7] ss:$0 sm:$0xff] }
 0x149   : > { %v2358_v34 = vpop.eup %2357  ;;  %2073 = vmatprep.subr.mxu0 %v2430_v49  ;;  %v458_v26 = vmul.f32 %v2356_v31, %v2551_v44  ;;  %v486_v39 = vadd.f32 %v1890_v14, %v473_v19  ;;  %v492_v44 = vld [vmem:[%s3168_s3 + $0x8] sm:$0xff] }
 0x14a   : > { %2074 = vmatpush3.msra.mxu0 %v488_v32  ;;  %v487_v35 = vadd.f32 %v1890_v14, %v474_v33  ;;  %v459_v38 = vmul.f32 %v2358_v34, %v2543_v37  ;;  %v491_v37 = vld [vmem:[%s3168_s3] sm:$0xff] }
 0x14b   : > { %2075 = vmatprep.subr.mxu0 %v2430_v49  ;;  %v471_v36 = vmul.f32 %v1889_v12, %v458_v26 }
 0x14c   : > { %2076 = vmatpush3.msra.mxu0 %v487_v35  ;;  %v472_v27 = vmul.f32 %v1889_v12, %v459_v38 }
 0x14d   : > { %2077 = vmatprep.subr.mxu0 %v2430_v49  ;;  %v484_v40 = vadd.f32 %v1890_v14, %v471_v36 }
 0x14e   : > { %2078 = vmatpush3.msra.mxu0 %v486_v39  ;;  %v485_v41 = vadd.f32 %v1890_v14, %v472_v27 }
 0x14f   : > { %2079 = vmatprep.subr.mxu0 %v2430_v49  ;;  %2113 = vmatmul.mubr.msk.f32.vlgmr.msra.gmra.mxu1 %vm372_vm0, %v484_v40 }
 0x150   : > { %2080 = vmatpush3.msra.mxu0 %v485_v41  ;;  %2115 = vmatprep.mubr.msk.f32.mxu1 %vm2431_vm1, %v2430_v49 }
 0x151   : > { %2081 = vmatprep.subr.mxu0 %v2430_v49  ;;  %2134 = vmatpush3.msra.mxu1 %v755_v42 }
 0x152   : > { %2082 = vmatpush3.msra.mxu0 %v484_v40  ;;  %2135 = vmatprep.subr.mxu1 %v2430_v49  ;;  %v1898_v40 = vld [vmem:[%s3170_s5] ss:$0 sm:$0xff] }
 0x153   : > { %2084 = vmatmul.mubr.msk.f32.vlgmr.msra.gmra.mxu0 %vm498_vm2, %v491_v37  ;;  %2116 = vmatmul.mubr.msk.f32.gmra.mxu1 %vm372_vm0, %v485_v41 }
 0x154   : > { %2086 = vmatprep.mubr.msk.f32.mxu0 %vm2431_vm1, %v2430_v49  ;;  %2118 = vmatprep.mubr.msk.f32.mxu1 %vm2431_vm1, %v2430_v49 }
 0x155   : > { %2136 = vmatpush3.msra.mxu1 %v754_v43  ;;  %2162 = vmatprep.subr.mxu0 %v2430_v49 }
 0x156   : > { %2137 = vmatprep.subr.mxu1 %v2430_v49 }
 0x157   : > { %2087 = vmatmul.mubr.msk.f32.gmra.mxu0 %vm498_vm2, %v492_v44  ;;  %2119 = vmatmul.mubr.msk.f32.gmra.mxu1 %vm372_vm0, %v486_v39 }
 0x158   : > { %2089 = vmatprep.mubr.msk.f32.mxu0 %vm2431_vm1, %v2430_v49  ;;  %2121 = vmatprep.mubr.msk.f32.mxu1 %vm2431_vm1, %v2430_v49 }
 0x159   : > { %2138 = vmatpush3.msra.mxu1 %v753_v45 }
 0x15a   : > { %2139 = vmatprep.subr.mxu1 %v2430_v49 }
 0x15b   : > { %2090 = vmatmul.mubr.msk.f32.gmra.mxu0 %vm498_vm2, %v493_v46  ;;  %2122 = vmatmul.mubr.msk.f32.gmra.mxu1 %vm372_vm0, %v487_v35 }
 0x15c   : > { %2092 = vmatprep.mubr.msk.f32.mxu0 %vm2431_vm1, %v2430_v49  ;;  %2124 = vmatprep.mubr.msk.f32.mxu1 %vm2431_vm1, %v2430_v49 }
 0x15d   : > { %2140 = vmatpush3.msra.mxu1 %v752_v52 }
 0x15e   : > { %2197 = vmatprep.subr.mxu1 %v2430_v49 }
 0x15f   : > { %2093 = vmatmul.mubr.msk.f32.gmra.mxu0 %vm498_vm2, %v494_v47  ;;  %2125 = vmatmul.mubr.msk.f32.gmra.mxu1 %vm372_vm0, %v488_v32 }
 0x160   : > { %2095 = vmatprep.mubr.msk.f32.mxu0 %vm2431_vm1, %v2430_v49  ;;  %2127 = vmatprep.mubr.msk.f32.mxu1 %vm2431_vm1, %v2430_v49 }
 0x163   : > { %2096 = vmatmul.mubr.msk.f32.gmra.mxu0 %vm498_vm2, %v495_v48  ;;  %2128 = vmatmul.mubr.msk.f32.gmra.mxu1 %vm372_vm0, %v489_v29 }
 0x164   : > { %2098 = vmatprep.mubr.msk.f32.mxu0 %vm2431_vm1, %v2430_v49  ;;  %2130 = vmatprep.mubr.msk.f32.mxu1 %vm2431_vm1, %v2430_v49 }
 0x167   : > { %2099 = vmatmul.mubr.msk.f32.gmra.mxu0 %vm498_vm2, %v496_v50  ;;  %2131 = vmatmul.mubr.msk.f32.gmra.mxu1 %vm372_vm0, %v2587_v20 }
 0x168   : > { %2101 = vmatprep.mubr.msk.f32.mxu0 %vm2431_vm1, %v2430_v49  ;;  %2141 = vmatprep.mubr.msk.f32.mxu1 %vm2431_vm1, %v2430_v49 }
 0x16b   : > { %2102 = vmatmul.mubr.msk.f32.gmra.mxu0 %vm498_vm2, %v497_v51 }
 0x16c   : > { %2176 = vmatprep.mubr.msk.f32.mxu0 %vm2431_vm1, %v2430_v49 }
 0x20f   : > { %v2683_v53 = vpop.f32.mrf.mxu1 }
 0x210   : > { %v719_v41 = vadd.f32 %v1898_v40, %v2683_v53 }
 0x211   : > { %v2114_v54 = vpop.f32.mrf.mxu1 }
 0x213   : > { %v586_v55 = vpop.f32.mrf.mxu0  ;;  %v2685_v56 = vpop.f32.mrf.mxu1 }
 0x214   : > { %2142 = vmatmul.mubr.msk.f32.vlgmr.msra.gmra.mxu1 %vm372_vm0, %v586_v55  ;;  %v724_v42 = vadd.f32 %v1898_v40, %v2685_v56 }
 0x215   : > { %v2085_v57 = vpop.f32.mrf.mxu0  ;;  %v2117_v58 = vpop.f32.mrf.mxu1  ;;  %2144 = vmatprep.mubr.msk.f32.mxu1 %vm2431_vm1, %v2430_v49 }
 0x217   : > { %v591_v59 = vpop.f32.mrf.mxu0  ;;  %v2690_v60 = vpop.f32.mrf.mxu1 }
 0x218   : > { %2145 = vmatmul.mubr.msk.f32.gmra.mxu1 %vm372_vm0, %v591_v59  ;;  %v729_v37 = vadd.f32 %v1898_v40, %v2690_v60 }
 0x219   : > { %v2088_v61 = vpop.f32.mrf.mxu0  ;;  %v2120_v62 = vpop.f32.mrf.mxu1  ;;  %2147 = vmatprep.mubr.msk.f32.mxu1 %vm2431_vm1, %v2430_v49 }
 0x21b   : > { %v596_v63 = vpop.f32.mrf.mxu0  ;;  %v2695_v0 = vpop.f32.mrf.mxu1 }
 0x21c   : > { %2148 = vmatmul.mubr.msk.f32.gmra.mxu1 %vm372_vm0, %v596_v63  ;;  %v734_v43 = vadd.f32 %v1898_v40, %v2695_v0 }
 0x21d   : > { %v2091_v1 = vpop.f32.mrf.mxu0  ;;  %v2123_v2 = vpop.f32.mrf.mxu1  ;;  %2150 = vmatprep.mubr.msk.f32.mxu1 %vm2431_vm1, %v2430_v49 }
 0x21f   : > { %v601_v3 = vpop.f32.mrf.mxu0  ;;  %v2700_v4 = vpop.f32.mrf.mxu1 }
 0x220   : > { %2151 = vmatmul.mubr.msk.f32.gmra.mxu1 %vm372_vm0, %v601_v3  ;;  %v739_v44 = vadd.f32 %v1898_v40, %v2700_v4 }
 0x221   : > { %v2094_v5 = vpop.f32.mrf.mxu0  ;;  %v2126_v6 = vpop.f32.mrf.mxu1  ;;  %2153 = vmatprep.mubr.msk.f32.mxu1 %vm2431_vm1, %v2430_v49 }
 0x222   : > { %v884_v5 = vlaneseq }
 0x223   : > { %v606_v7 = vpop.f32.mrf.mxu0  ;;  %v2705_v8 = vpop.f32.mrf.mxu1 }
 0x224   : > { %2154 = vmatmul.mubr.msk.f32.gmra.mxu1 %vm372_vm0, %v606_v7  ;;  %v744_v45 = vadd.f32 %v1898_v40, %v2705_v8  ;;  %v2857_v6 = vand.u32 127, %v884_v5 }
 0x225   : > { %v2097_v9 = vpop.f32.mrf.mxu0  ;;  %v2129_v10 = vpop.f32.mrf.mxu1  ;;  %2156 = vmatprep.mubr.msk.f32.mxu1 %vm2431_vm1, %v2430_v49 }
 0x226   : > { %vm886_vm4 = vcmp.lt.s32.totalorder %v2857_v6, 49 }
 0x227   : > { %v611_v11 = vpop.f32.mrf.mxu0  ;;  %v2710_v12 = vpop.f32.mrf.mxu1 }
 0x228   : > { %2157 = vmatmul.mubr.msk.f32.gmra.mxu1 %vm372_vm0, %v611_v11  ;;  %v749_v46 = vadd.f32 %v1898_v40, %v2710_v12 }
 0x229   : > { %v2100_v13 = vpop.f32.mrf.mxu0  ;;  %v2132_v14 = vpop.f32.mrf.mxu1  ;;  %2159 = vmatprep.mubr.msk.f32.mxu1 %vm2431_vm1, %v2430_v49 }
 0x22b   : > { %v616_v15 = vpop.f32.mrf.mxu0 }
 0x22c   : > { %2160 = vmatmul.mubr.msk.f32.gmra.mxu1 %vm372_vm0, %v616_v15 }
 0x22d   : > { %v2103_v16 = vpop.f32.mrf.mxu0  ;;  %2211 = vmatprep.mubr.msk.f32.mxu1 %vm2431_vm1, %v2430_v49 }
 0x2d4   : > { %v850_v17 = vpop.f32.mrf.mxu1 }
 0x2d5   : > { %v2746_v39 = vadd.f32 %v1906_v30, %v850_v17 }
 0x2d6   : > { %v2143_v20 = vpop.f32.mrf.mxu1 }
 0x2d8   : > { %v855_v21 = vpop.f32.mrf.mxu1 }
 0x2d9   : > { %v2748_v27 = vadd.f32 %v1906_v30, %v855_v21 }
 0x2da   : > { %v2146_v22 = vpop.f32.mrf.mxu1 }
 0x2dc   : > { %v860_v23 = vpop.f32.mrf.mxu1 }
 0x2dd   : > { %v2735_v38 = vadd.f32 %v1906_v30, %v860_v23 }
 0x2de   : > { %v2149_v24 = vpop.f32.mrf.mxu1 }
 0x2e0   : > { %v865_v18 = vpop.f32.mrf.mxu1 }
 0x2e1   : > { %v2737_v36 = vadd.f32 %v1906_v30, %v865_v18 }
 0x2e2   : > { %v2152_v25 = vpop.f32.mrf.mxu1 }
 0x2e4   : > { %v870_v28 = vpop.f32.mrf.mxu1 }
 0x2e5   : > { %v2725_v34 = vadd.f32 %v1906_v30, %v870_v28 }
 0x2e6   : > { %v2155_v29 = vpop.f32.mrf.mxu1 }
 0x2e8   : > { %v875_v31 = vpop.f32.mrf.mxu1 }
 0x2e9   : > { %v2721_v32 = vadd.f32 %v1906_v30, %v875_v31 }
 0x2ea   : > { %v2158_v33 = vpop.f32.mrf.mxu1 }
 0x2eb   : > { %1280 = vrot.lane.b32.xlu1 %v2721_v32, %s2432_s24 }
 0x2ec   : > { %v880_v19 = vpop.f32.mrf.mxu1 }
 0x2ed   : > { %v2727_v26 = vadd.f32 %v1906_v30, %v880_v19 }
 0x2ee   : > { %v2161_v35 = vpop.f32.mrf.mxu1 }
 0x2ef   : > { %1278 = vrot.lane.b32.xlu1 %v2725_v34, %s2432_s24  ;;  %1282 = vrot.lane.b32.xlu0 %v2727_v26, %s2432_s24 }
 0x2f0   : > { %2163 = vmatpush3.xpose.msk.msra.mxu0 %vm887_vm3, %v2727_v26 }
 0x2f1   : > { %2164 = vmatprep.subr.mxu0 %v2430_v49 }
 0x2f3   : > { %1276 = vrot.lane.b32.xlu1 %v2737_v36, %s2432_s24  ;;  %1274 = vrot.lane.b32.xlu0 %v2735_v38, %s2432_s24 }
 0x2f4   : > { %2165 = vmatpush3.xpose.msk.msra.mxu0 %vm887_vm3, %v2721_v32 }
 0x2f5   : > { %2166 = vmatprep.subr.mxu0 %v2430_v49 }
 0x2f7   : > { %1272 = vrot.lane.b32.xlu1 %v2748_v27, %s2432_s24  ;;  %1270 = vrot.lane.b32.xlu0 %v2746_v39, %s2432_s24 }
 0x2f8   : > { %2167 = vmatpush3.xpose.msk.msra.mxu0 %vm887_vm3, %v2725_v34 }
 0x2f9   : > { %2168 = vmatprep.subr.mxu0 %v2430_v49 }
 0x2fb   : > { %1256 = vrot.lane.b32.xlu1 %v719_v41, %s2432_s24  ;;  %1258 = vrot.lane.b32.xlu0 %v724_v42, %s2432_s24 }
 0x2fc   : > { %2169 = vmatpush3.xpose.msk.msra.mxu0 %vm887_vm3, %v2737_v36 }
 0x2fd   : > { %2170 = vmatprep.subr.mxu0 %v2430_v49 }
 0x2ff   : > { %1260 = vrot.lane.b32.xlu1 %v729_v37, %s2432_s24  ;;  %1262 = vrot.lane.b32.xlu0 %v734_v43, %s2432_s24 }
 0x300   : > { %2171 = vmatpush3.xpose.msk.msra.mxu0 %vm887_vm3, %v2735_v38 }
 0x301   : > { %2172 = vmatprep.subr.mxu0 %v2430_v49 }
 0x303   : > { %1264 = vrot.lane.b32.xlu1 %v739_v44, %s2432_s24  ;;  %1266 = vrot.lane.b32.xlu0 %v744_v45, %s2432_s24 }
 0x304   : > { %2173 = vmatpush3.xpose.msk.msra.mxu0 %vm887_vm3, %v2748_v27 }
 0x305   : > { %2174 = vmatprep.subr.mxu0 %v2430_v49 }
 0x307   : > { %1268 = vrot.lane.b32.xlu1 %v749_v46, %s2432_s24  ;;  %1116 = vrot.lane.b32.xlu0 %v2748_v27, %s2433_s27 }
 0x308   : > { %2175 = vmatpush3.xpose.msk.msra.mxu0 %vm887_vm3, %v2746_v39 }
 0x309   : > { %2232 = vmatprep.subr.mxu0 %v2430_v49 }
 0x30b   : > { %2177 = vmatmul.mubr.msk.f32.vlgmr.msra.gmra.mxu0 %vm887_vm3, %v719_v41  ;;  %1124 = vrot.lane.b32.xlu1 %v2721_v32, %s2433_s27 }
 0x30c   : > { %1126 = vrot.lane.b32.xlu0 %v2727_v26, %s2433_s27  ;;  %2179 = vmatprep.mubr.msk.f32.mxu0 %vm2431_vm1, %v2430_v49 }
 0x30f   : > { %2180 = vmatmul.mubr.msk.f32.gmra.mxu0 %vm887_vm3, %v724_v42  ;;  %1122 = vrot.lane.b32.xlu1 %v2725_v34, %s2433_s27 }
 0x310   : > { %2182 = vmatprep.mubr.msk.f32.mxu0 %vm2431_vm1, %v2430_v49 }
 0x313   : > { %2183 = vmatmul.mubr.msk.f32.gmra.mxu0 %vm887_vm3, %v729_v37  ;;  %1120 = vrot.lane.b32.xlu1 %v2737_v36, %s2433_s27 }
 0x314   : > { %2185 = vmatprep.mubr.msk.f32.mxu0 %vm2431_vm1, %v2430_v49 }
 0x317   : > { %2186 = vmatmul.mubr.msk.f32.gmra.mxu0 %vm887_vm3, %v734_v43  ;;  %1118 = vrot.lane.b32.xlu1 %v2735_v38, %s2433_s27 }
 0x318   : > { %2188 = vmatprep.mubr.msk.f32.mxu0 %vm2431_vm1, %v2430_v49 }
 0x31b   : > { %2189 = vmatmul.mubr.msk.f32.gmra.mxu0 %vm887_vm3, %v739_v44  ;;  %1114 = vrot.lane.b32.xlu1 %v2746_v39, %s2433_s27 }
 0x31c   : > { %2191 = vmatprep.mubr.msk.f32.mxu0 %vm2431_vm1, %v2430_v49 }
 0x31f   : > { %2192 = vmatmul.mubr.msk.f32.gmra.mxu0 %vm887_vm3, %v744_v45 }
 0x320   : > { %2194 = vmatprep.mubr.msk.f32.mxu0 %vm2431_vm1, %v2430_v49 }
 0x323   : > { %2195 = vmatmul.mubr.msk.f32.gmra.mxu0 %vm887_vm3, %v749_v46 }
 0x324   : > { %2246 = vmatprep.mubr.msk.f32.mxu0 %vm2431_vm1, %v2430_v49 }
 0x35d   : > { %v1281_v47 = vpop.permute.xlu1 %1280 }
 0x361   : > { %v1279_v48 = vpop.permute.xlu1 %1278  ;;  %v1283_v50 = vpop.permute.xlu0 %1282 }
 0x362   : > { %2233 = vmatpush3.xpose.msk.msra.mxu0 %vm887_vm3, %v1283_v50 }
 0x363   : > { %2234 = vmatprep.subr.mxu0 %v2430_v49 }
 0x365   : > { %v1277_v51 = vpop.permute.xlu1 %1276  ;;  %v1275_v52 = vpop.permute.xlu0 %1274 }
 0x366   : > { %2235 = vmatpush3.xpose.msk.msra.mxu0 %vm887_vm3, %v1281_v47 }
 0x367   : > { %2236 = vmatprep.subr.mxu0 %v2430_v49 }
 0x369   : > { %v1273_v53 = vpop.permute.xlu1 %1272  ;;  %v1271_v54 = vpop.permute.xlu0 %1270 }
 0x36a   : > { %2237 = vmatpush3.xpose.msk.msra.mxu0 %vm887_vm3, %v1279_v48 }
 0x36b   : > { %2238 = vmatprep.subr.mxu0 %v2430_v49 }
 0x36d   : > { %v1257_v55 = vpop.permute.xlu1 %1256  ;;  %v1259_v56 = vpop.permute.xlu0 %1258 }
 0x36e   : > { %2239 = vmatpush3.xpose.msk.msra.mxu0 %vm887_vm3, %v1277_v51 }
 0x36f   : > { %2240 = vmatprep.subr.mxu0 %v2430_v49 }
 0x371   : > { %v1261_v57 = vpop.permute.xlu1 %1260  ;;  %v1263_v58 = vpop.permute.xlu0 %1262 }
 0x372   : > { %2241 = vmatpush3.xpose.msk.msra.mxu0 %vm887_vm3, %v1275_v52 }
 0x373   : > { %2242 = vmatprep.subr.mxu0 %v2430_v49 }
 0x375   : > { %v1265_v59 = vpop.permute.xlu1 %1264  ;;  %v1267_v60 = vpop.permute.xlu0 %1266 }
 0x376   : > { %2243 = vmatpush3.xpose.msk.msra.mxu0 %vm887_vm3, %v1273_v53 }
 0x377   : > { %2244 = vmatprep.subr.mxu0 %v2430_v49 }
 0x379   : > { %v1269_v61 = vpop.permute.xlu1 %1268  ;;  %v1117_v62 = vpop.permute.xlu0 %1116 }
 0x37a   : > { %2245 = vmatpush3.xpose.msk.msra.mxu0 %vm887_vm3, %v1271_v54 }
 0x37b   : > { %2302 = vmatprep.subr.mxu0 %v2430_v49 }
 0x37d   : > { %v1125_v63 = vpop.permute.xlu1 %1124  ;;  %2247 = vmatmul.mubr.msk.f32.vlgmr.msra.gmra.mxu0 %vm887_vm3, %v1257_v55 }
 0x37e   : > { %v1127_v0 = vpop.permute.xlu0 %1126  ;;  %2249 = vmatprep.mubr.msk.f32.mxu0 %vm2431_vm1, %v2430_v49 }
 0x37f   : > { %2198 = vmatpush3.msra.mxu1 %v1127_v0 }
 0x380   : > { %2199 = vmatprep.subr.mxu1 %v2430_v49 }
 0x381   : > { %2200 = vmatpush3.msra.mxu1 %v1125_v63  ;;  %v1123_v1 = vpop.permute.xlu1 %1122  ;;  %2250 = vmatmul.mubr.msk.f32.gmra.mxu0 %vm887_vm3, %v1259_v56 }
 0x382   : > { %2201 = vmatprep.subr.mxu1 %v2430_v49  ;;  %2252 = vmatprep.mubr.msk.f32.mxu0 %vm2431_vm1, %v2430_v49 }
 0x383   : > { %2202 = vmatpush3.msra.mxu1 %v1123_v1 }
 0x384   : > { %2203 = vmatprep.subr.mxu1 %v2430_v49 }
 0x385   : > { %v1121_v2 = vpop.permute.xlu1 %1120  ;;  %2253 = vmatmul.mubr.msk.f32.gmra.mxu0 %vm887_vm3, %v1261_v57 }
 0x386   : > { %2204 = vmatpush3.msra.mxu1 %v1121_v2  ;;  %2255 = vmatprep.mubr.msk.f32.mxu0 %vm2431_vm1, %v2430_v49 }
 0x387   : > { %2205 = vmatprep.subr.mxu1 %v2430_v49 }
 0x389   : > { %v1119_v3 = vpop.permute.xlu1 %1118  ;;  %2256 = vmatmul.mubr.msk.f32.gmra.mxu0 %vm887_vm3, %v1263_v58 }
 0x38a   : > { %2206 = vmatpush3.msra.mxu1 %v1119_v3  ;;  %2258 = vmatprep.mubr.msk.f32.mxu0 %vm2431_vm1, %v2430_v49 }
 0x38b   : > { %2207 = vmatprep.subr.mxu1 %v2430_v49 }
 0x38c   : > { %2208 = vmatpush3.msra.mxu1 %v1117_v62 }
 0x38d   : > { %v1115_v4 = vpop.permute.xlu1 %1114  ;;  %2209 = vmatprep.subr.mxu1 %v2430_v49  ;;  %2259 = vmatmul.mubr.msk.f32.gmra.mxu0 %vm887_vm3, %v1265_v59 }
 0x38e   : > { %2210 = vmatpush3.msra.mxu1 %v1115_v4  ;;  %2261 = vmatprep.mubr.msk.f32.mxu0 %vm2431_vm1, %v2430_v49 }
 0x38f   : > { %2267 = vmatprep.subr.mxu1 %v2430_v49 }
 0x391   : > { %2262 = vmatmul.mubr.msk.f32.gmra.mxu0 %vm887_vm3, %v1267_v60 }
 0x392   : > { %2264 = vmatprep.mubr.msk.f32.mxu0 %vm2431_vm1, %v2430_v49 }
 0x395   : > { %2265 = vmatmul.mubr.msk.f32.gmra.mxu0 %vm887_vm3, %v1269_v61 }
 0x396   : > { %2310 = vmatprep.mubr.msk.f32.mxu0 %vm2431_vm1, %v2430_v49 }
 0x3cb   : > { %v996_v7 = vpop.f32.mrf.mxu0 }
 0x3cc   : > { %v2862_v8 = vsel %vm886_vm4, %v996_v7, -1e+30 }
 0x3cd   : > { %v2178_v9 = vpop.f32.mrf.mxu0  ;;  %v1037_v10 = vsel %vm498_vm2, %v2862_v8, -inf }
 0x3ce   : > { %1038 = vmax.xlane.f32.xlu0 %v1037_v10 }
 0x3cf   : > { %v1001_v11 = vpop.f32.mrf.mxu0 }
 0x3d0   : > { %v2868_v12 = vsel %vm886_vm4, %v1001_v11, -1e+30 }
 0x3d1   : > { %v2181_v13 = vpop.f32.mrf.mxu0  ;;  %v1040_v14 = vsel %vm498_vm2, %v2868_v12, -inf }
 0x3d2   : > { %1041 = vmax.xlane.f32.xlu1 %v1040_v14 }
 0x3d3   : > { %v1006_v15 = vpop.f32.mrf.mxu0 }
 0x3d4   : > { %v2874_v16 = vsel %vm886_vm4, %v1006_v15, -1e+30 }
 0x3d5   : > { %v2184_v17 = vpop.f32.mrf.mxu0  ;;  %v1043_v20 = vsel %vm498_vm2, %v2874_v16, -inf }
 0x3d6   : > { %1044 = vmax.xlane.f32.xlu0 %v1043_v20 }
 0x3d7   : > { %v1011_v21 = vpop.f32.mrf.mxu0 }
 0x3d8   : > { %v2880_v22 = vsel %vm886_vm4, %v1011_v21, -1e+30 }
 0x3d9   : > { %v2187_v23 = vpop.f32.mrf.mxu0  ;;  %v1046_v24 = vsel %vm498_vm2, %v2880_v22, -inf }
 0x3da   : > { %1047 = vmax.xlane.f32.xlu0 %v1046_v24 }
 0x3db   : > { %v1016_v18 = vpop.f32.mrf.mxu0 }
 0x3dc   : > { %v2886_v25 = vsel %vm886_vm4, %v1016_v18, -1e+30 }
 0x3dd   : > { %v2190_v28 = vpop.f32.mrf.mxu0  ;;  %v1049_v29 = vsel %vm498_vm2, %v2886_v25, -inf }
 0x3de   : > { %1050 = vmax.xlane.f32.xlu0 %v1049_v29 }
 0x3df   : > { %v1021_v30 = vpop.f32.mrf.mxu0 }
 0x3e0   : > { %v1035_v35 = vsel %vm886_vm4, %v1021_v30, -1e+30 }
 0x3e1   : > { %v2193_v31 = vpop.f32.mrf.mxu0  ;;  %v1052_v40 = vsel %vm498_vm2, %v1035_v35, -inf }
 0x3e3   : > { %1506 = vrot.lane.b32.xlu1 %v2721_v32, %s2434_s28  ;;  %v1026_v33 = vpop.f32.mrf.mxu0 }
 0x3e4   : > { %v2899_v41 = vsel %vm886_vm4, %v1026_v33, -1e+30 }
 0x3e5   : > { %v2196_v19 = vpop.f32.mrf.mxu0  ;;  %v1055_v42 = vsel %vm498_vm2, %v2899_v41, -inf }
 0x3f4   : > { %1508 = vrot.lane.b32.xlu0 %v2727_v26, %s2434_s28 }
 0x407   : > { %1053 = vmax.xlane.f32.xlu1 %v1052_v40 }
 0x413   : > { %1056 = vmax.xlane.f32.xlu0 %v1055_v42 }
 0x43d   : > { %v1378_v32 = vpop.f32.mrf.mxu0 }
 0x43e   : > { %v2905_v37 = vsel %vm886_vm4, %v1378_v32, -1e+30 }
 0x43f   : > { %v2248_v26 = vpop.f32.mrf.mxu0  ;;  %v1419_v43 = vsel %vm498_vm2, %v2905_v37, -inf }
 0x440   : > { %1420 = vmax.xlane.f32.xlu1 %v1419_v43 }
 0x441   : > { %v1383_v44 = vpop.f32.mrf.mxu0 }
 0x442   : > { %v2911_v45 = vsel %vm886_vm4, %v1383_v44, -1e+30 }
 0x443   : > { %v2251_v46 = vpop.f32.mrf.mxu0  ;;  %v1422_v47 = vsel %vm498_vm2, %v2911_v45, -inf }
 0x444   : > { %1423 = vmax.xlane.f32.xlu0 %v1422_v47 }
 0x445   : > { %v1388_v48 = vpop.f32.mrf.mxu0 }
 0x446   : > { %v2917_v50 = vsel %vm886_vm4, %v1388_v48, -1e+30 }
 0x447   : > { %v2254_v51 = vpop.f32.mrf.mxu0  ;;  %v1425_v52 = vsel %vm498_vm2, %v2917_v50, -inf }
 0x448   : > { %1426 = vmax.xlane.f32.xlu1 %v1425_v52 }
 0x449   : > { %v1393_v53 = vpop.f32.mrf.mxu0 }
 0x44a   : > { %v2923_v54 = vsel %vm886_vm4, %v1393_v53, -1e+30 }
 0x44b   : > { %v2257_v55 = vpop.f32.mrf.mxu0  ;;  %v1428_v56 = vsel %vm498_vm2, %v2923_v54, -inf }
 0x44c   : > { %1429 = vmax.xlane.f32.xlu0 %v1428_v56 }
 0x44d   : > { %v1398_v57 = vpop.f32.mrf.mxu0 }
 0x44e   : > { %v2929_v58 = vsel %vm886_vm4, %v1398_v57, -1e+30 }
 0x44f   : > { %v2260_v59 = vpop.f32.mrf.mxu0  ;;  %v1431_v60 = vsel %vm498_vm2, %v2929_v58, -inf }
 0x450   : > { %1432 = vmax.xlane.f32.xlu1 %v1431_v60 }
 0x451   : > { %v1403_v61 = vpop.f32.mrf.mxu0 }
 0x452   : > { %v2935_v62 = vsel %vm886_vm4, %v1403_v61, -1e+30 }
 0x453   : > { %v2263_v63 = vpop.f32.mrf.mxu0  ;;  %v1434_v0 = vsel %vm498_vm2, %v2935_v62, -inf }
 0x454   : > { %1435 = vmax.xlane.f32.xlu0 %v1434_v0 }
 0x455   : > { %v1408_v1 = vpop.f32.mrf.mxu0 }
 0x456   : > { %v2947_v11 = vsel %vm886_vm4, %v1408_v1, -1e+30 }
 0x457   : > { %v2266_v2 = vpop.f32.mrf.mxu0  ;;  %v1039_v3 = vpop.xlane.xlu0 %1038 }
 0x458   : > { %v1058_v4 = vsub.f32 %v2862_v8, %v1039_v3 }
 0x45a   : > { %v1065_v7 = vmul.f32 1.442695, %v1058_v4 }
 0x45c   : > { %2359 = vpow2.f32 %v1065_v7 }
 0x45f   : > { %v1045_v5 = vpop.xlane.xlu0 %1044 }
 0x460   : > { %v1060_v9 = vsub.f32 %v2874_v16, %v1045_v5 }
 0x461   : > { %1502 = vrot.lane.b32.xlu1 %v2737_v36, %s2434_s28  ;;  %v1437_v36 = vsel %vm498_vm2, %v2947_v11, -inf }
 0x462   : > { %v1069_v10 = vmul.f32 1.442695, %v1060_v9 }
 0x463   : > { %v1048_v21 = vpop.xlane.xlu0 %1047 }
 0x464   : > { %2361 = vpow2.f32 %v1069_v10  ;;  %v1061_v30 = vsub.f32 %v2880_v22, %v1048_v21 }
 0x466   : > { %v1071_v33 = vmul.f32 1.442695, %v1061_v30 }
 0x467   : > { %v1051_v23 = vpop.xlane.xlu0 %1050 }
 0x468   : > { %v1062_v19 = vsub.f32 %v2886_v25, %v1051_v23 }
 0x469   : > { %v2951_v13 = vpop.eup %2359 }
 0x46a   : > { %1504 = vrot.lane.b32.xlu0 %v2725_v34, %s2434_s28  ;;  %v1042_v34 = vpop.xlane.xlu1 %1041  ;;  %v1079_v8 = vsel %vm498_vm2, %v2951_v13, 0.0 }
 0x46b   : > { %v1059_v24 = vsub.f32 %v2868_v12, %v1042_v34  ;;  %v2969_v31 = vpop.permute.xlu0 %1508 }
 0x46d   : > { %v1067_v29 = vmul.f32 1.442695, %v1059_v24 }
 0x46e   : > { %v2957_v15 = vpop.permute.xlu1 %1506 }
 0x471   : > { %v2955_v14 = vpop.eup %2361 }
 0x472   : > { %v1085_v6 = vsel %vm498_vm2, %v2955_v14, 0.0 }
 0x485   : > { %1438 = vmax.xlane.f32.xlu1 %v1437_v36 }
 0x489   : > { %1080 = vadd.xlane.f32.xlu0 %v1079_v8 }
 0x48d   : > { %1086 = vadd.xlane.f32.xlu0 %v1085_v6 }
 0x490   : > { %v1054_v16 = vpop.xlane.xlu1 %1053 }
 0x491   : > { %v1063_v17 = vsub.f32 %v1035_v35, %v1054_v16  ;;  %v1073_v35 = vmul.f32 1.442695, %v1062_v19 }
 0x493   : > { %v1075_v20 = vmul.f32 1.442695, %v1063_v17 }
 0x495   : > { %2363 = vpow2.f32 %v1075_v20 }
 0x496   : > { %1500 = vrot.lane.b32.xlu1 %v2735_v38, %s2434_s28  ;;  %2365 = vpow2.f32 %v1067_v29 }
 0x497   : > { %2367 = vpow2.f32 %v1071_v33 }
 0x498   : > { %2369 = vpow2.f32 %v1073_v35 }
 0x49c   : > { %v1057_v38 = vpop.xlane.xlu0 %1056 }
 0x49d   : > { %v1064_v12 = vsub.f32 %v2899_v41, %v1057_v38 }
 0x49f   : > { %v1077_v40 = vmul.f32 1.442695, %v1064_v12 }
 0x4a1   : > { %2371 = vpow2.f32 %v1077_v40 }
 0x4a2   : > { %v2964_v18 = vpop.eup %2363 }
 0x4a3   : > { %v1094_v28 = vsel %vm498_vm2, %v2964_v18, 0.0  ;;  %v2973_v42 = vpop.eup %2365 }
 0x4a4   : > { %1095 = vadd.xlane.f32.xlu0 %v1094_v28  ;;  %v1082_v32 = vsel %vm498_vm2, %v2973_v42, 0.0  ;;  %v2977_v22 = vpop.eup %2367 }
 0x4a5   : > { %v1088_v26 = vsel %vm498_vm2, %v2977_v22, 0.0  ;;  %v2981_v25 = vpop.eup %2369 }
 0x4a6   : > { %v1091_v41 = vsel %vm498_vm2, %v2981_v25, 0.0 }
 0x4ae   : > { %v2985_v43 = vpop.eup %2371 }
 0x4af   : > { %v1097_v44 = vsel %vm498_vm2, %v2985_v43, 0.0 }
 0x4ba   : > { %1083 = vadd.xlane.f32.xlu1 %v1082_v32 }
 0x4be   : > { %1089 = vadd.xlane.f32.xlu1 %v1088_v26 }
 0x4c2   : > { %1092 = vadd.xlane.f32.xlu1 %v1091_v41 }
 0x4c6   : > { %1098 = vadd.xlane.f32.xlu1 %v1097_v44 }
 0x4c9   : > { %v1421_v46 = vpop.xlane.xlu1 %1420 }
 0x4ca   : > { %v1440_v47 = vsub.f32 %v2905_v37, %v1421_v46 }
 0x4cc   : > { %v1447_v48 = vmul.f32 1.442695, %v1440_v47 }
 0x4cd   : > { %v1424_v51 = vpop.xlane.xlu0 %1423 }
 0x4ce   : > { %2373 = vpow2.f32 %v1447_v48  ;;  %v1441_v52 = vsub.f32 %v2911_v45, %v1424_v51 }
 0x4d0   : > { %v1449_v53 = vmul.f32 1.442695, %v1441_v52 }
 0x4d1   : > { %v1427_v55 = vpop.xlane.xlu1 %1426 }
 0x4d2   : > { %2375 = vpow2.f32 %v1449_v53  ;;  %v1442_v56 = vsub.f32 %v2917_v50, %v1427_v55 }
 0x4d4   : > { %v1451_v57 = vmul.f32 1.442695, %v1442_v56 }
 0x4d5   : > { %v1430_v59 = vpop.xlane.xlu0 %1429 }
 0x4d6   : > { %2377 = vpow2.f32 %v1451_v57  ;;  %v1443_v60 = vsub.f32 %v2923_v54, %v1430_v59 }
 0x4d8   : > { %v1453_v61 = vmul.f32 1.442695, %v1443_v60 }
 0x4d9   : > { %v1433_v63 = vpop.xlane.xlu1 %1432 }
 0x4da   : > { %2379 = vpow2.f32 %v1453_v61  ;;  %v1444_v37 = vsub.f32 %v2929_v58, %v1433_v63 }
 0x4db   : > { %v2994_v0 = vpop.eup %2373 }
 0x4dc   : > { %v1455_v1 = vmul.f32 1.442695, %v1444_v37  ;;  %v1461_v45 = vsel %vm498_vm2, %v2994_v0, 0.0 }
 0x4dd   : > { %1462 = vadd.xlane.f32.xlu0 %v1461_v45  ;;  %v1436_v2 = vpop.xlane.xlu0 %1435  ;;  %v1503_v8 = vpop.permute.xlu1 %1502 }
 0x4de   : > { %2381 = vpow2.f32 %v1455_v1  ;;  %v1445_v50 = vsub.f32 %v2935_v62, %v1436_v2 }
 0x4df   : > { %v2999_v3 = vpop.eup %2375 }
 0x4e0   : > { %v1457_v4 = vmul.f32 1.442695, %v1445_v50  ;;  %v1464_v54 = vsel %vm498_vm2, %v2999_v3, 0.0 }
 0x4e1   : > { %1465 = vadd.xlane.f32.xlu1 %v1464_v54  ;;  %v1505_v6 = vpop.permute.xlu0 %1504  ;;  %v1676_v54 = vld [vmem:[%s3173_s8 + $0x18] sm:$0xff] }
 0x4e2   : > { %2383 = vpow2.f32 %v1457_v4  ;;  %2303 = vmatpush3.msra.mxu0 %v1676_v54 }
 0x4e3   : > { %v3003_v58 = vpop.eup %2377  ;;  %2304 = vmatprep.subr.mxu0 %v2430_v49 }
 0x4e4   : > { %v1467_v5 = vsel %vm498_vm2, %v3003_v58, 0.0 }
 0x4e5   : > { %1468 = vadd.xlane.f32.xlu0 %v1467_v5  ;;  %v1674_v5 = vld [vmem:[%s3173_s8 + $0x8] sm:$0xff] }
 0x4e7   : > { %v3007_v7 = vpop.eup %2379 }
 0x4e8   : > { %v1470_v9 = vsel %vm498_vm2, %v3007_v7, 0.0 }
 0x4e9   : > { %1471 = vadd.xlane.f32.xlu0 %v1470_v9 }
 0x4eb   : > { %v3011_v62 = vpop.eup %2381 }
 0x4ec   : > { %v1473_v10 = vsel %vm498_vm2, %v3011_v62, 0.0 }
 0x4ed   : > { %1474 = vadd.xlane.f32.xlu1 %v1473_v10 }
 0x4ef   : > { %v3015_v36 = vpop.eup %2383 }
 0x4f0   : > { %v1476_v34 = vsel %vm498_vm2, %v3015_v36, 0.0 }
 0x4f1   : > { %1477 = vadd.xlane.f32.xlu0 %v1476_v34 }
 0x507   : > { %1498 = vrot.lane.b32.xlu0 %v2748_v27, %s2434_s28 }
 0x50e   : > { %v1439_v16 = vpop.xlane.xlu1 %1438 }
 0x50f   : > { %v1446_v17 = vsub.f32 %v2947_v11, %v1439_v16 }
 0x511   : > { %v1459_v20 = vmul.f32 1.442695, %v1446_v17 }
 0x512   : > { %v1081_v21 = vpop.xlane.xlu0 %1080  ;;  %v1501_v27 = vpop.permute.xlu1 %1500 }
 0x513   : > { %2385 = vpow2.f32 %v1459_v20 }
 0x514   : > { %2387 = vrcp.f32 %v1081_v21 }
 0x516   : > { %v1087_v11 = vpop.xlane.xlu0 %1086 }
 0x520   : > { %v3022_v23 = vpop.eup %2385 }
 0x521   : > { %v2388_v24 = vpop.eup %2387  ;;  %v1479_v28 = vsel %vm498_vm2, %v3022_v23, 0.0 }
 0x522   : > { %v1107_v29 = vmul.f32 %v2388_v24, %v2951_v13  ;;  %1480 = vadd.xlane.f32.xlu1 %v1479_v28 }
 0x524   : > { %2212 = vmatmul.mubr.msk.f32.vlgmr.msra.gmra.mxu1 %vm498_vm2, %v1107_v29 }
 0x525   : > { %2268 = vmatpush3.msra.mxu1 %v2969_v31  ;;  %2214 = vmatprep.mubr.msk.f32.mxu1 %vm2431_vm1, %v2430_v49 }
 0x526   : > { %2269 = vmatprep.subr.mxu1 %v2430_v49 }
 0x527   : > { %2270 = vmatpush3.msra.mxu1 %v2957_v15 }
 0x528   : > { %2271 = vmatprep.subr.mxu1 %v2430_v49 }
 0x529   : > { %2272 = vmatpush3.msra.mxu1 %v1505_v6 }
 0x52a   : > { %2273 = vmatprep.subr.mxu1 %v2430_v49 }
 0x52b   : > { %2274 = vmatpush3.msra.mxu1 %v1503_v8 }
 0x52c   : > { %2275 = vmatprep.subr.mxu1 %v2430_v49 }
 0x52d   : > { %2276 = vmatpush3.msra.mxu1 %v1501_v27  ;;  %v1096_v31 = vpop.xlane.xlu0 %1095 }
 0x52e   : > { %2277 = vmatprep.subr.mxu1 %v2430_v49 }
 0x533   : > { %1496 = vrot.lane.b32.xlu1 %v2746_v39, %s2434_s28 }
 0x543   : > { %v1084_v13 = vpop.xlane.xlu1 %1083 }
 0x544   : > { %2389 = vrcp.f32 %v1084_v13 }
 0x545   : > { %2391 = vrcp.f32 %v1087_v11 }
 0x547   : > { %v1090_v15 = vpop.xlane.xlu1 %1089 }
 0x548   : > { %2393 = vrcp.f32 %v1090_v15 }
 0x54b   : > { %v1093_v30 = vpop.xlane.xlu1 %1092 }
 0x54c   : > { %2395 = vrcp.f32 %v1093_v30 }
 0x54d   : > { %2397 = vrcp.f32 %v1096_v31 }
 0x54f   : > { %v1099_v35 = vpop.xlane.xlu1 %1098 }
 0x550   : > { %2399 = vrcp.f32 %v1099_v35 }
 0x551   : > { %v2390_v33 = vpop.eup %2389 }
 0x552   : > { %v1108_v19 = vmul.f32 %v2390_v33, %v2973_v42  ;;  %v2392_v38 = vpop.eup %2391 }
 0x553   : > { %v1109_v39 = vmul.f32 %v2392_v38, %v2955_v14 }
 0x554   : > { %2215 = vmatmul.mubr.msk.f32.gmra.mxu1 %vm498_vm2, %v1108_v19 }
 0x555   : > { %2217 = vmatprep.mubr.msk.f32.mxu1 %vm2431_vm1, %v2430_v49  ;;  %v2394_v12 = vpop.eup %2393 }
 0x556   : > { %v1110_v40 = vmul.f32 %v2394_v12, %v2977_v22 }
 0x558   : > { %2218 = vmatmul.mubr.msk.f32.gmra.mxu1 %vm498_vm2, %v1109_v39 }
 0x559   : > { %2220 = vmatprep.mubr.msk.f32.mxu1 %vm2431_vm1, %v2430_v49  ;;  %v2396_v32 = vpop.eup %2395 }
 0x55a   : > { %v1111_v42 = vmul.f32 %v2396_v32, %v2981_v25  ;;  %v2398_v26 = vpop.eup %2397 }
 0x55b   : > { %v1112_v14 = vmul.f32 %v2398_v26, %v2964_v18 }
 0x55c   : > { %2221 = vmatmul.mubr.msk.f32.gmra.mxu1 %vm498_vm2, %v1110_v40 }
 0x55d   : > { %2223 = vmatprep.mubr.msk.f32.mxu1 %vm2431_vm1, %v2430_v49  ;;  %v2400_v41 = vpop.eup %2399 }
 0x55e   : > { %v1113_v22 = vmul.f32 %v2400_v41, %v2985_v43 }
 0x560   : > { %2224 = vmatmul.mubr.msk.f32.gmra.mxu1 %vm498_vm2, %v1111_v42 }
 0x561   : > { %2226 = vmatprep.mubr.msk.f32.mxu1 %vm2431_vm1, %v2430_v49 }
 0x564   : > { %2227 = vmatmul.mubr.msk.f32.gmra.mxu1 %vm498_vm2, %v1112_v14 }
 0x565   : > { %2229 = vmatprep.mubr.msk.f32.mxu1 %vm2431_vm1, %v2430_v49 }
 0x566   : > { %v1463_v25 = vpop.xlane.xlu0 %1462 }
 0x567   : > { %2401 = vrcp.f32 %v1463_v25 }
 0x568   : > { %2230 = vmatmul.mubr.msk.f32.gmra.mxu1 %vm498_vm2, %v1113_v22 }
 0x569   : > { %2281 = vmatprep.mubr.msk.f32.mxu1 %vm2431_vm1, %v2430_v49 }
 0x56a   : > { %v1466_v18 = vpop.xlane.xlu1 %1465 }
 0x56b   : > { %2403 = vrcp.f32 %v1466_v18 }
 0x56e   : > { %v1469_v44 = vpop.xlane.xlu0 %1468 }
 0x56f   : > { %2405 = vrcp.f32 %v1469_v44 }
 0x572   : > { %v1472_v46 = vpop.xlane.xlu0 %1471 }
 0x573   : > { %2407 = vrcp.f32 %v1472_v46 }
 0x574   : > { %v2402_v52 = vpop.eup %2401 }
 0x575   : > { %v1489_v53 = vmul.f32 %v2402_v52, %v2994_v0 }
 0x576   : > { %v1475_v51 = vpop.xlane.xlu1 %1474 }
 0x577   : > { %2409 = vrcp.f32 %v1475_v51  ;;  %v1956_v51 = vld [vmem:[%s3174_s9] ss:$0 sm:$0xff] }
 0x578   : > { %v2404_v56 = vpop.eup %2403 }
 0x579   : > { %v1490_v57 = vmul.f32 %v2404_v56, %v2999_v3  ;;  %v2415_v56 = vld [vmem:[%s2507_s19] sm:$0xff] }
 0x57a   : > { %v1478_v47 = vpop.xlane.xlu0 %1477 }
 0x57b   : > { %2411 = vrcp.f32 %v1478_v47 }
 0x57c   : > { %v2406_v59 = vpop.eup %2405 }
 0x57d   : > { %v1491_v60 = vmul.f32 %v2406_v59, %v3003_v58  ;;  %v1675_v58 = vld [vmem:[%s3173_s8 + $0x10] sm:$0xff] }
 0x57e   : > { %v1499_v48 = vpop.permute.xlu0 %1498  ;;  %2305 = vmatpush3.msra.mxu0 %v1675_v58 }
 0x57f   : > { %2278 = vmatpush3.msra.mxu1 %v1499_v48  ;;  %2306 = vmatprep.subr.mxu0 %v2430_v49 }
 0x580   : > { %2279 = vmatprep.subr.mxu1 %v2430_v49  ;;  %v2408_v61 = vpop.eup %2407  ;;  %2307 = vmatpush3.msra.mxu0 %v1674_v5 }
 0x581   : > { %v1492_v63 = vmul.f32 %v2408_v61, %v3007_v7  ;;  %v1673_v7 = vld [vmem:[%s3173_s8] sm:$0xff]  ;;  %2308 = vmatprep.subr.mxu0 %v2430_v49 }
 0x582   : > { %2309 = vmatpush3.msra.mxu0 %v1673_v7 }
 0x584   : > { %v2410_v37 = vpop.eup %2409 }
 0x585   : > { %v1493_v0 = vmul.f32 %v2410_v37, %v3011_v62  ;;  %v2416_v37 = vld [vmem:[%s2507_s19 + $0x8] sm:$0xff] }
 0x588   : > { %v2412_v1 = vpop.eup %2411 }
 0x589   : > { %v1494_v45 = vmul.f32 %v2412_v1, %v3015_v36 }
 0x5ab   : > { %v1481_v43 = vpop.xlane.xlu1 %1480 }
 0x5ac   : > { %2413 = vrcp.f32 %v1481_v43 }
 0x5af   : > { %v1497_v55 = vpop.permute.xlu1 %1496 }
 0x5b0   : > { %2280 = vmatpush3.msra.mxu1 %v1497_v55 }
 0x5b1   : > { %2282 = vmatmul.mubr.msk.f32.vlgmr.msra.gmra.mxu1 %vm498_vm2, %v1489_v53 }
 0x5b2   : > { %2284 = vmatprep.mubr.msk.f32.mxu1 %vm2431_vm1, %v2430_v49 }
 0x5b5   : > { %2285 = vmatmul.mubr.msk.f32.gmra.mxu1 %vm498_vm2, %v1490_v57 }
 0x5b6   : > { %2287 = vmatprep.mubr.msk.f32.mxu1 %vm2431_vm1, %v2430_v49 }
 0x5b9   : > { %2288 = vmatmul.mubr.msk.f32.gmra.mxu1 %vm498_vm2, %v1491_v60  ;;  %v2414_v2 = vpop.eup %2413 }
 0x5ba   : > { %2290 = vmatprep.mubr.msk.f32.mxu1 %vm2431_vm1, %v2430_v49  ;;  %v1495_v50 = vmul.f32 %v2414_v2, %v3022_v23 }
 0x5bd   : > { %2291 = vmatmul.mubr.msk.f32.gmra.mxu1 %vm498_vm2, %v1492_v63 }
 0x5be   : > { %2293 = vmatprep.mubr.msk.f32.mxu1 %vm2431_vm1, %v2430_v49 }
 0x5c1   : > { %2294 = vmatmul.mubr.msk.f32.gmra.mxu1 %vm498_vm2, %v1493_v0 }
 0x5c2   : > { %2296 = vmatprep.mubr.msk.f32.mxu1 %vm2431_vm1, %v2430_v49 }
 0x5c5   : > { %2297 = vmatmul.mubr.msk.f32.gmra.mxu1 %vm498_vm2, %v1494_v45 }
 0x5c6   : > { %2299 = vmatprep.mubr.msk.f32.mxu1 %vm2431_vm1, %v2430_v49 }
 0x5c9   : > { %2300 = vmatmul.mubr.msk.f32.gmra.mxu1 %vm498_vm2, %v1495_v50 }
 0x5e4   : > { %v1222_v3 = vpop.f32.mrf.mxu1 }
 0x5e6   : > { %v2213_v4 = vpop.f32.mrf.mxu1 }
 0x614   : > { %v1227_v9 = vpop.f32.mrf.mxu1 }
 0x616   : > { %v2216_v62 = vpop.f32.mrf.mxu1 }
 0x618   : > { %v1232_v10 = vpop.f32.mrf.mxu1 }
 0x61a   : > { %v2219_v36 = vpop.f32.mrf.mxu1 }
 0x61c   : > { %v1237_v34 = vpop.f32.mrf.mxu1 }
 0x61e   : > { %v2222_v8 = vpop.f32.mrf.mxu1 }
 0x620   : > { %v1242_v6 = vpop.f32.mrf.mxu1 }
 0x622   : > { %v2225_v16 = vpop.f32.mrf.mxu1 }
 0x624   : > { %v1247_v17 = vpop.f32.mrf.mxu1 }
 0x626   : > { %v2228_v20 = vpop.f32.mrf.mxu1 }
 0x628   : > { %v1252_v21 = vpop.f32.mrf.mxu1 }
 0x62a   : > { %v2231_v23 = vpop.f32.mrf.mxu1 }
 0x671   : > { %v1604_v24 = vpop.f32.mrf.mxu1 }
 0x672   : > { %1645 = vrot.lane.b32.xlu0 %v1604_v24, %s2435_s21  ;;  %v2420_v24 = vld [vmem:[%s2507_s19 + $0x28] sm:$0xff] }
 0x673   : > { %v2283_v28 = vpop.f32.mrf.mxu1 }
 0x675   : > { %v1609_v29 = vpop.f32.mrf.mxu1 }
 0x676   : > { %1647 = vrot.lane.b32.xlu0 %v1609_v29, %s2435_s21 }
 0x677   : > { %v2286_v27 = vpop.f32.mrf.mxu1 }
 0x679   : > { %v1614_v11 = vpop.f32.mrf.mxu1 }
 0x67a   : > { %1649 = vrot.lane.b32.xlu0 %v1614_v11, %s2435_s21 }
 0x67b   : > { %v2289_v13 = vpop.f32.mrf.mxu1 }
 0x67c   : > { %v2421_v13 = vld [vmem:[%s2507_s19 + $0x30] sm:$0xff] }
 0x67d   : > { %v1619_v15 = vpop.f32.mrf.mxu1 }
 0x67e   : > { %1651 = vrot.lane.b32.xlu1 %v1619_v15, %s2435_s21 }
 0x67f   : > { %v2292_v30 = vpop.f32.mrf.mxu1 }
 0x681   : > { %v1624_v31 = vpop.f32.mrf.mxu1 }
 0x682   : > { %1653 = vrot.lane.b32.xlu0 %v1624_v31, %s2435_s21 }
 0x683   : > { %v2295_v33 = vpop.f32.mrf.mxu1 }
 0x685   : > { %v1629_v19 = vpop.f32.mrf.mxu1 }
 0x686   : > { %1655 = vrot.lane.b32.xlu1 %v1629_v19, %s2435_s21 }
 0x687   : > { %v2298_v38 = vpop.f32.mrf.mxu1 }
 0x689   : > { %v1634_v35 = vpop.f32.mrf.mxu1 }
 0x68a   : > { %1657 = vrot.lane.b32.xlu0 %v1634_v35, %s2435_s21 }
 0x68b   : > { %v2301_v39 = vpop.f32.mrf.mxu1 }
 0x6e4   : > { %v1646_v12 = vpop.permute.xlu0 %1645 }
 0x6e5   : > { %v1666_v40 = vsel %vm887_vm3, %v1222_v3, %v1646_v12  ;;  %v2417_v3 = vld [vmem:[%s2507_s19 + $0x10] sm:$0xff] }
 0x6e6   : > { %2311 = vmatmul.mubr.msk.f32.vlgmr.msra.gmra.mxu0 %vm372_vm0, %v1666_v40 }
 0x6e7   : > { %2313 = vmatprep.mubr.msk.f32.mxu0 %vm2431_vm1, %v2430_v49 }
 0x6e8   : > { %v1648_v32 = vpop.permute.xlu0 %1647 }
 0x6e9   : > { %v1667_v42 = vsel %vm887_vm3, %v1227_v9, %v1648_v32  ;;  %v2418_v9 = vld [vmem:[%s2507_s19 + $0x18] sm:$0xff] }
 0x6ea   : > { %2314 = vmatmul.mubr.msk.f32.gmra.mxu0 %vm372_vm0, %v1667_v42 }
 0x6eb   : > { %2316 = vmatprep.mubr.msk.f32.mxu0 %vm2431_vm1, %v2430_v49 }
 0x6ec   : > { %v1650_v26 = vpop.permute.xlu0 %1649 }
 0x6ed   : > { %v1668_v14 = vsel %vm887_vm3, %v1232_v10, %v1650_v26 }
 0x6ee   : > { %2317 = vmatmul.mubr.msk.f32.gmra.mxu0 %vm372_vm0, %v1668_v14 }
 0x6ef   : > { %2319 = vmatprep.mubr.msk.f32.mxu0 %vm2431_vm1, %v2430_v49 }
 0x6f0   : > { %v1652_v41 = vpop.permute.xlu1 %1651 }
 0x6f1   : > { %v1669_v22 = vsel %vm887_vm3, %v1237_v34, %v1652_v41 }
 0x6f2   : > { %2320 = vmatmul.mubr.msk.f32.gmra.mxu0 %vm372_vm0, %v1669_v22 }
 0x6f3   : > { %2322 = vmatprep.mubr.msk.f32.mxu0 %vm2431_vm1, %v2430_v49 }
 0x6f4   : > { %v1654_v25 = vpop.permute.xlu0 %1653 }
 0x6f5   : > { %v1670_v44 = vsel %vm887_vm3, %v1242_v6, %v1654_v25  ;;  %v2419_v6 = vld [vmem:[%s2507_s19 + $0x20] sm:$0xff] }
 0x6f6   : > { %2323 = vmatmul.mubr.msk.f32.gmra.mxu0 %vm372_vm0, %v1670_v44 }
 0x6f7   : > { %2325 = vmatprep.mubr.msk.f32.mxu0 %vm2431_vm1, %v2430_v49 }
 0x6f8   : > { %v1656_v46 = vpop.permute.xlu1 %1655 }
 0x6f9   : > { %v1671_v47 = vsel %vm887_vm3, %v1247_v17, %v1656_v46 }
 0x6fa   : > { %2326 = vmatmul.mubr.msk.f32.gmra.mxu0 %vm372_vm0, %v1671_v47 }
 0x6fb   : > { %2328 = vmatprep.mubr.msk.f32.mxu0 %vm2431_vm1, %v2430_v49 }
 0x6fc   : > { %v1658_v48 = vpop.permute.xlu0 %1657 }
 0x6fd   : > { %v1672_v18 = vsel %vm887_vm3, %v1252_v21, %v1658_v48 }
 0x6fe   : > { %2329 = vmatmul.mubr.msk.f32.gmra.mxu0 %vm372_vm0, %v1672_v18 }
 0x7a6   : > { %v1771_v43 = vpop.f32.mrf.mxu0 }
 0x7a7   : > { %v1772_v52 = vadd.f32 %v1956_v51, %v1771_v43 }
 0x7a8   : > { %v2312_v53 = vpop.f32.mrf.mxu0 }
 0x7a9   : > { %v1805_v55 = vmul.f32 0.5, %v1772_v52 }
 0x7aa   : > { %v1776_v49 = vpop.f32.mrf.mxu0 }
 0x7ab   : > { %v1812_v57 = vadd.f32 %v2415_v56, %v1805_v55  ;;  %v1777_v59 = vadd.f32 %v1956_v51, %v1776_v49 }
 0x7ac   : > { %v2315_v60 = vpop.f32.mrf.mxu0 }
 0x7ad   : > { %1819 = vst.msk [vmem:[%s3139_s26] sm:$0xff] %vm372_vm0, %v1812_v57  ;;  %v1806_v61 = vmul.f32 0.5, %v1777_v59 }
 0x7ae   : > { %v1781_v63 = vpop.f32.mrf.mxu0 }
 0x7af   : > { %v1813_v0 = vadd.f32 %v2416_v37, %v1806_v61  ;;  %v1782_v1 = vadd.f32 %v1956_v51, %v1781_v63 }
 0x7b0   : > { %v2318_v45 = vpop.f32.mrf.mxu0 }
 0x7b1   : > { %1820 = vst.msk [vmem:[%s3139_s26 + $0x8] sm:$0xff] %vm372_vm0, %v1813_v0  ;;  %v1807_v2 = vmul.f32 0.5, %v1782_v1 }
 0x7b2   : > { %v1786_v50 = vpop.f32.mrf.mxu0 }
 0x7b3   : > { %v1814_v4 = vadd.f32 %v2417_v3, %v1807_v2  ;;  %v1787_v54 = vadd.f32 %v1956_v51, %v1786_v50 }
 0x7b4   : > { %v2321_v58 = vpop.f32.mrf.mxu0 }
 0x7b5   : > { %1821 = vst.msk [vmem:[%s3139_s26 + $0x10] sm:$0xff] %vm372_vm0, %v1814_v4  ;;  %v1808_v5 = vmul.f32 0.5, %v1787_v54 }
 0x7b6   : > { %v1791_v7 = vpop.f32.mrf.mxu0 }
 0x7b7   : > { %v1815_v62 = vadd.f32 %v2418_v9, %v1808_v5  ;;  %v1792_v10 = vadd.f32 %v1956_v51, %v1791_v7 }
 0x7b8   : > { %v2324_v36 = vpop.f32.mrf.mxu0 }
 0x7b9   : > { %1822 = vst.msk [vmem:[%s3139_s26 + $0x18] sm:$0xff] %vm372_vm0, %v1815_v62  ;;  %v1809_v34 = vmul.f32 0.5, %v1792_v10 }
 0x7ba   : > { %v1796_v8 = vpop.f32.mrf.mxu0 }
 0x7bb   : > { %v1816_v16 = vadd.f32 %v2419_v6, %v1809_v34  ;;  %v1797_v17 = vadd.f32 %v1956_v51, %v1796_v8 }
 0x7bc   : > { %v2327_v20 = vpop.f32.mrf.mxu0 }
 0x7bd   : > { %1823 = vst.msk [vmem:[%s3139_s26 + $0x20] sm:$0xff] %vm372_vm0, %v1816_v16  ;;  %v1810_v21 = vmul.f32 0.5, %v1797_v17 }
 0x7be   : > { %v1801_v23 = vpop.f32.mrf.mxu0 }
 0x7bf   : > { %v1817_v28 = vadd.f32 %v2420_v24, %v1810_v21  ;;  %v1802_v29 = vadd.f32 %v1956_v51, %v1801_v23 }
 0x7c0   : > { %v2330_v27 = vpop.f32.mrf.mxu0 }
 0x7c1   : > { %1824 = vst.msk [vmem:[%s3139_s26 + $0x28] sm:$0xff] %vm372_vm0, %v1817_v28  ;;  %v1811_v11 = vmul.f32 0.5, %v1802_v29 }
 0x7c3   : > { %v1818_v15 = vadd.f32 %v2421_v13, %v1811_v11 }
 0x7c5   : > { %1825 = vst.msk [vmem:[%s3139_s26 + $0x30] sm:$0xff] %vm372_vm0, %v1818_v15 }
 0x7c6 PF: > { %s20_s13 = sadd.s32 1, %s2428_s13  }
 0x7c7   : > { %p17_p4 = scmp.ge.s32.totalorder %s20_s13, 4  }
 0x7c9   :  { %19 = sbr.rel (!%p17_p4) target bundleno = 1 (0x1), region = 90 }

// kernel: vit_forward.15
= control target key start
LH: loop header
LB: loop body
LE: loop exit
PB: predicated region body
PF: predicated region fallthrough
CT: control target
= control target key end

     0   :  { %s1021_s24 = smov 0   ;;  %s1211_s0 = inlined_call_operand.vmem [shape: f32[112,32], index: 0, kind: input, shape index: {}]   ;;  %s1212_s1 = inlined_call_operand.vmem [shape: f32[1,32], index: 1, kind: input, shape index: {}]   ;;  %s1213_s2 = inlined_call_operand.vmem [shape: f32[1,32], index: 2, kind: input, shape index: {}]   ;;  %s1214_s3 = inlined_call_operand.vmem [shape: f32[32,64], index: 3, kind: input, shape index: {}]   ;;  %s1215_s4 = inlined_call_operand.vmem [shape: f32[1,64], index: 4, kind: input, shape index: {}]   ;;  %s1216_s5 = inlined_call_operand.vmem [shape: f32[64,64], index: 5, kind: input, shape index: {}]   ;;  %s1217_s6 = inlined_call_operand.vmem [shape: f32[1,64], index: 6, kind: input, shape index: {}]   ;;  %s1218_s7 = inlined_call_operand.vmem [shape: f32[112,64], index: 7, kind: output, shape index: {}]  }
   0x1 LB: > { %s784_s25 = sadd.s32 4294967295, %s977_s24   ;;  %p788_p0 = scmp.ge.s32.totalorder %s977_s24, 1  ;;  %s977_s24 = sphi %s1021_s24, %s17_s24  }
   0x2   : > { %p238_p1 = scmp.lt.s32.totalorder %s977_s24, 3 }
   0x4   : > { %p239_p2 = pnand %p788_p0, %p238_p1 }
   0x5   : > { %s270_s26 = smul.u32 (!%p239_p2), 7, %s784_s25 }
   0x6   : > { %242 = sbr.rel (%p239_p2) target bundleno = 773 (0x305), region = 48 }
   0x7   : > { %p271_p3 = scmp.lt.s32.totalorder (!%p239_p2), %s270_s26, 13 }
   0xb   : > { %s1220_s26 = smov (!%p271_p3, %s270_s26), 13  ;;  %vm291_vm0 = vcmask 261120   ;;  %v979_v49 = vmov 0.0   ;;  %v413_v50 = vld [vmem:[%s1214_s3 + $0x18] sm:$0xff]  ;;  %v412_v51 = vld [vmem:[%s1214_s3 + $0x10] sm:$0xff]  ;;  %vm980_vm1 = vmmov 0  }
   0xc   : > { %s789_s27 = sshll.u32 %s1220_s26, 3  ;;  %837 = vmatprep.subr.mxu0 %v979_v49  ;;  %903 = vmatprep.subr.mxu1 %v979_v49  ;;  %v411_v52 = vld [vmem:[%s1214_s3 + $0x8] sm:$0xff]  ;;  %v410_v53 = vld [vmem:[%s1214_s3] sm:$0xff]  ;;  %vm592_vm2 = vcmask 523264  }
   0xd   : > { %s274_s30 = scalar_lea.vmem %s1211_s0, %s789_s27  ;;  %838 = vmatpush3.msra.mxu0 %v413_v50  ;;  %845 = vmatprep.mubr.msk.f32.mxu0 %vm980_vm1, %v979_v49  ;;  %v793_v50 = vld [vmem:[%s1215_s4] ss:$0 sm:$0xff]  ;;  %s280_s22 = scalar_lea.vmem %s1218_s7, %s789_s27 }
   0xe   : > { %v282_v0 = vld [vmem:[%s274_s30] sm:$0xff]  ;;  %v284_v1 = vld [vmem:[%s274_s30 + $0x10] sm:$0xff]  ;;  %v283_v2 = vld [vmem:[%s274_s30 + $0x8] sm:$0xff]  ;;  %839 = vmatprep.subr.mxu0 %v979_v49  ;;  %885 = vmatprep.mubr.msk.f32.mxu1 %vm980_vm1, %v979_v49 }
   0xf   : > { %v292_v3 = vsel %vm291_vm0, %v282_v0, 0.0  ;;  %v298_v4 = vsel %vm291_vm0, %v284_v1, 0.0  ;;  %v285_v5 = vld [vmem:[%s274_s30 + $0x18] sm:$0xff]  ;;  %v295_v6 = vsel %vm291_vm0, %v283_v2, 0.0  ;;  %v286_v8 = vld [vmem:[%s274_s30 + $0x20] sm:$0xff]  ;;  %v287_v9 = vld [vmem:[%s274_s30 + $0x28] sm:$0xff]  ;;  %840 = vmatpush3.msra.mxu0 %v412_v51 }
  0x10   : > { %293 = vadd.xlane.f32.xlu0 %v292_v3  ;;  %299 = vadd.xlane.f32.xlu1 %v298_v4  ;;  %v301_v7 = vsel %vm291_vm0, %v285_v5, 0.0  ;;  %v304_v10 = vsel %vm291_vm0, %v286_v8, 0.0  ;;  %v307_v11 = vsel %vm291_vm0, %v287_v9, 0.0  ;;  %v288_v12 = vld [vmem:[%s274_s30 + $0x30] sm:$0xff] }
  0x11   : > { %v310_v13 = vsel %vm291_vm0, %v288_v12, 0.0  ;;  %841 = vmatprep.subr.mxu0 %v979_v49 }
  0x12   : > { %842 = vmatpush3.msra.mxu0 %v411_v52 }
  0x13   : > { %843 = vmatprep.subr.mxu0 %v979_v49 }
  0x14   : > { %296 = vadd.xlane.f32.xlu0 %v295_v6  ;;  %302 = vadd.xlane.f32.xlu1 %v301_v7 }
  0x15   : > { %844 = vmatpush3.msra.mxu0 %v410_v53 }
  0x16   : > { %866 = vmatprep.subr.mxu0 %v979_v49 }
  0x18   : > { %305 = vadd.xlane.f32.xlu0 %v304_v10  ;;  %308 = vadd.xlane.f32.xlu1 %v307_v11  ;;  %v791_v11 = vld [vmem:[%s1212_s1] ss:$0 sm:$0xff] }
  0x1c   : > { %311 = vadd.xlane.f32.xlu0 %v310_v13 }
  0x99   : > { %v294_v14 = vpop.xlane.xlu0 %293  ;;  %v300_v15 = vpop.xlane.xlu1 %299 }
  0x9a   : > { %v314_v16 = vmul.f32 0.03125, %v294_v14  ;;  %v316_v17 = vmul.f32 0.03125, %v300_v15  ;;  %v792_v14 = vld [vmem:[%s1213_s2] ss:$0 sm:$0xff] }
  0x9c   : > { %v1044_v18 = vsub.f32 %v282_v0, %v314_v16  ;;  %v1046_v19 = vsub.f32 %v284_v1, %v316_v17 }
  0x9d   : > { %v297_v20 = vpop.xlane.xlu0 %296  ;;  %v303_v21 = vpop.xlane.xlu1 %302 }
  0x9e   : > { %v315_v22 = vmul.f32 0.03125, %v297_v20  ;;  %v317_v23 = vmul.f32 0.03125, %v303_v21  ;;  %v328_v24 = vmul.f32 %v1044_v18, %v1044_v18  ;;  %v330_v25 = vmul.f32 %v1046_v19, %v1046_v19 }
  0xa0   : > { %v1052_v26 = vsub.f32 %v283_v2, %v315_v22  ;;  %v1054_v27 = vsub.f32 %v285_v5, %v317_v23  ;;  %v335_v28 = vsel %vm291_vm0, %v328_v24, 0.0  ;;  %v341_v31 = vsel %vm291_vm0, %v330_v25, 0.0 }
  0xa1   : > { %336 = vadd.xlane.f32.xlu1 %v335_v28  ;;  %v306_v29 = vpop.xlane.xlu0 %305  ;;  %v309_v30 = vpop.xlane.xlu1 %308 }
  0xa2   : > { %v318_v32 = vmul.f32 0.03125, %v306_v29  ;;  %v319_v33 = vmul.f32 0.03125, %v309_v30  ;;  %v329_v34 = vmul.f32 %v1052_v26, %v1052_v26  ;;  %v331_v35 = vmul.f32 %v1054_v27, %v1054_v27 }
  0xa4   : > { %v1062_v36 = vsub.f32 %v286_v8, %v318_v32  ;;  %v1064_v37 = vsub.f32 %v287_v9, %v319_v33  ;;  %v338_v38 = vsel %vm291_vm0, %v329_v34, 0.0  ;;  %v344_v41 = vsel %vm291_vm0, %v331_v35, 0.0 }
  0xa5   : > { %342 = vadd.xlane.f32.xlu1 %v341_v31  ;;  %339 = vadd.xlane.f32.xlu0 %v338_v38  ;;  %v312_v39 = vpop.xlane.xlu0 %311 }
  0xa6   : > { %v320_v40 = vmul.f32 0.03125, %v312_v39  ;;  %v332_v42 = vmul.f32 %v1062_v36, %v1062_v36  ;;  %v333_v43 = vmul.f32 %v1064_v37, %v1064_v37 }
  0xa8   : > { %v1072_v44 = vsub.f32 %v288_v12, %v320_v40  ;;  %v347_v45 = vsel %vm291_vm0, %v332_v42, 0.0  ;;  %v350_v46 = vsel %vm291_vm0, %v333_v43, 0.0  ;;  %v583_v42 = vld [vmem:[%s1216_s5 + $0x30] sm:$0xff]  ;;  %v582_v43 = vld [vmem:[%s1216_s5 + $0x28] sm:$0xff] }
  0xa9   : > { %345 = vadd.xlane.f32.xlu0 %v344_v41  ;;  %348 = vadd.xlane.f32.xlu1 %v347_v45  ;;  %v584_v41 = vld [vmem:[%s1216_s5 + $0x38] sm:$0xff] }
  0xaa   : > { %v334_v47 = vmul.f32 %v1072_v44, %v1072_v44  ;;  %911 = vmatpush3.msra.mxu1 %v584_v41  ;;  %v580_v45 = vld [vmem:[%s1216_s5 + $0x18] sm:$0xff] }
  0xab   : > { %904 = vmatprep.subr.mxu1 %v979_v49 }
  0xac   : > { %v353_v48 = vsel %vm291_vm0, %v334_v47, 0.0  ;;  %912 = vmatpush3.msra.mxu1 %v583_v42  ;;  %v578_v47 = vld [vmem:[%s1216_s5 + $0x8] sm:$0xff] }
  0xad   : > { %351 = vadd.xlane.f32.xlu0 %v350_v46  ;;  %354 = vadd.xlane.f32.xlu1 %v353_v48  ;;  %v579_v46 = vld [vmem:[%s1216_s5 + $0x10] sm:$0xff]  ;;  %v577_v48 = vld [vmem:[%s1216_s5] sm:$0xff] }
  0xae   : > { %905 = vmatprep.subr.mxu1 %v979_v49 }
  0xaf   : > { %913 = vmatpush3.msra.mxu1 %v582_v43 }
  0xb0   : > { %906 = vmatprep.subr.mxu1 %v979_v49 }
 0x12a   : > { %v337_v54 = vpop.xlane.xlu1 %336 }
 0x12b   : > { %v356_v55 = vmul.f32 0.03125, %v337_v54 }
 0x12d   : > { %v363_v56 = vadd.f32 1e-05, %v356_v55 }
 0x12e   : > { %v343_v57 = vpop.xlane.xlu1 %342  ;;  %v340_v58 = vpop.xlane.xlu0 %339 }
 0x12f   : > { %929 = vrsqrt.f32 %v363_v56  ;;  %v358_v59 = vmul.f32 0.03125, %v343_v57  ;;  %v357_v60 = vmul.f32 0.03125, %v340_v58 }
 0x131   : > { %v365_v61 = vadd.f32 1e-05, %v358_v59  ;;  %v364_v62 = vadd.f32 1e-05, %v357_v60 }
 0x132   : > { %v349_v63 = vpop.xlane.xlu1 %348  ;;  %v346_v0 = vpop.xlane.xlu0 %345 }
 0x133   : > { %931 = vrsqrt.f32 %v365_v61  ;;  %v360_v1 = vmul.f32 0.03125, %v349_v63  ;;  %v359_v2 = vmul.f32 0.03125, %v346_v0 }
 0x134   : > { %933 = vrsqrt.f32 %v364_v62 }
 0x135   : > { %v366_v3 = vadd.f32 1e-05, %v359_v2  ;;  %v367_v4 = vadd.f32 1e-05, %v360_v1 }
 0x136   : > { %v352_v5 = vpop.xlane.xlu0 %351  ;;  %v355_v6 = vpop.xlane.xlu1 %354 }
 0x137   : > { %v361_v7 = vmul.f32 0.03125, %v352_v5  ;;  %935 = vrsqrt.f32 %v366_v3  ;;  %v362_v8 = vmul.f32 0.03125, %v355_v6 }
 0x138   : > { %937 = vrsqrt.f32 %v367_v4 }
 0x139   : > { %v368_v9 = vadd.f32 1e-05, %v361_v7  ;;  %v369_v13 = vadd.f32 1e-05, %v362_v8 }
 0x13b   : > { %939 = vrsqrt.f32 %v368_v9 }
 0x13c   : > { %v930_v10 = vpop.eup %929  ;;  %941 = vrsqrt.f32 %v369_v13 }
 0x13d   : > { %v377_v12 = vmul.f32 %v930_v10, %v1044_v18 }
 0x13f   : > { %v390_v15 = vmul.f32 %v791_v11, %v377_v12 }
 0x140   : > { %v932_v16 = vpop.eup %931 }
 0x141   : > { %v934_v17 = vpop.eup %933  ;;  %v403_v20 = vadd.f32 %v792_v14, %v390_v15  ;;  %v379_v22 = vmul.f32 %v932_v16, %v1046_v19 }
 0x142   : > { %v378_v21 = vmul.f32 %v934_v17, %v1052_v26 }
 0x143   : > { %846 = vmatmul.mubr.msk.f32.vlgmr.msra.gmra.mxu0 %vm291_vm0, %v403_v20  ;;  %v392_v25 = vmul.f32 %v791_v11, %v379_v22 }
 0x144   : > { %848 = vmatprep.mubr.msk.f32.mxu0 %vm980_vm1, %v979_v49  ;;  %v391_v18 = vmul.f32 %v791_v11, %v378_v21  ;;  %v936_v23 = vpop.eup %935  ;;  %867 = vmatpush3.msra.mxu0 %v584_v41 }
 0x145   : > { %v380_v28 = vmul.f32 %v936_v23, %v1054_v27  ;;  %v938_v29 = vpop.eup %937  ;;  %v405_v26 = vadd.f32 %v792_v14, %v392_v25  ;;  %868 = vmatprep.subr.mxu0 %v979_v49 }
 0x146   : > { %v404_v24 = vadd.f32 %v792_v14, %v391_v18  ;;  %v381_v19 = vmul.f32 %v938_v29, %v1062_v36  ;;  %869 = vmatpush3.msra.mxu0 %v583_v42 }
 0x147   : > { %v393_v30 = vmul.f32 %v791_v11, %v380_v28  ;;  %870 = vmatprep.subr.mxu0 %v979_v49 }
 0x148   : > { %849 = vmatmul.mubr.msk.f32.gmra.mxu0 %vm291_vm0, %v404_v24  ;;  %v940_v31 = vpop.eup %939  ;;  %v394_v33 = vmul.f32 %v791_v11, %v381_v19 }
 0x149   : > { %851 = vmatprep.mubr.msk.f32.mxu0 %vm980_vm1, %v979_v49  ;;  %v406_v32 = vadd.f32 %v792_v14, %v393_v30  ;;  %v382_v27 = vmul.f32 %v940_v31, %v1064_v37  ;;  %v942_v34 = vpop.eup %941  ;;  %871 = vmatpush3.msra.mxu0 %v582_v43  ;;  %v801_v43 = vld [vmem:[%s1217_s6] ss:$0 sm:$0xff] }
 0x14a   : > { %v407_v35 = vadd.f32 %v792_v14, %v394_v33  ;;  %v383_v36 = vmul.f32 %v942_v34, %v1072_v44  ;;  %872 = vmatprep.subr.mxu0 %v979_v49  ;;  %v581_v44 = vld [vmem:[%s1216_s5 + $0x20] sm:$0xff] }
 0x14b   : > { %v395_v38 = vmul.f32 %v791_v11, %v382_v27  ;;  %873 = vmatpush3.msra.mxu0 %v581_v44  ;;  %914 = vmatpush3.msra.mxu1 %v581_v44 }
 0x14c   : > { %852 = vmatmul.mubr.msk.f32.gmra.mxu0 %vm291_vm0, %v405_v26  ;;  %v396_v40 = vmul.f32 %v791_v11, %v383_v36  ;;  %874 = vmatprep.subr.mxu0 %v979_v49 }
 0x14d   : > { %854 = vmatprep.mubr.msk.f32.mxu0 %vm980_vm1, %v979_v49  ;;  %v408_v39 = vadd.f32 %v792_v14, %v395_v38  ;;  %907 = vmatprep.subr.mxu1 %v979_v49 }
 0x14e   : > { %v409_v37 = vadd.f32 %v792_v14, %v396_v40  ;;  %875 = vmatpush3.msra.mxu0 %v580_v45  ;;  %915 = vmatpush3.msra.mxu1 %v580_v45 }
 0x14f   : > { %876 = vmatprep.subr.mxu0 %v979_v49  ;;  %908 = vmatprep.subr.mxu1 %v979_v49 }
 0x150   : > { %855 = vmatmul.mubr.msk.f32.gmra.mxu0 %vm291_vm0, %v406_v32  ;;  %916 = vmatpush3.msra.mxu1 %v579_v46 }
 0x151   : > { %857 = vmatprep.mubr.msk.f32.mxu0 %vm980_vm1, %v979_v49  ;;  %877 = vmatpush3.msra.mxu0 %v579_v46 }
 0x152   : > { %878 = vmatprep.subr.mxu0 %v979_v49  ;;  %909 = vmatprep.subr.mxu1 %v979_v49 }
 0x153   : > { %879 = vmatpush3.msra.mxu0 %v578_v47  ;;  %917 = vmatpush3.msra.mxu1 %v578_v47 }
 0x154   : > { %858 = vmatmul.mubr.msk.f32.gmra.mxu0 %vm291_vm0, %v407_v35  ;;  %880 = vmatprep.subr.mxu0 %v979_v49 }
 0x155   : > { %860 = vmatprep.mubr.msk.f32.mxu0 %vm980_vm1, %v979_v49  ;;  %910 = vmatprep.subr.mxu1 %v979_v49 }
 0x156   : > { %881 = vmatpush3.msra.mxu0 %v577_v48  ;;  %918 = vmatpush3.msra.mxu1 %v577_v48 }
 0x158   : > { %861 = vmatmul.mubr.msk.f32.gmra.mxu0 %vm291_vm0, %v408_v39 }
 0x159   : > { %863 = vmatprep.mubr.msk.f32.mxu0 %vm980_vm1, %v979_v49 }
 0x15c   : > { %864 = vmatmul.mubr.msk.f32.gmra.mxu0 %vm291_vm0, %v409_v37 }
 0x15d   : > { %882 = vmatprep.mubr.msk.f32.mxu0 %vm980_vm1, %v979_v49 }
 0x203   : > { %v508_v51 = vpop.f32.mrf.mxu0 }
 0x204   : > { %v509_v52 = vadd.f32 %v793_v50, %v508_v51 }
 0x205   : > { %v847_v53 = vpop.f32.mrf.mxu0 }
 0x206   : > { %v549_v54 = vmul.f32 0.70710677, %v509_v52  ;;  %v542_v6 = vmul.f32 0.5, %v509_v52 }
 0x208   : > { %943 = verf.f32 %v549_v54  ;;  %v513_v55 = vpop.f32.mrf.mxu0 }
 0x209   : > { %v514_v56 = vadd.f32 %v793_v50, %v513_v55 }
 0x20a   : > { %v850_v57 = vpop.f32.mrf.mxu0 }
 0x20b   : > { %v550_v58 = vmul.f32 0.70710677, %v514_v56  ;;  %v543_v15 = vmul.f32 0.5, %v514_v56 }
 0x20c   : > { %v518_v59 = vpop.f32.mrf.mxu0 }
 0x20d   : > { %945 = verf.f32 %v550_v58  ;;  %v519_v60 = vadd.f32 %v793_v50, %v518_v59 }
 0x20e   : > { %v853_v61 = vpop.f32.mrf.mxu0 }
 0x20f   : > { %v551_v62 = vmul.f32 0.70710677, %v519_v60  ;;  %v544_v24 = vmul.f32 0.5, %v519_v60 }
 0x210   : > { %v523_v63 = vpop.f32.mrf.mxu0 }
 0x211   : > { %947 = verf.f32 %v551_v62  ;;  %v524_v0 = vadd.f32 %v793_v50, %v523_v63 }
 0x212   : > { %v856_v1 = vpop.f32.mrf.mxu0 }
 0x213   : > { %v552_v2 = vmul.f32 0.70710677, %v524_v0  ;;  %v545_v30 = vmul.f32 0.5, %v524_v0 }
 0x214   : > { %v528_v3 = vpop.f32.mrf.mxu0 }
 0x215   : > { %v944_v4 = vpop.eup %943  ;;  %949 = verf.f32 %v552_v2  ;;  %v529_v5 = vadd.f32 %v793_v50, %v528_v3 }
 0x216   : > { %v563_v7 = vadd.f32 1.0, %v944_v4  ;;  %v859_v8 = vpop.f32.mrf.mxu0 }
 0x217   : > { %v553_v9 = vmul.f32 0.70710677, %v529_v5  ;;  %v546_v33 = vmul.f32 0.5, %v529_v5 }
 0x218   : > { %v570_v10 = vmul.f32 %v563_v7, %v542_v6  ;;  %v533_v11 = vpop.f32.mrf.mxu0 }
 0x219   : > { %951 = verf.f32 %v553_v9  ;;  %v534_v12 = vadd.f32 %v793_v50, %v533_v11 }
 0x21a   : > { %v946_v13 = vpop.eup %945  ;;  %v862_v14 = vpop.f32.mrf.mxu0  ;;  %883 = vmatmul.mubr.msk.f32.vlgmr.msra.gmra.mxu0 %vm592_vm2, %v570_v10 }
 0x21b   : > { %v564_v16 = vadd.f32 1.0, %v946_v13  ;;  %v554_v17 = vmul.f32 0.70710677, %v534_v12  ;;  %v547_v38 = vmul.f32 0.5, %v534_v12 }
 0x21c   : > { %v538_v20 = vpop.f32.mrf.mxu0 }
 0x21d   : > { %v571_v21 = vmul.f32 %v564_v16, %v543_v15  ;;  %953 = verf.f32 %v554_v17  ;;  %v539_v22 = vadd.f32 %v793_v50, %v538_v20 }
 0x21e   : > { %v948_v18 = vpop.eup %947  ;;  %v865_v23 = vpop.f32.mrf.mxu0 }
 0x21f   : > { %v565_v25 = vadd.f32 1.0, %v948_v18  ;;  %v555_v28 = vmul.f32 0.70710677, %v539_v22  ;;  %886 = vmatmul.mubr.msk.f32.vlgmr.msra.gmra.mxu1 %vm592_vm2, %v571_v21  ;;  %v548_v37 = vmul.f32 0.5, %v539_v22 }
 0x220   : > { %888 = vmatprep.mubr.msk.f32.mxu1 %vm980_vm1, %v979_v49 }
 0x221   : > { %v572_v29 = vmul.f32 %v565_v25, %v544_v24  ;;  %955 = verf.f32 %v555_v28 }
 0x222   : > { %v950_v26 = vpop.eup %949 }
 0x223   : > { %v566_v19 = vadd.f32 1.0, %v950_v26  ;;  %889 = vmatmul.mubr.msk.f32.gmra.mxu1 %vm592_vm2, %v572_v29 }
 0x224   : > { %891 = vmatprep.mubr.msk.f32.mxu1 %vm980_vm1, %v979_v49 }
 0x225   : > { %v573_v31 = vmul.f32 %v566_v19, %v545_v30 }
 0x226   : > { %v952_v32 = vpop.eup %951 }
 0x227   : > { %v567_v27 = vadd.f32 1.0, %v952_v32  ;;  %892 = vmatmul.mubr.msk.f32.gmra.mxu1 %vm592_vm2, %v573_v31 }
 0x228   : > { %894 = vmatprep.mubr.msk.f32.mxu1 %vm980_vm1, %v979_v49 }
 0x229   : > { %v574_v34 = vmul.f32 %v567_v27, %v546_v33 }
 0x22a   : > { %v954_v35 = vpop.eup %953 }
 0x22b   : > { %v568_v36 = vadd.f32 1.0, %v954_v35  ;;  %895 = vmatmul.mubr.msk.f32.gmra.mxu1 %vm592_vm2, %v574_v34 }
 0x22c   : > { %897 = vmatprep.mubr.msk.f32.mxu1 %vm980_vm1, %v979_v49 }
 0x22d   : > { %v575_v39 = vmul.f32 %v568_v36, %v547_v38 }
 0x22e   : > { %v956_v40 = vpop.eup %955 }
 0x22f   : > { %v569_v41 = vadd.f32 1.0, %v956_v40  ;;  %898 = vmatmul.mubr.msk.f32.gmra.mxu1 %vm592_vm2, %v575_v39 }
 0x230   : > { %900 = vmatprep.mubr.msk.f32.mxu1 %vm980_vm1, %v979_v49 }
 0x231   : > { %v576_v42 = vmul.f32 %v569_v41, %v548_v37 }
 0x233   : > { %901 = vmatmul.mubr.msk.f32.gmra.mxu1 %vm592_vm2, %v576_v42 }
 0x2da   : > { %v680_v44 = vpop.f32.mrf.mxu0 }
 0x2db   : > { %v681_v45 = vadd.f32 %v801_v43, %v680_v44 }
 0x2dc   : > { %v884_v46 = vpop.f32.mrf.mxu0 }
 0x2dd   : > { %957 = vtanh.f32 %v681_v45 }
 0x2df   : > { %v685_v47 = vpop.f32.mrf.mxu1 }
 0x2e0   : > { %v686_v48 = vadd.f32 %v801_v43, %v685_v47 }
 0x2e1   : > { %v887_v50 = vpop.f32.mrf.mxu1 }
 0x2e2   : > { %959 = vtanh.f32 %v686_v48 }
 0x2e3   : > { %v690_v51 = vpop.f32.mrf.mxu1 }
 0x2e4   : > { %v691_v52 = vadd.f32 %v801_v43, %v690_v51 }
 0x2e5   : > { %v890_v53 = vpop.f32.mrf.mxu1 }
 0x2e6   : > { %961 = vtanh.f32 %v691_v52 }
 0x2e7   : > { %v695_v49 = vpop.f32.mrf.mxu1 }
 0x2e8   : > { %v696_v54 = vadd.f32 %v801_v43, %v695_v49 }
 0x2e9   : > { %v893_v55 = vpop.f32.mrf.mxu1 }
 0x2ea   : > { %v958_v56 = vpop.eup %957  ;;  %963 = vtanh.f32 %v696_v54 }
 0x2eb   : > { %721 = vst.msk [vmem:[%s280_s22] sm:$0xff] %vm592_vm2, %v958_v56  ;;  %v700_v57 = vpop.f32.mrf.mxu1 }
 0x2ec   : > { %v701_v58 = vadd.f32 %v801_v43, %v700_v57 }
 0x2ed   : > { %v896_v59 = vpop.f32.mrf.mxu1 }
 0x2ee   : > { %965 = vtanh.f32 %v701_v58 }
 0x2ef   : > { %v960_v60 = vpop.eup %959  ;;  %v705_v61 = vpop.f32.mrf.mxu1 }
 0x2f0   : > { %722 = vst.msk [vmem:[%s280_s22 + $0x8] sm:$0xff] %vm592_vm2, %v960_v60  ;;  %v706_v62 = vadd.f32 %v801_v43, %v705_v61 }
 0x2f1   : > { %v899_v63 = vpop.f32.mrf.mxu1 }
 0x2f2   : > { %967 = vtanh.f32 %v706_v62 }
 0x2f3   : > { %v962_v0 = vpop.eup %961  ;;  %v710_v1 = vpop.f32.mrf.mxu1 }
 0x2f4   : > { %723 = vst.msk [vmem:[%s280_s22 + $0x10] sm:$0xff] %vm592_vm2, %v962_v0  ;;  %v711_v2 = vadd.f32 %v801_v43, %v710_v1 }
 0x2f5   : > { %v902_v3 = vpop.f32.mrf.mxu1 }
 0x2f6   : > { %969 = vtanh.f32 %v711_v2 }
 0x2f7   : > { %v964_v4 = vpop.eup %963 }
 0x2f8   : > { %724 = vst.msk [vmem:[%s280_s22 + $0x18] sm:$0xff] %vm592_vm2, %v964_v4 }
 0x2fb   : > { %v966_v5 = vpop.eup %965 }
 0x2fc   : > { %725 = vst.msk [vmem:[%s280_s22 + $0x20] sm:$0xff] %vm592_vm2, %v966_v5 }
 0x2ff   : > { %v968_v6 = vpop.eup %967 }
 0x300   : > { %726 = vst.msk [vmem:[%s280_s22 + $0x28] sm:$0xff] %vm592_vm2, %v968_v6 }
 0x303   : > { %v970_v7 = vpop.eup %969 }
 0x304   : > { %727 = vst.msk [vmem:[%s280_s22 + $0x30] sm:$0xff] %vm592_vm2, %v970_v7 }
 0x305 PF: > { %s17_s24 = sadd.s32 1, %s977_s24  }
 0x306   : > { %p14_p4 = scmp.ge.s32.totalorder %s17_s24, 4  }
 0x308   :  { %16 = sbr.rel (!%p14_p4) target bundleno = 1 (0x1), region = 78 }

</bundles_post_ra>
